<compile_context>
chip_gen: v6e
topology: v6e:2x2x1
jax: 0.10.0
libtpu: 0.0.40
codegen_flags: <defaults>
</compile_context>

<pallas_src>
import functools
import math

import jax
import jax.numpy as jnp
from jax.experimental import pallas as pl
from jax.experimental.pallas import tpu as pltpu

BN_EPS = 1e-5
PAIRWISE_EPS = 1e-6
VMEM_LIMIT = 32 * 1024 * 1024  # safe on v5e/v6e (128 MiB) and v7x (64 MiB physical)


def _tile(n, cap, mult):
    """Largest divisor of n that is <= cap and a multiple of `mult`; else n (full dim)."""
    cap = min(cap, n)
    for t in range(cap, 0, -1):
        if n % t == 0 and t % mult == 0:
            return t
    return n


def _cparams(sem):
    return pltpu.CompilerParams(dimension_semantics=sem, vmem_limit_bytes=VMEM_LIMIT)


# ---------------------------------------------------------------------------
# Tiled matmul + fused BN affine (+ ReLU)
# ---------------------------------------------------------------------------

def _matmul_affine_kernel(x_ref, w_ref, s_ref, b_ref, o_ref, acc_ref, *, relu):
    k = pl.program_id(2)

    @pl.when(k == 0)
    def _():
        acc_ref[...] = jnp.zeros_like(acc_ref)

    acc_ref[...] += jnp.dot(x_ref[0], w_ref[...], preferred_element_type=jnp.float32)

    @pl.when(k == pl.num_programs(2) - 1)
    def _():
        y = acc_ref[...] * s_ref[...] + b_ref[...]
        if relu:
            y = jnp.maximum(y, 0.0)
        o_ref[0] = y.astype(o_ref.dtype)


def matmul_affine(x, w, scale, bias, relu, out_dtype=jnp.float32,
                  tm_cap=512, tk_cap=512):
    """Y[b] = relu?((X[b] @ W) * scale + bias);  X: (B, M, K), W: (K, N)."""
    B, M, K = x.shape
    N = w.shape[1]
    tm = _tile(M, tm_cap, 8)
    tk = _tile(K, tk_cap, 128)
    x = x.astype(jnp.bfloat16)
    w = w.astype(jnp.bfloat16)
    return pl.pallas_call(
        functools.partial(_matmul_affine_kernel, relu=relu),
        out_shape=jax.ShapeDtypeStruct((B, M, N), out_dtype),
        grid=(B, M // tm, K // tk),
        in_specs=[
            pl.BlockSpec((1, tm, tk), lambda b, i, k: (b, i, k)),
            pl.BlockSpec((tk, N), lambda b, i, k: (k, 0)),
            pl.BlockSpec((1, N), lambda b, i, k: (0, 0)),
            pl.BlockSpec((1, N), lambda b, i, k: (0, 0)),
        ],
        out_specs=pl.BlockSpec((1, tm, N), lambda b, i, k: (b, i, 0)),
        scratch_shapes=[pltpu.VMEM((tm, N), jnp.float32)],
        compiler_params=_cparams(("parallel", "parallel", "arbitrary")),
    )(x, w,
      scale.reshape(1, N).astype(jnp.float32),
      bias.reshape(1, N).astype(jnp.float32))


# ---------------------------------------------------------------------------
# Dilated 3x3 conv + BN + ReLU without materialized im2col
# ---------------------------------------------------------------------------

def _dilated3x3_kernel(x0_ref, x1_ref, x2_ref, w_ref, s_ref, b_ref, o_ref,
                       *, d, pad, w_out):
    acc = jnp.zeros(o_ref.shape[2:], jnp.float32)        # (W, P)
    rows = (x0_ref, x1_ref, x2_ref)
    for ky in range(3):
        row = rows[ky][0, 0]                             # (Wp, Cin) bf16
        for kx in range(3):
            c0 = pad + (kx - 1) * d                      # static offset
            sl = row[c0:c0 + w_out, :]                   # (W, Cin)
            acc = acc + jnp.dot(sl, w_ref[ky, kx], preferred_element_type=jnp.float32)
    y = acc * s_ref[...] + b_ref[...]
    o_ref[0, 0] = jnp.maximum(y, 0.0).astype(o_ref.dtype)


def dilated_conv3x3_bn_relu(xp, w, scale, bias, *, d, pad, h_out, w_out,
                            out_dtype=jnp.bfloat16):
    """xp: (N, H+2*pad, W+2*pad, Cin) shared-max-padded input; w: (3,3,Cin,P)."""
    Nb, Hp, Wp, Cin = xp.shape
    P = w.shape[-1]

    def row_spec(ky):
        off = pad + (ky - 1) * d
        return pl.BlockSpec((1, 1, Wp, Cin), lambda n, h, off=off: (n, h + off, 0, 0))

    return pl.pallas_call(
        functools.partial(_dilated3x3_kernel, d=d, pad=pad, w_out=w_out),
        out_shape=jax.ShapeDtypeStruct((Nb, h_out, w_out, P), out_dtype),
        grid=(Nb, h_out),
        in_specs=[
            row_spec(0), row_spec(1), row_spec(2),
            pl.BlockSpec((3, 3, Cin, P), lambda n, h: (0, 0, 0, 0)),
            pl.BlockSpec((1, P), lambda n, h: (0, 0)),
            pl.BlockSpec((1, P), lambda n, h: (0, 0)),
        ],
        out_specs=pl.BlockSpec((1, 1, w_out, P), lambda n, h: (n, h, 0, 0)),
        compiler_params=_cparams(("parallel", "parallel")),
    )(xp, xp, xp, w.astype(jnp.bfloat16),
      scale.reshape(1, P).astype(jnp.float32),
      bias.reshape(1, P).astype(jnp.float32))


# ---------------------------------------------------------------------------
# Global average pool, tiled over HW with an output-resident accumulator
# ---------------------------------------------------------------------------

def _gap_kernel(x_ref, o_ref, *, inv):
    j = pl.program_id(1)

    @pl.when(j == 0)
    def _():
        o_ref[...] = jnp.zeros_like(o_ref)

    o_ref[0] += jnp.sum(x_ref[0].astype(jnp.float32), axis=0, keepdims=True)

    @pl.when(j == pl.num_programs(1) - 1)
    def _():
        o_ref[...] = o_ref[...] * inv


def global_avg_pool(x):
    """(N, HW, C) -> (N, C) f32."""
    N, HW, C = x.shape
    tg = _tile(HW, 1024, 8)
    out = pl.pallas_call(
        functools.partial(_gap_kernel, inv=1.0 / HW),
        out_shape=jax.ShapeDtypeStruct((N, 1, C), jnp.float32),
        grid=(N, HW // tg),
        in_specs=[pl.BlockSpec((1, tg, C), lambda n, j: (n, j, 0))],
        out_specs=pl.BlockSpec((1, 1, C), lambda n, j: (n, 0, 0)),
        compiler_params=_cparams(("parallel", "arbitrary")),
    )(x)
    return out.reshape(N, C)


# ---------------------------------------------------------------------------
# Fused: Euclidean-distance scaling + both concats + conv2 + bn1 + relu
# ---------------------------------------------------------------------------

def _fused_conv2_kernel(x1_ref, x2_ref, x3_ref, x4_ref, pf_ref, xc_ref,
                        w2_ref, s_ref, b_ref, o_ref, *, eps):
    # Per-batch scalars s_i = 1 / (1 + ||pool_i - x12 + eps||_2)
    pf = pf_ref[0].astype(jnp.float32)                   # (5, P)  [x6,x7,x8,x9,x5]
    xc = xc_ref[0].astype(jnp.float32)                   # (1, P)  x12
    diff = pf - xc + eps
    dist = jnp.sqrt(jnp.sum(diff * diff, axis=-1, keepdims=True))   # (5, 1)
    sw = pl.reciprocal(1.0 + dist, approx=True)                     # (5, 1)

    tm, P = o_ref.shape[1], o_ref.shape[2]
    acc = jnp.zeros((tm, P), jnp.float32)
    branches = (x1_ref, x2_ref, x3_ref, x4_ref)
    for i in range(4):
        # cat([x_i, s_i*x_i]) @ [W2a_i; W2b_i] == x_i @ (W2a_i + s_i*W2b_i)
        w_eff = (w2_ref[0, i].astype(jnp.float32)
                 + sw[i:i + 1, :] * w2_ref[1, i].astype(jnp.float32)
                 ).astype(jnp.bfloat16)
        acc = acc + jnp.dot(branches[i][0], w_eff, preferred_element_type=jnp.float32)

    # x10 is the broadcast of x5 over HW -> its conv2 contribution is one row.
    x5b = pf[4:5].astype(jnp.bfloat16)                   # (1, P)
    w5 = (w2_ref[0, 4].astype(jnp.float32)
          + sw[4:5, :] * w2_ref[1, 4].astype(jnp.float32)).astype(jnp.bfloat16)
    acc = acc + jnp.dot(x5b, w5, preferred_element_type=jnp.float32)

    y = acc * s_ref[...] + b_ref[...]
    o_ref[0] = jnp.maximum(y, 0.0).astype(o_ref.dtype)


def fused_dist_concat_conv2(x1, x2, x3, x4, pool_feats, x12, w2, scale, bias):
    N, HW, P = x1.shape
    tm = _tile(HW, 512, 8)
    branch_spec = pl.BlockSpec((1, tm, P), lambda n, i: (n, i, 0))
    return pl.pallas_call(
        functools.partial(_fused_conv2_kernel, eps=PAIRWISE_EPS),
        out_shape=jax.ShapeDtypeStruct((N, HW, P), jnp.float32),
        grid=(N, HW // tm),
        in_specs=[branch_spec, branch_spec, branch_spec, branch_spec,
                  pl.BlockSpec((1, 5, P), lambda n, i: (n, 0, 0)),
                  pl.BlockSpec((1, 1, P), lambda n, i: (n, 0, 0)),
                  pl.BlockSpec((2, 5, P, P), lambda n, i: (0, 0, 0, 0)),
                  pl.BlockSpec((1, P), lambda n, i: (0, 0)),
                  pl.BlockSpec((1, P), lambda n, i: (0, 0))],
        out_specs=pl.BlockSpec((1, tm, P), lambda n, i: (n, i, 0)),
        compiler_params=_cparams(("parallel", "parallel")),
    )(x1, x2, x3, x4, pool_feats, x12,
      w2.astype(jnp.bfloat16),
      scale.reshape(1, P).astype(jnp.float32),
      bias.reshape(1, P).astype(jnp.float32))


# ---------------------------------------------------------------------------
# Parameters and forward pass
# ---------------------------------------------------------------------------

def kaiming(key, fan_in, shape):
    return jax.random.normal(key, shape, jnp.float32) * math.sqrt(2.0 / fan_in)


def init_params(key, inplanes, planes):
    ks = jax.random.split(key, 8)
    p = {}
    p["w_aspp1"] = kaiming(ks[0], inplanes, (inplanes, planes))
    p["w_aspp2"] = kaiming(ks[1], 9 * inplanes, (3, 3, inplanes, planes))
    p["w_aspp3"] = kaiming(ks[2], 9 * inplanes, (3, 3, inplanes, planes))
    p["w_aspp4"] = kaiming(ks[3], 9 * inplanes, (3, 3, inplanes, planes))
    p["w_gap"]   = kaiming(ks[4], planes, (planes, planes))         # global_avg_pool conv (shared)
    p["w_gap1"]  = kaiming(ks[5], inplanes, (inplanes, planes))     # global_avg_pool1 conv
    p["w_conv1"] = kaiming(ks[6], 5 * planes, (5 * planes, planes))
    p["w_conv2"] = kaiming(ks[7], 10 * planes, (10 * planes, planes))
    # BatchNorm (weight=1, bias=0, running stats 0/1) as fused affine
    p["bn_scale"] = jnp.full((planes,), 1.0 / math.sqrt(1.0 + BN_EPS), jnp.float32)
    p["bn_bias"]  = jnp.zeros((planes,), jnp.float32)
    p["id_scale"] = jnp.ones((planes,), jnp.float32)
    p["id_bias"]  = jnp.zeros((planes,), jnp.float32)
    return p


def aspp_forward(params, x_nchw, dilations):
    x = jnp.transpose(x_nchw, (0, 2, 3, 1)).astype(jnp.bfloat16)    # NHWC, bf16 MXU inputs
    N, H, W, Cin = x.shape
    HW = H * W
    P = params["w_aspp1"].shape[1]
    bn_s, bn_b = params["bn_scale"], params["bn_bias"]
    x_seq = x.reshape(N, HW, Cin)

    # ASPP branch 1: 1x1 conv + BN + ReLU (tiled matmul)
    x1 = matmul_affine(x_seq, params["w_aspp1"], bn_s, bn_b,
                       relu=True, out_dtype=jnp.bfloat16)           # (N, HW, P)

    # ASPP branches 2-4: dilated 3x3 conv + BN + ReLU (no im2col, shared max pad)
    pad = max(dilations[1:])
    xp = jnp.pad(x, ((0, 0), (pad, pad), (pad, pad), (0, 0)))

    def branch(wkey, d):
        y = dilated_conv3x3_bn_relu(xp, params[wkey], bn_s, bn_b,
                                    d=d, pad=pad, h_out=H, w_out=W)
        return y.reshape(N, HW, P)

    x2 = branch("w_aspp2", dilations[1])
    x3 = branch("w_aspp3", dilations[2])
    x4 = branch("w_aspp4", dilations[3])

    # Global average pools
    mx = global_avg_pool(x_seq)                                     # (N, Cin)
    m1 = global_avg_pool(x1)
    m2 = global_avg_pool(x2)
    m3 = global_avg_pool(x3)
    m4 = global_avg_pool(x4)                                        # (N, P) each

    # global_avg_pool1: pool -> 1x1 conv -> BN -> ReLU
    x5 = matmul_affine(mx[None], params["w_gap1"], bn_s, bn_b, relu=True)[0]    # (N, P)
    # shared global_avg_pool conv applied to the four branch means, batched
    pool4 = jnp.concatenate([m1, m2, m3, m4], axis=0)               # (4N, P)
    x6to9 = matmul_affine(pool4[None], params["w_gap"], bn_s, bn_b,
                          relu=True)[0].reshape(4, N, P)            # x6..x9

    # conv1 + GAP fold: GAP(conv1(cat)) == conv1(GAP(cat)) (bias-free 1x1 conv)
    pooled_cat = jnp.concatenate([m1, m2, m3, m4, x5], axis=-1)     # (N, 5P)
    v = matmul_affine(pooled_cat[None], params["w_conv1"],
                      params["id_scale"], params["id_bias"], relu=False)[0]     # (N, P)
    x12 = matmul_affine(v[None], params["w_gap"], bn_s, bn_b, relu=True)[0]     # (N, P)

    pool_feats = jnp.concatenate([jnp.transpose(x6to9, (1, 0, 2)),
                                  x5[:, None, :]], axis=1)          # (N, 5, P)

    # Fused: Euclidean-distance scaling + concats + conv2 + bn1 + relu
    w2 = params["w_conv2"].reshape(2, 5, P, P)
    out = fused_dist_concat_conv2(x1, x2, x3, x4, pool_feats,
                                  x12[:, None, :], w2, bn_s, bn_b)  # (N, HW, P) f32

    # TODO(synk): nn.Dropout(0.3) is identity in eval mode; training-mode RNG dropout not implemented.
    return out.reshape(N, H, W, P).transpose(0, 3, 1, 2)            # back to NCHW


if __name__ == "__main__":
    key = jax.random.PRNGKey(0)
    k_x, k_p = jax.random.split(key)

    # Small stand-ins for the module's channel counts (inplanes=2048, planes=256)
    N, inplanes, H, W = 2, 32, 16, 16
    planes = 32
    dilations = [1, 6, 12, 18]        # output_stride = 16

    x = jax.random.normal(k_x, (N, inplanes, H, W), jnp.float32)
    params = init_params(k_p, inplanes, planes)

    fwd = jax.jit(functools.partial(aspp_forward, dilations=dilations))
    out = fwd(params, x)
    jax.block_until_ready(out)
    assert out.shape == (N, planes, H, W), out.shape
    assert bool(jnp.all(jnp.isfinite(out)))
    print("KERNEL_OK")
</pallas_src>

<mosaic_0001>
module attributes {stable_mosaic.version = 11 : i64} {
  func.func @_dilated3x3_kernel(%arg0: i32, %arg1: i32, %arg2: memref<1x1x52x32xbf16, #tpu.memory_space<vmem>>, %arg3: memref<1x1x52x32xbf16, #tpu.memory_space<vmem>>, %arg4: memref<1x1x52x32xbf16, #tpu.memory_space<vmem>>, %arg5: memref<3x3x32x32xbf16, #tpu.memory_space<vmem>>, %arg6: memref<1x32xf32, #tpu.memory_space<vmem>>, %arg7: memref<1x32xf32, #tpu.memory_space<vmem>>, %arg8: memref<1x1x16x32xbf16, #tpu.memory_space<vmem>>) attributes {dimension_semantics = [#tpu.dimension_semantics<parallel>, #tpu.dimension_semantics<parallel>], iteration_bounds = array<i64: 2, 16>, scalar_prefetch = 0 : i64, scratch_operands = 0 : i64, tpu.core_type = #tpu.core_type<tc>, window_params = [{transform_indices = @transform_0, window_bounds = array<i64: 1, 1, 52, 32>}, {transform_indices = @transform_1, window_bounds = array<i64: 1, 1, 52, 32>}, {transform_indices = @transform_2, window_bounds = array<i64: 1, 1, 52, 32>}, {pipeline_mode = #tpu.pipeline_mode<synchronous>, transform_indices = @transform_3, window_bounds = array<i64: 3, 3, 32, 32>}, {pipeline_mode = #tpu.pipeline_mode<synchronous>, transform_indices = @transform_4, window_bounds = array<i64: 1, 32>}, {pipeline_mode = #tpu.pipeline_mode<synchronous>, transform_indices = @transform_5, window_bounds = array<i64: 1, 32>}, {transform_indices = @transform_6, window_bounds = array<i64: 1, 1, 16, 32>}]} {
    %cst = arith.constant 0.000000e+00 : f32
    %0 = vector.broadcast %cst : f32 to vector<16x32xf32>
    %c0 = arith.constant 0 : index
    %c0_0 = arith.constant 0 : index
    %c0_1 = arith.constant 0 : index
    %c0_2 = arith.constant 0 : index
    %1 = vector.load %arg2[%c0, %c0_0, %c0_1, %c0_2] : memref<1x1x52x32xbf16, #tpu.memory_space<vmem>>, vector<1x1x52x32xbf16>
    %2 = vector.shape_cast %1 : vector<1x1x52x32xbf16> to vector<52x32xbf16>
    %3 = vector.extract_strided_slice %2 {offsets = [6, 0], sizes = [16, 32], strides = [1, 1]} : vector<52x32xbf16> to vector<16x32xbf16>
    %c0_3 = arith.constant 0 : index
    %c0_4 = arith.constant 0 : index
    %c0_5 = arith.constant 0 : index
    %c0_6 = arith.constant 0 : index
    %4 = vector.load %arg5[%c0_3, %c0_4, %c0_5, %c0_6] : memref<3x3x32x32xbf16, #tpu.memory_space<vmem>>, vector<1x1x32x32xbf16>
    %5 = vector.shape_cast %4 : vector<1x1x32x32xbf16> to vector<32x32xbf16>
    %cst_7 = arith.constant dense<0.000000e+00> : vector<16x32xf32>
    %6 = tpu.matmul %3, %5, %cst_7 {dimension_numbers = #tpu.dot_dimension_numbers<[1], [0], [0], [1], [0, 0, 1, 1], [], []>} : vector<16x32xbf16>, vector<32x32xbf16>, vector<16x32xf32> -> vector<16x32xf32>
    %7 = arith.addf %0, %6 : vector<16x32xf32>
    %8 = vector.extract_strided_slice %2 {offsets = [18, 0], sizes = [16, 32], strides = [1, 1]} : vector<52x32xbf16> to vector<16x32xbf16>
    %c0_8 = arith.constant 0 : index
    %c1 = arith.constant 1 : index
    %c0_9 = arith.constant 0 : index
    %c0_10 = arith.constant 0 : index
    %9 = vector.load %arg5[%c0_8, %c1, %c0_9, %c0_10] : memref<3x3x32x32xbf16, #tpu.memory_space<vmem>>, vector<1x1x32x32xbf16>
    %10 = vector.shape_cast %9 : vector<1x1x32x32xbf16> to vector<32x32xbf16>
    %cst_11 = arith.constant dense<0.000000e+00> : vector<16x32xf32>
    %11 = tpu.matmul %8, %10, %cst_11 {dimension_numbers = #tpu.dot_dimension_numbers<[1], [0], [0], [1], [0, 0, 1, 1], [], []>} : vector<16x32xbf16>, vector<32x32xbf16>, vector<16x32xf32> -> vector<16x32xf32>
    %12 = arith.addf %7, %11 : vector<16x32xf32>
    %13 = vector.extract_strided_slice %2 {offsets = [30, 0], sizes = [16, 32], strides = [1, 1]} : vector<52x32xbf16> to vector<16x32xbf16>
    %c0_12 = arith.constant 0 : index
    %c2 = arith.constant 2 : index
    %c0_13 = arith.constant 0 : index
    %c0_14 = arith.constant 0 : index
    %14 = vector.load %arg5[%c0_12, %c2, %c0_13, %c0_14] : memref<3x3x32x32xbf16, #tpu.memory_space<vmem>>, vector<1x1x32x32xbf16>
    %15 = vector.shape_cast %14 : vector<1x1x32x32xbf16> to vector<32x32xbf16>
    %cst_15 = arith.constant dense<0.000000e+00> : vector<16x32xf32>
    %16 = tpu.matmul %13, %15, %cst_15 {dimension_numbers = #tpu.dot_dimension_numbers<[1], [0], [0], [1], [0, 0, 1, 1], [], []>} : vector<16x32xbf16>, vector<32x32xbf16>, vector<16x32xf32> -> vector<16x32xf32>
    %17 = arith.addf %12, %16 : vector<16x32xf32>
    %c0_16 = arith.constant 0 : index
    %c0_17 = arith.constant 0 : index
    %c0_18 = arith.constant 0 : index
    %c0_19 = arith.constant 0 : index
    %18 = vector.load %arg3[%c0_16, %c0_17, %c0_18, %c0_19] : memref<1x1x52x32xbf16, #tpu.memory_space<vmem>>, vector<1x1x52x32xbf16>
    %19 = vector.shape_cast %18 : vector<1x1x52x32xbf16> to vector<52x32xbf16>
    %20 = vector.extract_strided_slice %19 {offsets = [6, 0], sizes = [16, 32], strides = [1, 1]} : vector<52x32xbf16> to vector<16x32xbf16>
    %c1_20 = arith.constant 1 : index
    %c0_21 = arith.constant 0 : index
    %c0_22 = arith.constant 0 : index
    %c0_23 = arith.constant 0 : index
    %21 = vector.load %arg5[%c1_20, %c0_21, %c0_22, %c0_23] : memref<3x3x32x32xbf16, #tpu.memory_space<vmem>>, vector<1x1x32x32xbf16>
    %22 = vector.shape_cast %21 : vector<1x1x32x32xbf16> to vector<32x32xbf16>
    %cst_24 = arith.constant dense<0.000000e+00> : vector<16x32xf32>
    %23 = tpu.matmul %20, %22, %cst_24 {dimension_numbers = #tpu.dot_dimension_numbers<[1], [0], [0], [1], [0, 0, 1, 1], [], []>} : vector<16x32xbf16>, vector<32x32xbf16>, vector<16x32xf32> -> vector<16x32xf32>
    %24 = arith.addf %17, %23 : vector<16x32xf32>
    %25 = vector.extract_strided_slice %19 {offsets = [18, 0], sizes = [16, 32], strides = [1, 1]} : vector<52x32xbf16> to vector<16x32xbf16>
    %c1_25 = arith.constant 1 : index
    %c1_26 = arith.constant 1 : index
    %c0_27 = arith.constant 0 : index
    %c0_28 = arith.constant 0 : index
    %26 = vector.load %arg5[%c1_25, %c1_26, %c0_27, %c0_28] : memref<3x3x32x32xbf16, #tpu.memory_space<vmem>>, vector<1x1x32x32xbf16>
    %27 = vector.shape_cast %26 : vector<1x1x32x32xbf16> to vector<32x32xbf16>
    %cst_29 = arith.constant dense<0.000000e+00> : vector<16x32xf32>
    %28 = tpu.matmul %25, %27, %cst_29 {dimension_numbers = #tpu.dot_dimension_numbers<[1], [0], [0], [1], [0, 0, 1, 1], [], []>} : vector<16x32xbf16>, vector<32x32xbf16>, vector<16x32xf32> -> vector<16x32xf32>
    %29 = arith.addf %24, %28 : vector<16x32xf32>
    %30 = vector.extract_strided_slice %19 {offsets = [30, 0], sizes = [16, 32], strides = [1, 1]} : vector<52x32xbf16> to vector<16x32xbf16>
    %c1_30 = arith.constant 1 : index
    %c2_31 = arith.constant 2 : index
    %c0_32 = arith.constant 0 : index
    %c0_33 = arith.constant 0 : index
    %31 = vector.load %arg5[%c1_30, %c2_31, %c0_32, %c0_33] : memref<3x3x32x32xbf16, #tpu.memory_space<vmem>>, vector<1x1x32x32xbf16>
    %32 = vector.shape_cast %31 : vector<1x1x32x32xbf16> to vector<32x32xbf16>
    %cst_34 = arith.constant dense<0.000000e+00> : vector<16x32xf32>
    %33 = tpu.matmul %30, %32, %cst_34 {dimension_numbers = #tpu.dot_dimension_numbers<[1], [0], [0], [1], [0, 0, 1, 1], [], []>} : vector<16x32xbf16>, vector<32x32xbf16>, vector<16x32xf32> -> vector<16x32xf32>
    %34 = arith.addf %29, %33 : vector<16x32xf32>
    %c0_35 = arith.constant 0 : index
    %c0_36 = arith.constant 0 : index
    %c0_37 = arith.constant 0 : index
    %c0_38 = arith.constant 0 : index
    %35 = vector.load %arg4[%c0_35, %c0_36, %c0_37, %c0_38] : memref<1x1x52x32xbf16, #tpu.memory_space<vmem>>, vector<1x1x52x32xbf16>
    %36 = vector.shape_cast %35 : vector<1x1x52x32xbf16> to vector<52x32xbf16>
    %37 = vector.extract_strided_slice %36 {offsets = [6, 0], sizes = [16, 32], strides = [1, 1]} : vector<52x32xbf16> to vector<16x32xbf16>
    %c2_39 = arith.constant 2 : index
    %c0_40 = arith.constant 0 : index
    %c0_41 = arith.constant 0 : index
    %c0_42 = arith.constant 0 : index
    %38 = vector.load %arg5[%c2_39, %c0_40, %c0_41, %c0_42] : memref<3x3x32x32xbf16, #tpu.memory_space<vmem>>, vector<1x1x32x32xbf16>
    %39 = vector.shape_cast %38 : vector<1x1x32x32xbf16> to vector<32x32xbf16>
    %cst_43 = arith.constant dense<0.000000e+00> : vector<16x32xf32>
    %40 = tpu.matmul %37, %39, %cst_43 {dimension_numbers = #tpu.dot_dimension_numbers<[1], [0], [0], [1], [0, 0, 1, 1], [], []>} : vector<16x32xbf16>, vector<32x32xbf16>, vector<16x32xf32> -> vector<16x32xf32>
    %41 = arith.addf %34, %40 : vector<16x32xf32>
    %42 = vector.extract_strided_slice %36 {offsets = [18, 0], sizes = [16, 32], strides = [1, 1]} : vector<52x32xbf16> to vector<16x32xbf16>
    %c2_44 = arith.constant 2 : index
    %c1_45 = arith.constant 1 : index
    %c0_46 = arith.constant 0 : index
    %c0_47 = arith.constant 0 : index
    %43 = vector.load %arg5[%c2_44, %c1_45, %c0_46, %c0_47] : memref<3x3x32x32xbf16, #tpu.memory_space<vmem>>, vector<1x1x32x32xbf16>
    %44 = vector.shape_cast %43 : vector<1x1x32x32xbf16> to vector<32x32xbf16>
    %cst_48 = arith.constant dense<0.000000e+00> : vector<16x32xf32>
    %45 = tpu.matmul %42, %44, %cst_48 {dimension_numbers = #tpu.dot_dimension_numbers<[1], [0], [0], [1], [0, 0, 1, 1], [], []>} : vector<16x32xbf16>, vector<32x32xbf16>, vector<16x32xf32> -> vector<16x32xf32>
    %46 = arith.addf %41, %45 : vector<16x32xf32>
    %47 = vector.extract_strided_slice %36 {offsets = [30, 0], sizes = [16, 32], strides = [1, 1]} : vector<52x32xbf16> to vector<16x32xbf16>
    %c2_49 = arith.constant 2 : index
    %c2_50 = arith.constant 2 : index
    %c0_51 = arith.constant 0 : index
    %c0_52 = arith.constant 0 : index
    %48 = vector.load %arg5[%c2_49, %c2_50, %c0_51, %c0_52] : memref<3x3x32x32xbf16, #tpu.memory_space<vmem>>, vector<1x1x32x32xbf16>
    %49 = vector.shape_cast %48 : vector<1x1x32x32xbf16> to vector<32x32xbf16>
    %cst_53 = arith.constant dense<0.000000e+00> : vector<16x32xf32>
    %50 = tpu.matmul %47, %49, %cst_53 {dimension_numbers = #tpu.dot_dimension_numbers<[1], [0], [0], [1], [0, 0, 1, 1], [], []>} : vector<16x32xbf16>, vector<32x32xbf16>, vector<16x32xf32> -> vector<16x32xf32>
    %51 = arith.addf %46, %50 : vector<16x32xf32>
    %c0_54 = arith.constant 0 : index
    %c0_55 = arith.constant 0 : index
    %52 = vector.load %arg6[%c0_54, %c0_55] : memref<1x32xf32, #tpu.memory_space<vmem>>, vector<1x32xf32>
    %53 = vector.broadcast %52 : vector<1x32xf32> to vector<16x32xf32>
    %54 = arith.mulf %51, %53 : vector<16x32xf32>
    %c0_56 = arith.constant 0 : index
    %c0_57 = arith.constant 0 : index
    %55 = vector.load %arg7[%c0_56, %c0_57] : memref<1x32xf32, #tpu.memory_space<vmem>>, vector<1x32xf32>
    %56 = vector.broadcast %55 : vector<1x32xf32> to vector<16x32xf32>
    %57 = arith.addf %54, %56 : vector<16x32xf32>
    %cst_58 = arith.constant 0.000000e+00 : f32
    %58 = vector.broadcast %cst_58 : f32 to vector<16x32xf32>
    %59 = arith.maximumf %57, %58 : vector<16x32xf32>
    %60 = arith.truncf %59 : vector<16x32xf32> to vector<16x32xbf16>
    %c0_59 = arith.constant 0 : index
    %c0_60 = arith.constant 0 : index
    %c0_61 = arith.constant 0 : index
    %c0_62 = arith.constant 0 : index
    %61 = vector.load %arg8[%c0_59, %c0_60, %c0_61, %c0_62] : memref<1x1x16x32xbf16, #tpu.memory_space<vmem>>, vector<1x1x16x32xbf16>
    %62 = vector.shape_cast %61 : vector<1x1x16x32xbf16> to vector<16x32xbf16>
    %63 = vector.shape_cast %60 : vector<16x32xbf16> to vector<1x1x16x32xbf16>
    tpu.vector_store %arg8[%c0_59, %c0_60, %c0_61, %c0_62], %63 {strides = array<i32>} : memref<1x1x16x32xbf16, #tpu.memory_space<vmem>>, vector<1x1x16x32xbf16>,
    return
  }
  func.func @transform_0(%arg0: i32, %arg1: i32) -> (i32, i32, i32, i32) {
    %c6_i32 = arith.constant 6 : i32
    %0 = arith.addi %arg1, %c6_i32 : i32
    %c0_i32 = arith.constant 0 : i32
    %c0_i32_0 = arith.constant 0 : i32
    %c0_i32_1 = arith.constant 0 : i32
    return %arg0, %0, %c0_i32, %c0_i32_0 : i32, i32, i32, i32
  }
  func.func @transform_1(%arg0: i32, %arg1: i32) -> (i32, i32, i32, i32) {
    %c18_i32 = arith.constant 18 : i32
    %0 = arith.addi %arg1, %c18_i32 : i32
    %c0_i32 = arith.constant 0 : i32
    %c0_i32_0 = arith.constant 0 : i32
    %c0_i32_1 = arith.constant 0 : i32
    return %arg0, %0, %c0_i32, %c0_i32_0 : i32, i32, i32, i32
  }
  func.func @transform_2(%arg0: i32, %arg1: i32) -> (i32, i32, i32, i32) {
    %c30_i32 = arith.constant 30 : i32
    %0 = arith.addi %arg1, %c30_i32 : i32
    %c0_i32 = arith.constant 0 : i32
    %c0_i32_0 = arith.constant 0 : i32
    %c0_i32_1 = arith.constant 0 : i32
    return %arg0, %0, %c0_i32, %c0_i32_0 : i32, i32, i32, i32
  }
  func.func @transform_3(%arg0: i32, %arg1: i32) -> (i32, i32, i32, i32) {
    %c0_i32 = arith.constant 0 : i32
    %c0_i32_0 = arith.constant 0 : i32
    %c0_i32_1 = arith.constant 0 : i32
    %c0_i32_2 = arith.constant 0 : i32
    %c0_i32_3 = arith.constant 0 : i32
    return %c0_i32, %c0_i32_0, %c0_i32_1, %c0_i32_2 : i32, i32, i32, i32
  }
  func.func @transform_4(%arg0: i32, %arg1: i32) -> (i32, i32) {
    %c0_i32 = arith.constant 0 : i32
    %c0_i32_0 = arith.constant 0 : i32
    %c0_i32_1 = arith.constant 0 : i32
    return %c0_i32, %c0_i32_0 : i32, i32
  }
  func.func @transform_5(%arg0: i32, %arg1: i32) -> (i32, i32) {
    %c0_i32 = arith.constant 0 : i32
    %c0_i32_0 = arith.constant 0 : i32
    %c0_i32_1 = arith.constant 0 : i32
    return %c0_i32, %c0_i32_0 : i32, i32
  }
  func.func @transform_6(%arg0: i32, %arg1: i32) -> (i32, i32, i32, i32) {
    %c0_i32 = arith.constant 0 : i32
    %c0_i32_0 = arith.constant 0 : i32
    %c0_i32_1 = arith.constant 0 : i32
    return %arg0, %arg1, %c0_i32, %c0_i32_0 : i32, i32, i32, i32
  }
}

module attributes {stable_mosaic.version = 11 : i64} {
  func.func @_gap_kernel(%arg0: i32, %arg1: i32, %arg2: memref<1x256x32xbf16, #tpu.memory_space<vmem>>, %arg3: memref<1x1x32xf32, #tpu.memory_space<vmem>>) attributes {dimension_semantics = [#tpu.dimension_semantics<parallel>, #tpu.dimension_semantics<arbitrary>], iteration_bounds = array<i64: 2, 1>, scalar_prefetch = 0 : i64, scratch_operands = 0 : i64, tpu.core_type = #tpu.core_type<tc>, window_params = [{transform_indices = @transform_0, window_bounds = array<i64: 1, 256, 32>}, {transform_indices = @transform_1, window_bounds = array<i64: 1, 1, 32>}]} {
    %c0_i32 = arith.constant 0 : i32
    %0 = arith.cmpi eq, %arg1, %c0_i32 : i32
    %1 = arith.extui %0 : i1 to i32
    %c0_i32_0 = arith.constant 0 : i32
    %2 = arith.cmpi ne, %1, %c0_i32_0 : i32
    scf.if %2 {
      %cst_11 = arith.constant 0.000000e+00 : f32
      %17 = vector.broadcast %cst_11 : f32 to vector<1x1x32xf32>
      %c0_12 = arith.constant 0 : index
      %c0_13 = arith.constant 0 : index
      %c0_14 = arith.constant 0 : index
      %18 = vector.load %arg3[%c0_12, %c0_13, %c0_14] : memref<1x1x32xf32, #tpu.memory_space<vmem>>, vector<1x1x32xf32>
      tpu.vector_store %arg3[%c0_12, %c0_13, %c0_14], %17 {strides = array<i32>} : memref<1x1x32xf32, #tpu.memory_space<vmem>>, vector<1x1x32xf32>,
    } else {
    }
    %c0 = arith.constant 0 : index
    %c0_1 = arith.constant 0 : index
    %c0_2 = arith.constant 0 : index
    %3 = vector.load %arg3[%c0, %c0_1, %c0_2] : memref<1x1x32xf32, #tpu.memory_space<vmem>>, vector<1x1x32xf32>
    %4 = vector.shape_cast %3 : vector<1x1x32xf32> to vector<1x32xf32>
    %c0_3 = arith.constant 0 : index
    %c0_4 = arith.constant 0 : index
    %c0_5 = arith.constant 0 : index
    %5 = vector.load %arg2[%c0_3, %c0_4, %c0_5] : memref<1x256x32xbf16, #tpu.memory_space<vmem>>, vector<1x256x32xbf16>
    %6 = vector.shape_cast %5 : vector<1x256x32xbf16> to vector<256x32xbf16>
    %7 = arith.extf %6 : vector<256x32xbf16> to vector<256x32xf32>
    %cst = arith.constant dense<0.000000e+00> : vector<32xf32>
    %8 = vector.multi_reduction <add>, %7, %cst [0] : vector<256x32xf32> to vector<32xf32>
    %9 = vector.shape_cast %8 : vector<32xf32> to vector<1x32xf32>
    %10 = arith.addf %4, %9 : vector<1x32xf32>
    %c0_6 = arith.constant 0 : index
    %c0_7 = arith.constant 0 : index
    %c0_8 = arith.constant 0 : index
    %11 = vector.load %arg3[%c0_6, %c0_7, %c0_8] : memref<1x1x32xf32, #tpu.memory_space<vmem>>, vector<1x1x32xf32>
    %12 = vector.shape_cast %11 : vector<1x1x32xf32> to vector<1x32xf32>
    %13 = vector.shape_cast %10 : vector<1x32xf32> to vector<1x1x32xf32>
    tpu.vector_store %arg3[%c0_6, %c0_7, %c0_8], %13 {strides = array<i32>} : memref<1x1x32xf32, #tpu.memory_space<vmem>>, vector<1x1x32xf32>,
    %c0_i32_9 = arith.constant 0 : i32
    %14 = arith.cmpi eq, %arg1, %c0_i32_9 : i32
    %15 = arith.extui %14 : i1 to i32
    %c0_i32_10 = arith.constant 0 : i32
    %16 = arith.cmpi ne, %15, %c0_i32_10 : i32
    scf.if %16 {
      %c0_11 = arith.constant 0 : index
      %c0_12 = arith.constant 0 : index
      %c0_13 = arith.constant 0 : index
      %17 = vector.load %arg3[%c0_11, %c0_12, %c0_13] : memref<1x1x32xf32, #tpu.memory_space<vmem>>, vector<1x1x32xf32>
      %cst_14 = arith.constant 3.906250e-03 : f32
      %18 = vector.broadcast %cst_14 : f32 to vector<1x1x32xf32>
      %19 = arith.mulf %17, %18 : vector<1x1x32xf32>
      %c0_15 = arith.constant 0 : index
      %c0_16 = arith.constant 0 : index
      %c0_17 = arith.constant 0 : index
      %20 = vector.load %arg3[%c0_15, %c0_16, %c0_17] : memref<1x1x32xf32, #tpu.memory_space<vmem>>, vector<1x1x32xf32>
      tpu.vector_store %arg3[%c0_15, %c0_16, %c0_17], %19 {strides = array<i32>} : memref<1x1x32xf32, #tpu.memory_space<vmem>>, vector<1x1x32xf32>,
    } else {
    }
    return
  }
  func.func @transform_0(%arg0: i32, %arg1: i32) -> (i32, i32, i32) {
    %c0_i32 = arith.constant 0 : i32
    %c0_i32_0 = arith.constant 0 : i32
    return %arg0, %arg1, %c0_i32 : i32, i32, i32
  }
  func.func @transform_1(%arg0: i32, %arg1: i32) -> (i32, i32, i32) {
    %c0_i32 = arith.constant 0 : i32
    %c0_i32_0 = arith.constant 0 : i32
    %c0_i32_1 = arith.constant 0 : i32
    return %arg0, %c0_i32, %c0_i32_0 : i32, i32, i32
  }
}

module attributes {stable_mosaic.version = 11 : i64} {
  func.func @_dilated3x3_kernel(%arg0: i32, %arg1: i32, %arg2: memref<1x1x52x32xbf16, #tpu.memory_space<vmem>>, %arg3: memref<1x1x52x32xbf16, #tpu.memory_space<vmem>>, %arg4: memref<1x1x52x32xbf16, #tpu.memory_space<vmem>>, %arg5: memref<3x3x32x32xbf16, #tpu.memory_space<vmem>>, %arg6: memref<1x32xf32, #tpu.memory_space<vmem>>, %arg7: memref<1x32xf32, #tpu.memory_space<vmem>>, %arg8: memref<1x1x16x32xbf16, #tpu.memory_space<vmem>>) attributes {dimension_semantics = [#tpu.dimension_semantics<parallel>, #tpu.dimension_semantics<parallel>], iteration_bounds = array<i64: 2, 16>, scalar_prefetch = 0 : i64, scratch_operands = 0 : i64, tpu.core_type = #tpu.core_type<tc>, window_params = [{transform_indices = @transform_0, window_bounds = array<i64: 1, 1, 52, 32>}, {transform_indices = @transform_1, window_bounds = array<i64: 1, 1, 52, 32>}, {transform_indices = @transform_2, window_bounds = array<i64: 1, 1, 52, 32>}, {pipeline_mode = #tpu.pipeline_mode<synchronous>, transform_indices = @transform_3, window_bounds = array<i64: 3, 3, 32, 32>}, {pipeline_mode = #tpu.pipeline_mode<synchronous>, transform_indices = @transform_4, window_bounds = array<i64: 1, 32>}, {pipeline_mode = #tpu.pipeline_mode<synchronous>, transform_indices = @transform_5, window_bounds = array<i64: 1, 32>}, {transform_indices = @transform_6, window_bounds = array<i64: 1, 1, 16, 32>}]} {
    %cst = arith.constant 0.000000e+00 : f32
    %0 = vector.broadcast %cst : f32 to vector<16x32xf32>
    %c0 = arith.constant 0 : index
    %c0_0 = arith.constant 0 : index
    %c0_1 = arith.constant 0 : index
    %c0_2 = arith.constant 0 : index
    %1 = vector.load %arg2[%c0, %c0_0, %c0_1, %c0_2] : memref<1x1x52x32xbf16, #tpu.memory_space<vmem>>, vector<1x1x52x32xbf16>
    %2 = vector.shape_cast %1 : vector<1x1x52x32xbf16> to vector<52x32xbf16>
    %3 = vector.extract_strided_slice %2 {offsets = [0, 0], sizes = [16, 32], strides = [1, 1]} : vector<52x32xbf16> to vector<16x32xbf16>
    %c0_3 = arith.constant 0 : index
    %c0_4 = arith.constant 0 : index
    %c0_5 = arith.constant 0 : index
    %c0_6 = arith.constant 0 : index
    %4 = vector.load %arg5[%c0_3, %c0_4, %c0_5, %c0_6] : memref<3x3x32x32xbf16, #tpu.memory_space<vmem>>, vector<1x1x32x32xbf16>
    %5 = vector.shape_cast %4 : vector<1x1x32x32xbf16> to vector<32x32xbf16>
    %cst_7 = arith.constant dense<0.000000e+00> : vector<16x32xf32>
    %6 = tpu.matmul %3, %5, %cst_7 {dimension_numbers = #tpu.dot_dimension_numbers<[1], [0], [0], [1], [0, 0, 1, 1], [], []>} : vector<16x32xbf16>, vector<32x32xbf16>, vector<16x32xf32> -> vector<16x32xf32>
    %7 = arith.addf %0, %6 : vector<16x32xf32>
    %8 = vector.extract_strided_slice %2 {offsets = [18, 0], sizes = [16, 32], strides = [1, 1]} : vector<52x32xbf16> to vector<16x32xbf16>
    %c0_8 = arith.constant 0 : index
    %c1 = arith.constant 1 : index
    %c0_9 = arith.constant 0 : index
    %c0_10 = arith.constant 0 : index
    %9 = vector.load %arg5[%c0_8, %c1, %c0_9, %c0_10] : memref<3x3x32x32xbf16, #tpu.memory_space<vmem>>, vector<1x1x32x32xbf16>
    %10 = vector.shape_cast %9 : vector<1x1x32x32xbf16> to vector<32x32xbf16>
    %cst_11 = arith.constant dense<0.000000e+00> : vector<16x32xf32>
    %11 = tpu.matmul %8, %10, %cst_11 {dimension_numbers = #tpu.dot_dimension_numbers<[1], [0], [0], [1], [0, 0, 1, 1], [], []>} : vector<16x32xbf16>, vector<32x32xbf16>, vector<16x32xf32> -> vector<16x32xf32>
    %12 = arith.addf %7, %11 : vector<16x32xf32>
    %13 = vector.extract_strided_slice %2 {offsets = [36, 0], sizes = [16, 32], strides = [1, 1]} : vector<52x32xbf16> to vector<16x32xbf16>
    %c0_12 = arith.constant 0 : index
    %c2 = arith.constant 2 : index
    %c0_13 = arith.constant 0 : index
    %c0_14 = arith.constant 0 : index
    %14 = vector.load %arg5[%c0_12, %c2, %c0_13, %c0_14] : memref<3x3x32x32xbf16, #tpu.memory_space<vmem>>, vector<1x1x32x32xbf16>
    %15 = vector.shape_cast %14 : vector<1x1x32x32xbf16> to vector<32x32xbf16>
    %cst_15 = arith.constant dense<0.000000e+00> : vector<16x32xf32>
    %16 = tpu.matmul %13, %15, %cst_15 {dimension_numbers = #tpu.dot_dimension_numbers<[1], [0], [0], [1], [0, 0, 1, 1], [], []>} : vector<16x32xbf16>, vector<32x32xbf16>, vector<16x32xf32> -> vector<16x32xf32>
    %17 = arith.addf %12, %16 : vector<16x32xf32>
    %c0_16 = arith.constant 0 : index
    %c0_17 = arith.constant 0 : index
    %c0_18 = arith.constant 0 : index
    %c0_19 = arith.constant 0 : index
    %18 = vector.load %arg3[%c0_16, %c0_17, %c0_18, %c0_19] : memref<1x1x52x32xbf16, #tpu.memory_space<vmem>>, vector<1x1x52x32xbf16>
    %19 = vector.shape_cast %18 : vector<1x1x52x32xbf16> to vector<52x32xbf16>
    %20 = vector.extract_strided_slice %19 {offsets = [0, 0], sizes = [16, 32], strides = [1, 1]} : vector<52x32xbf16> to vector<16x32xbf16>
    %c1_20 = arith.constant 1 : index
    %c0_21 = arith.constant 0 : index
    %c0_22 = arith.constant 0 : index
    %c0_23 = arith.constant 0 : index
    %21 = vector.load %arg5[%c1_20, %c0_21, %c0_22, %c0_23] : memref<3x3x32x32xbf16, #tpu.memory_space<vmem>>, vector<1x1x32x32xbf16>
    %22 = vector.shape_cast %21 : vector<1x1x32x32xbf16> to vector<32x32xbf16>
    %cst_24 = arith.constant dense<0.000000e+00> : vector<16x32xf32>
    %23 = tpu.matmul %20, %22, %cst_24 {dimension_numbers = #tpu.dot_dimension_numbers<[1], [0], [0], [1], [0, 0, 1, 1], [], []>} : vector<16x32xbf16>, vector<32x32xbf16>, vector<16x32xf32> -> vector<16x32xf32>
    %24 = arith.addf %17, %23 : vector<16x32xf32>
    %25 = vector.extract_strided_slice %19 {offsets = [18, 0], sizes = [16, 32], strides = [1, 1]} : vector<52x32xbf16> to vector<16x32xbf16>
    %c1_25 = arith.constant 1 : index
    %c1_26 = arith.constant 1 : index
    %c0_27 = arith.constant 0 : index
    %c0_28 = arith.constant 0 : index
    %26 = vector.load %arg5[%c1_25, %c1_26, %c0_27, %c0_28] : memref<3x3x32x32xbf16, #tpu.memory_space<vmem>>, vector<1x1x32x32xbf16>
    %27 = vector.shape_cast %26 : vector<1x1x32x32xbf16> to vector<32x32xbf16>
    %cst_29 = arith.constant dense<0.000000e+00> : vector<16x32xf32>
    %28 = tpu.matmul %25, %27, %cst_29 {dimension_numbers = #tpu.dot_dimension_numbers<[1], [0], [0], [1], [0, 0, 1, 1], [], []>} : vector<16x32xbf16>, vector<32x32xbf16>, vector<16x32xf32> -> vector<16x32xf32>
    %29 = arith.addf %24, %28 : vector<16x32xf32>
    %30 = vector.extract_strided_slice %19 {offsets = [36, 0], sizes = [16, 32], strides = [1, 1]} : vector<52x32xbf16> to vector<16x32xbf16>
    %c1_30 = arith.constant 1 : index
    %c2_31 = arith.constant 2 : index
    %c0_32 = arith.constant 0 : index
    %c0_33 = arith.constant 0 : index
    %31 = vector.load %arg5[%c1_30, %c2_31, %c0_32, %c0_33] : memref<3x3x32x32xbf16, #tpu.memory_space<vmem>>, vector<1x1x32x32xbf16>
    %32 = vector.shape_cast %31 : vector<1x1x32x32xbf16> to vector<32x32xbf16>
    %cst_34 = arith.constant dense<0.000000e+00> : vector<16x32xf32>
    %33 = tpu.matmul %30, %32, %cst_34 {dimension_numbers = #tpu.dot_dimension_numbers<[1], [0], [0], [1], [0, 0, 1, 1], [], []>} : vector<16x32xbf16>, vector<32x32xbf16>, vector<16x32xf32> -> vector<16x32xf32>
    %34 = arith.addf %29, %33 : vector<16x32xf32>
    %c0_35 = arith.constant 0 : index
    %c0_36 = arith.constant 0 : index
    %c0_37 = arith.constant 0 : index
    %c0_38 = arith.constant 0 : index
    %35 = vector.load %arg4[%c0_35, %c0_36, %c0_37, %c0_38] : memref<1x1x52x32xbf16, #tpu.memory_space<vmem>>, vector<1x1x52x32xbf16>
    %36 = vector.shape_cast %35 : vector<1x1x52x32xbf16> to vector<52x32xbf16>
    %37 = vector.extract_strided_slice %36 {offsets = [0, 0], sizes = [16, 32], strides = [1, 1]} : vector<52x32xbf16> to vector<16x32xbf16>
    %c2_39 = arith.constant 2 : index
    %c0_40 = arith.constant 0 : index
    %c0_41 = arith.constant 0 : index
    %c0_42 = arith.constant 0 : index
    %38 = vector.load %arg5[%c2_39, %c0_40, %c0_41, %c0_42] : memref<3x3x32x32xbf16, #tpu.memory_space<vmem>>, vector<1x1x32x32xbf16>
    %39 = vector.shape_cast %38 : vector<1x1x32x32xbf16> to vector<32x32xbf16>
    %cst_43 = arith.constant dense<0.000000e+00> : vector<16x32xf32>
    %40 = tpu.matmul %37, %39, %cst_43 {dimension_numbers = #tpu.dot_dimension_numbers<[1], [0], [0], [1], [0, 0, 1, 1], [], []>} : vector<16x32xbf16>, vector<32x32xbf16>, vector<16x32xf32> -> vector<16x32xf32>
    %41 = arith.addf %34, %40 : vector<16x32xf32>
    %42 = vector.extract_strided_slice %36 {offsets = [18, 0], sizes = [16, 32], strides = [1, 1]} : vector<52x32xbf16> to vector<16x32xbf16>
    %c2_44 = arith.constant 2 : index
    %c1_45 = arith.constant 1 : index
    %c0_46 = arith.constant 0 : index
    %c0_47 = arith.constant 0 : index
    %43 = vector.load %arg5[%c2_44, %c1_45, %c0_46, %c0_47] : memref<3x3x32x32xbf16, #tpu.memory_space<vmem>>, vector<1x1x32x32xbf16>
    %44 = vector.shape_cast %43 : vector<1x1x32x32xbf16> to vector<32x32xbf16>
    %cst_48 = arith.constant dense<0.000000e+00> : vector<16x32xf32>
    %45 = tpu.matmul %42, %44, %cst_48 {dimension_numbers = #tpu.dot_dimension_numbers<[1], [0], [0], [1], [0, 0, 1, 1], [], []>} : vector<16x32xbf16>, vector<32x32xbf16>, vector<16x32xf32> -> vector<16x32xf32>
    %46 = arith.addf %41, %45 : vector<16x32xf32>
    %47 = vector.extract_strided_slice %36 {offsets = [36, 0], sizes = [16, 32], strides = [1, 1]} : vector<52x32xbf16> to vector<16x32xbf16>
    %c2_49 = arith.constant 2 : index
    %c2_50 = arith.constant 2 : index
    %c0_51 = arith.constant 0 : index
    %c0_52 = arith.constant 0 : index
    %48 = vector.load %arg5[%c2_49, %c2_50, %c0_51, %c0_52] : memref<3x3x32x32xbf16, #tpu.memory_space<vmem>>, vector<1x1x32x32xbf16>
    %49 = vector.shape_cast %48 : vector<1x1x32x32xbf16> to vector<32x32xbf16>
    %cst_53 = arith.constant dense<0.000000e+00> : vector<16x32xf32>
    %50 = tpu.matmul %47, %49, %cst_53 {dimension_numbers = #tpu.dot_dimension_numbers<[1], [0], [0], [1], [0, 0, 1, 1], [], []>} : vector<16x32xbf16>, vector<32x32xbf16>, vector<16x32xf32> -> vector<16x32xf32>
    %51 = arith.addf %46, %50 : vector<16x32xf32>
    %c0_54 = arith.constant 0 : index
    %c0_55 = arith.constant 0 : index
    %52 = vector.load %arg6[%c0_54, %c0_55] : memref<1x32xf32, #tpu.memory_space<vmem>>, vector<1x32xf32>
    %53 = vector.broadcast %52 : vector<1x32xf32> to vector<16x32xf32>
    %54 = arith.mulf %51, %53 : vector<16x32xf32>
    %c0_56 = arith.constant 0 : index
    %c0_57 = arith.constant 0 : index
    %55 = vector.load %arg7[%c0_56, %c0_57] : memref<1x32xf32, #tpu.memory_space<vmem>>, vector<1x32xf32>
    %56 = vector.broadcast %55 : vector<1x32xf32> to vector<16x32xf32>
    %57 = arith.addf %54, %56 : vector<16x32xf32>
    %cst_58 = arith.constant 0.000000e+00 : f32
    %58 = vector.broadcast %cst_58 : f32 to vector<16x32xf32>
    %59 = arith.maximumf %57, %58 : vector<16x32xf32>
    %60 = arith.truncf %59 : vector<16x32xf32> to vector<16x32xbf16>
    %c0_59 = arith.constant 0 : index
    %c0_60 = arith.constant 0 : index
    %c0_61 = arith.constant 0 : index
    %c0_62 = arith.constant 0 : index
    %61 = vector.load %arg8[%c0_59, %c0_60, %c0_61, %c0_62] : memref<1x1x16x32xbf16, #tpu.memory_space<vmem>>, vector<1x1x16x32xbf16>
    %62 = vector.shape_cast %61 : vector<1x1x16x32xbf16> to vector<16x32xbf16>
    %63 = vector.shape_cast %60 : vector<16x32xbf16> to vector<1x1x16x32xbf16>
    tpu.vector_store %arg8[%c0_59, %c0_60, %c0_61, %c0_62], %63 {strides = array<i32>} : memref<1x1x16x32xbf16, #tpu.memory_space<vmem>>, vector<1x1x16x32xbf16>,
    return
  }
  func.func @transform_0(%arg0: i32, %arg1: i32) -> (i32, i32, i32, i32) {
    %c0_i32 = arith.constant 0 : i32
    %0 = arith.addi %arg1, %c0_i32 : i32
    %c0_i32_0 = arith.constant 0 : i32
    %c0_i32_1 = arith.constant 0 : i32
    %c0_i32_2 = arith.constant 0 : i32
    return %arg0, %0, %c0_i32_0, %c0_i32_1 : i32, i32, i32, i32
  }
  func.func @transform_1(%arg0: i32, %arg1: i32) -> (i32, i32, i32, i32) {
    %c18_i32 = arith.constant 18 : i32
    %0 = arith.addi %arg1, %c18_i32 : i32
    %c0_i32 = arith.constant 0 : i32
    %c0_i32_0 = arith.constant 0 : i32
    %c0_i32_1 = arith.constant 0 : i32
    return %arg0, %0, %c0_i32, %c0_i32_0 : i32, i32, i32, i32
  }
  func.func @transform_2(%arg0: i32, %arg1: i32) -> (i32, i32, i32, i32) {
    %c36_i32 = arith.constant 36 : i32
    %0 = arith.addi %arg1, %c36_i32 : i32
    %c0_i32 = arith.constant 0 : i32
    %c0_i32_0 = arith.constant 0 : i32
    %c0_i32_1 = arith.constant 0 : i32
    return %arg0, %0, %c0_i32, %c0_i32_0 : i32, i32, i32, i32
  }
  func.func @transform_3(%arg0: i32, %arg1: i32) -> (i32, i32, i32, i32) {
    %c0_i32 = arith.constant 0 : i32
    %c0_i32_0 = arith.constant 0 : i32
    %c0_i32_1 = arith.constant 0 : i32
    %c0_i32_2 = arith.constant 0 : i32
    %c0_i32_3 = arith.constant 0 : i32
    return %c0_i32, %c0_i32_0, %c0_i32_1, %c0_i32_2 : i32, i32, i32, i32
  }
  func.func @transform_4(%arg0: i32, %arg1: i32) -> (i32, i32) {
    %c0_i32 = arith.constant 0 : i32
    %c0_i32_0 = arith.constant 0 : i32
    %c0_i32_1 = arith.constant 0 : i32
    return %c0_i32, %c0_i32_0 : i32, i32
  }
  func.func @transform_5(%arg0: i32, %arg1: i32) -> (i32, i32) {
    %c0_i32 = arith.constant 0 : i32
    %c0_i32_0 = arith.constant 0 : i32
    %c0_i32_1 = arith.constant 0 : i32
    return %c0_i32, %c0_i32_0 : i32, i32
  }
  func.func @transform_6(%arg0: i32, %arg1: i32) -> (i32, i32, i32, i32) {
    %c0_i32 = arith.constant 0 : i32
    %c0_i32_0 = arith.constant 0 : i32
    %c0_i32_1 = arith.constant 0 : i32
    return %arg0, %arg1, %c0_i32, %c0_i32_0 : i32, i32, i32, i32
  }
}

module attributes {stable_mosaic.version = 11 : i64} {
  func.func @_dilated3x3_kernel(%arg0: i32, %arg1: i32, %arg2: memref<1x1x52x32xbf16, #tpu.memory_space<vmem>>, %arg3: memref<1x1x52x32xbf16, #tpu.memory_space<vmem>>, %arg4: memref<1x1x52x32xbf16, #tpu.memory_space<vmem>>, %arg5: memref<3x3x32x32xbf16, #tpu.memory_space<vmem>>, %arg6: memref<1x32xf32, #tpu.memory_space<vmem>>, %arg7: memref<1x32xf32, #tpu.memory_space<vmem>>, %arg8: memref<1x1x16x32xbf16, #tpu.memory_space<vmem>>) attributes {dimension_semantics = [#tpu.dimension_semantics<parallel>, #tpu.dimension_semantics<parallel>], iteration_bounds = array<i64: 2, 16>, scalar_prefetch = 0 : i64, scratch_operands = 0 : i64, tpu.core_type = #tpu.core_type<tc>, window_params = [{transform_indices = @transform_0, window_bounds = array<i64: 1, 1, 52, 32>}, {transform_indices = @transform_1, window_bounds = array<i64: 1, 1, 52, 32>}, {transform_indices = @transform_2, window_bounds = array<i64: 1, 1, 52, 32>}, {pipeline_mode = #tpu.pipeline_mode<synchronous>, transform_indices = @transform_3, window_bounds = array<i64: 3, 3, 32, 32>}, {pipeline_mode = #tpu.pipeline_mode<synchronous>, transform_indices = @transform_4, window_bounds = array<i64: 1, 32>}, {pipeline_mode = #tpu.pipeline_mode<synchronous>, transform_indices = @transform_5, window_bounds = array<i64: 1, 32>}, {transform_indices = @transform_6, window_bounds = array<i64: 1, 1, 16, 32>}]} {
    %cst = arith.constant 0.000000e+00 : f32
    %0 = vector.broadcast %cst : f32 to vector<16x32xf32>
    %c0 = arith.constant 0 : index
    %c0_0 = arith.constant 0 : index
    %c0_1 = arith.constant 0 : index
    %c0_2 = arith.constant 0 : index
    %1 = vector.load %arg2[%c0, %c0_0, %c0_1, %c0_2] : memref<1x1x52x32xbf16, #tpu.memory_space<vmem>>, vector<1x1x52x32xbf16>
    %2 = vector.shape_cast %1 : vector<1x1x52x32xbf16> to vector<52x32xbf16>
    %3 = vector.extract_strided_slice %2 {offsets = [12, 0], sizes = [16, 32], strides = [1, 1]} : vector<52x32xbf16> to vector<16x32xbf16>
    %c0_3 = arith.constant 0 : index
    %c0_4 = arith.constant 0 : index
    %c0_5 = arith.constant 0 : index
    %c0_6 = arith.constant 0 : index
    %4 = vector.load %arg5[%c0_3, %c0_4, %c0_5, %c0_6] : memref<3x3x32x32xbf16, #tpu.memory_space<vmem>>, vector<1x1x32x32xbf16>
    %5 = vector.shape_cast %4 : vector<1x1x32x32xbf16> to vector<32x32xbf16>
    %cst_7 = arith.constant dense<0.000000e+00> : vector<16x32xf32>
    %6 = tpu.matmul %3, %5, %cst_7 {dimension_numbers = #tpu.dot_dimension_numbers<[1], [0], [0], [1], [0, 0, 1, 1], [], []>} : vector<16x32xbf16>, vector<32x32xbf16>, vector<16x32xf32> -> vector<16x32xf32>
    %7 = arith.addf %0, %6 : vector<16x32xf32>
    %8 = vector.extract_strided_slice %2 {offsets = [18, 0], sizes = [16, 32], strides = [1, 1]} : vector<52x32xbf16> to vector<16x32xbf16>
    %c0_8 = arith.constant 0 : index
    %c1 = arith.constant 1 : index
    %c0_9 = arith.constant 0 : index
    %c0_10 = arith.constant 0 : index
    %9 = vector.load %arg5[%c0_8, %c1, %c0_9, %c0_10] : memref<3x3x32x32xbf16, #tpu.memory_space<vmem>>, vector<1x1x32x32xbf16>
    %10 = vector.shape_cast %9 : vector<1x1x32x32xbf16> to vector<32x32xbf16>
    %cst_11 = arith.constant dense<0.000000e+00> : vector<16x32xf32>
    %11 = tpu.matmul %8, %10, %cst_11 {dimension_numbers = #tpu.dot_dimension_numbers<[1], [0], [0], [1], [0, 0, 1, 1], [], []>} : vector<16x32xbf16>, vector<32x32xbf16>, vector<16x32xf32> -> vector<16x32xf32>
    %12 = arith.addf %7, %11 : vector<16x32xf32>
    %13 = vector.extract_strided_slice %2 {offsets = [24, 0], sizes = [16, 32], strides = [1, 1]} : vector<52x32xbf16> to vector<16x32xbf16>
    %c0_12 = arith.constant 0 : index
    %c2 = arith.constant 2 : index
    %c0_13 = arith.constant 0 : index
    %c0_14 = arith.constant 0 : index
    %14 = vector.load %arg5[%c0_12, %c2, %c0_13, %c0_14] : memref<3x3x32x32xbf16, #tpu.memory_space<vmem>>, vector<1x1x32x32xbf16>
    %15 = vector.shape_cast %14 : vector<1x1x32x32xbf16> to vector<32x32xbf16>
    %cst_15 = arith.constant dense<0.000000e+00> : vector<16x32xf32>
    %16 = tpu.matmul %13, %15, %cst_15 {dimension_numbers = #tpu.dot_dimension_numbers<[1], [0], [0], [1], [0, 0, 1, 1], [], []>} : vector<16x32xbf16>, vector<32x32xbf16>, vector<16x32xf32> -> vector<16x32xf32>
    %17 = arith.addf %12, %16 : vector<16x32xf32>
    %c0_16 = arith.constant 0 : index
    %c0_17 = arith.constant 0 : index
    %c0_18 = arith.constant 0 : index
    %c0_19 = arith.constant 0 : index
    %18 = vector.load %arg3[%c0_16, %c0_17, %c0_18, %c0_19] : memref<1x1x52x32xbf16, #tpu.memory_space<vmem>>, vector<1x1x52x32xbf16>
    %19 = vector.shape_cast %18 : vector<1x1x52x32xbf16> to vector<52x32xbf16>
    %20 = vector.extract_strided_slice %19 {offsets = [12, 0], sizes = [16, 32], strides = [1, 1]} : vector<52x32xbf16> to vector<16x32xbf16>
    %c1_20 = arith.constant 1 : index
    %c0_21 = arith.constant 0 : index
    %c0_22 = arith.constant 0 : index
    %c0_23 = arith.constant 0 : index
    %21 = vector.load %arg5[%c1_20, %c0_21, %c0_22, %c0_23] : memref<3x3x32x32xbf16, #tpu.memory_space<vmem>>, vector<1x1x32x32xbf16>
    %22 = vector.shape_cast %21 : vector<1x1x32x32xbf16> to vector<32x32xbf16>
    %cst_24 = arith.constant dense<0.000000e+00> : vector<16x32xf32>
    %23 = tpu.matmul %20, %22, %cst_24 {dimension_numbers = #tpu.dot_dimension_numbers<[1], [0], [0], [1], [0, 0, 1, 1], [], []>} : vector<16x32xbf16>, vector<32x32xbf16>, vector<16x32xf32> -> vector<16x32xf32>
    %24 = arith.addf %17, %23 : vector<16x32xf32>
    %25 = vector.extract_strided_slice %19 {offsets = [18, 0], sizes = [16, 32], strides = [1, 1]} : vector<52x32xbf16> to vector<16x32xbf16>
    %c1_25 = arith.constant 1 : index
    %c1_26 = arith.constant 1 : index
    %c0_27 = arith.constant 0 : index
    %c0_28 = arith.constant 0 : index
    %26 = vector.load %arg5[%c1_25, %c1_26, %c0_27, %c0_28] : memref<3x3x32x32xbf16, #tpu.memory_space<vmem>>, vector<1x1x32x32xbf16>
    %27 = vector.shape_cast %26 : vector<1x1x32x32xbf16> to vector<32x32xbf16>
    %cst_29 = arith.constant dense<0.000000e+00> : vector<16x32xf32>
    %28 = tpu.matmul %25, %27, %cst_29 {dimension_numbers = #tpu.dot_dimension_numbers<[1], [0], [0], [1], [0, 0, 1, 1], [], []>} : vector<16x32xbf16>, vector<32x32xbf16>, vector<16x32xf32> -> vector<16x32xf32>
    %29 = arith.addf %24, %28 : vector<16x32xf32>
    %30 = vector.extract_strided_slice %19 {offsets = [24, 0], sizes = [16, 32], strides = [1, 1]} : vector<52x32xbf16> to vector<16x32xbf16>
    %c1_30 = arith.constant 1 : index
    %c2_31 = arith.constant 2 : index
    %c0_32 = arith.constant 0 : index
    %c0_33 = arith.constant 0 : index
    %31 = vector.load %arg5[%c1_30, %c2_31, %c0_32, %c0_33] : memref<3x3x32x32xbf16, #tpu.memory_space<vmem>>, vector<1x1x32x32xbf16>
    %32 = vector.shape_cast %31 : vector<1x1x32x32xbf16> to vector<32x32xbf16>
    %cst_34 = arith.constant dense<0.000000e+00> : vector<16x32xf32>
    %33 = tpu.matmul %30, %32, %cst_34 {dimension_numbers = #tpu.dot_dimension_numbers<[1], [0], [0], [1], [0, 0, 1, 1], [], []>} : vector<16x32xbf16>, vector<32x32xbf16>, vector<16x32xf32> -> vector<16x32xf32>
    %34 = arith.addf %29, %33 : vector<16x32xf32>
    %c0_35 = arith.constant 0 : index
    %c0_36 = arith.constant 0 : index
    %c0_37 = arith.constant 0 : index
    %c0_38 = arith.constant 0 : index
    %35 = vector.load %arg4[%c0_35, %c0_36, %c0_37, %c0_38] : memref<1x1x52x32xbf16, #tpu.memory_space<vmem>>, vector<1x1x52x32xbf16>
    %36 = vector.shape_cast %35 : vector<1x1x52x32xbf16> to vector<52x32xbf16>
    %37 = vector.extract_strided_slice %36 {offsets = [12, 0], sizes = [16, 32], strides = [1, 1]} : vector<52x32xbf16> to vector<16x32xbf16>
    %c2_39 = arith.constant 2 : index
    %c0_40 = arith.constant 0 : index
    %c0_41 = arith.constant 0 : index
    %c0_42 = arith.constant 0 : index
    %38 = vector.load %arg5[%c2_39, %c0_40, %c0_41, %c0_42] : memref<3x3x32x32xbf16, #tpu.memory_space<vmem>>, vector<1x1x32x32xbf16>
    %39 = vector.shape_cast %38 : vector<1x1x32x32xbf16> to vector<32x32xbf16>
    %cst_43 = arith.constant dense<0.000000e+00> : vector<16x32xf32>
    %40 = tpu.matmul %37, %39, %cst_43 {dimension_numbers = #tpu.dot_dimension_numbers<[1], [0], [0], [1], [0, 0, 1, 1], [], []>} : vector<16x32xbf16>, vector<32x32xbf16>, vector<16x32xf32> -> vector<16x32xf32>
    %41 = arith.addf %34, %40 : vector<16x32xf32>
    %42 = vector.extract_strided_slice %36 {offsets = [18, 0], sizes = [16, 32], strides = [1, 1]} : vector<52x32xbf16> to vector<16x32xbf16>
    %c2_44 = arith.constant 2 : index
    %c1_45 = arith.constant 1 : index
    %c0_46 = arith.constant 0 : index
    %c0_47 = arith.constant 0 : index
    %43 = vector.load %arg5[%c2_44, %c1_45, %c0_46, %c0_47] : memref<3x3x32x32xbf16, #tpu.memory_space<vmem>>, vector<1x1x32x32xbf16>
    %44 = vector.shape_cast %43 : vector<1x1x32x32xbf16> to vector<32x32xbf16>
    %cst_48 = arith.constant dense<0.000000e+00> : vector<16x32xf32>
    %45 = tpu.matmul %42, %44, %cst_48 {dimension_numbers = #tpu.dot_dimension_numbers<[1], [0], [0], [1], [0, 0, 1, 1], [], []>} : vector<16x32xbf16>, vector<32x32xbf16>, vector<16x32xf32> -> vector<16x32xf32>
    %46 = arith.addf %41, %45 : vector<16x32xf32>
    %47 = vector.extract_strided_slice %36 {offsets = [24, 0], sizes = [16, 32], strides = [1, 1]} : vector<52x32xbf16> to vector<16x32xbf16>
    %c2_49 = arith.constant 2 : index
    %c2_50 = arith.constant 2 : index
    %c0_51 = arith.constant 0 : index
    %c0_52 = arith.constant 0 : index
    %48 = vector.load %arg5[%c2_49, %c2_50, %c0_51, %c0_52] : memref<3x3x32x32xbf16, #tpu.memory_space<vmem>>, vector<1x1x32x32xbf16>
    %49 = vector.shape_cast %48 : vector<1x1x32x32xbf16> to vector<32x32xbf16>
    %cst_53 = arith.constant dense<0.000000e+00> : vector<16x32xf32>
    %50 = tpu.matmul %47, %49, %cst_53 {dimension_numbers = #tpu.dot_dimension_numbers<[1], [0], [0], [1], [0, 0, 1, 1], [], []>} : vector<16x32xbf16>, vector<32x32xbf16>, vector<16x32xf32> -> vector<16x32xf32>
    %51 = arith.addf %46, %50 : vector<16x32xf32>
    %c0_54 = arith.constant 0 : index
    %c0_55 = arith.constant 0 : index
    %52 = vector.load %arg6[%c0_54, %c0_55] : memref<1x32xf32, #tpu.memory_space<vmem>>, vector<1x32xf32>
    %53 = vector.broadcast %52 : vector<1x32xf32> to vector<16x32xf32>
    %54 = arith.mulf %51, %53 : vector<16x32xf32>
    %c0_56 = arith.constant 0 : index
    %c0_57 = arith.constant 0 : index
    %55 = vector.load %arg7[%c0_56, %c0_57] : memref<1x32xf32, #tpu.memory_space<vmem>>, vector<1x32xf32>
    %56 = vector.broadcast %55 : vector<1x32xf32> to vector<16x32xf32>
    %57 = arith.addf %54, %56 : vector<16x32xf32>
    %cst_58 = arith.constant 0.000000e+00 : f32
    %58 = vector.broadcast %cst_58 : f32 to vector<16x32xf32>
    %59 = arith.maximumf %57, %58 : vector<16x32xf32>
    %60 = arith.truncf %59 : vector<16x32xf32> to vector<16x32xbf16>
    %c0_59 = arith.constant 0 : index
    %c0_60 = arith.constant 0 : index
    %c0_61 = arith.constant 0 : index
    %c0_62 = arith.constant 0 : index
    %61 = vector.load %arg8[%c0_59, %c0_60, %c0_61, %c0_62] : memref<1x1x16x32xbf16, #tpu.memory_space<vmem>>, vector<1x1x16x32xbf16>
    %62 = vector.shape_cast %61 : vector<1x1x16x32xbf16> to vector<16x32xbf16>
    %63 = vector.shape_cast %60 : vector<16x32xbf16> to vector<1x1x16x32xbf16>
    tpu.vector_store %arg8[%c0_59, %c0_60, %c0_61, %c0_62], %63 {strides = array<i32>} : memref<1x1x16x32xbf16, #tpu.memory_space<vmem>>, vector<1x1x16x32xbf16>,
    return
  }
  func.func @transform_0(%arg0: i32, %arg1: i32) -> (i32, i32, i32, i32) {
    %c12_i32 = arith.constant 12 : i32
    %0 = arith.addi %arg1, %c12_i32 : i32
    %c0_i32 = arith.constant 0 : i32
    %c0_i32_0 = arith.constant 0 : i32
    %c0_i32_1 = arith.constant 0 : i32
    return %arg0, %0, %c0_i32, %c0_i32_0 : i32, i32, i32, i32
  }
  func.func @transform_1(%arg0: i32, %arg1: i32) -> (i32, i32, i32, i32) {
    %c18_i32 = arith.constant 18 : i32
    %0 = arith.addi %arg1, %c18_i32 : i32
    %c0_i32 = arith.constant 0 : i32
    %c0_i32_0 = arith.constant 0 : i32
    %c0_i32_1 = arith.constant 0 : i32
    return %arg0, %0, %c0_i32, %c0_i32_0 : i32, i32, i32, i32
  }
  func.func @transform_2(%arg0: i32, %arg1: i32) -> (i32, i32, i32, i32) {
    %c24_i32 = arith.constant 24 : i32
    %0 = arith.addi %arg1, %c24_i32 : i32
    %c0_i32 = arith.constant 0 : i32
    %c0_i32_0 = arith.constant 0 : i32
    %c0_i32_1 = arith.constant 0 : i32
    return %arg0, %0, %c0_i32, %c0_i32_0 : i32, i32, i32, i32
  }
  func.func @transform_3(%arg0: i32, %arg1: i32) -> (i32, i32, i32, i32) {
    %c0_i32 = arith.constant 0 : i32
    %c0_i32_0 = arith.constant 0 : i32
    %c0_i32_1 = arith.constant 0 : i32
    %c0_i32_2 = arith.constant 0 : i32
    %c0_i32_3 = arith.constant 0 : i32
    return %c0_i32, %c0_i32_0, %c0_i32_1, %c0_i32_2 : i32, i32, i32, i32
  }
  func.func @transform_4(%arg0: i32, %arg1: i32) -> (i32, i32) {
    %c0_i32 = arith.constant 0 : i32
    %c0_i32_0 = arith.constant 0 : i32
    %c0_i32_1 = arith.constant 0 : i32
    return %c0_i32, %c0_i32_0 : i32, i32
  }
  func.func @transform_5(%arg0: i32, %arg1: i32) -> (i32, i32) {
    %c0_i32 = arith.constant 0 : i32
    %c0_i32_0 = arith.constant 0 : i32
    %c0_i32_1 = arith.constant 0 : i32
    return %c0_i32, %c0_i32_0 : i32, i32
  }
  func.func @transform_6(%arg0: i32, %arg1: i32) -> (i32, i32, i32, i32) {
    %c0_i32 = arith.constant 0 : i32
    %c0_i32_0 = arith.constant 0 : i32
    %c0_i32_1 = arith.constant 0 : i32
    return %arg0, %arg1, %c0_i32, %c0_i32_0 : i32, i32, i32, i32
  }
}

module attributes {stable_mosaic.version = 11 : i64} {
  func.func @_matmul_affine_kernel(%arg0: i32, %arg1: i32, %arg2: i32, %arg3: memref<1x2x32xbf16, #tpu.memory_space<vmem>>, %arg4: memref<32x32xbf16, #tpu.memory_space<vmem>>, %arg5: memref<1x32xf32, #tpu.memory_space<vmem>>, %arg6: memref<1x32xf32, #tpu.memory_space<vmem>>, %arg7: memref<1x2x32xf32, #tpu.memory_space<vmem>>, %arg8: memref<2x32xf32, #tpu.memory_space<vmem>>) attributes {dimension_semantics = [#tpu.dimension_semantics<parallel>, #tpu.dimension_semantics<parallel>, #tpu.dimension_semantics<arbitrary>], iteration_bounds = array<i64: 1, 1, 1>, scalar_prefetch = 0 : i64, scratch_operands = 1 : i64, tpu.core_type = #tpu.core_type<tc>, window_params = [{transform_indices = @transform_0, window_bounds = array<i64: 1, 2, 32>}, {transform_indices = @transform_1, window_bounds = array<i64: 32, 32>}, {pipeline_mode = #tpu.pipeline_mode<synchronous>, transform_indices = @transform_2, window_bounds = array<i64: 1, 32>}, {pipeline_mode = #tpu.pipeline_mode<synchronous>, transform_indices = @transform_3, window_bounds = array<i64: 1, 32>}, {transform_indices = @transform_4, window_bounds = array<i64: 1, 2, 32>}]} {
    %c0_i32 = arith.constant 0 : i32
    %0 = arith.cmpi eq, %arg2, %c0_i32 : i32
    %1 = arith.extui %0 : i1 to i32
    %c0_i32_0 = arith.constant 0 : i32
    %2 = arith.cmpi ne, %1, %c0_i32_0 : i32
    scf.if %2 {
      %cst_11 = arith.constant 0.000000e+00 : f32
      %13 = vector.broadcast %cst_11 : f32 to vector<2x32xf32>
      %c0_12 = arith.constant 0 : index
      %c0_13 = arith.constant 0 : index
      %14 = vector.load %arg8[%c0_12, %c0_13] : memref<2x32xf32, #tpu.memory_space<vmem>>, vector<2x32xf32>
      tpu.vector_store %arg8[%c0_12, %c0_13], %13 {strides = array<i32>} : memref<2x32xf32, #tpu.memory_space<vmem>>, vector<2x32xf32>,
    } else {
    }
    %c0 = arith.constant 0 : index
    %c0_1 = arith.constant 0 : index
    %3 = vector.load %arg8[%c0, %c0_1] : memref<2x32xf32, #tpu.memory_space<vmem>>, vector<2x32xf32>
    %c0_2 = arith.constant 0 : index
    %c0_3 = arith.constant 0 : index
    %c0_4 = arith.constant 0 : index
    %4 = vector.load %arg3[%c0_2, %c0_3, %c0_4] : memref<1x2x32xbf16, #tpu.memory_space<vmem>>, vector<1x2x32xbf16>
    %5 = vector.shape_cast %4 : vector<1x2x32xbf16> to vector<2x32xbf16>
    %c0_5 = arith.constant 0 : index
    %c0_6 = arith.constant 0 : index
    %6 = vector.load %arg4[%c0_5, %c0_6] : memref<32x32xbf16, #tpu.memory_space<vmem>>, vector<32x32xbf16>
    %cst = arith.constant dense<0.000000e+00> : vector<2x32xf32>
    %7 = tpu.matmul %5, %6, %cst {dimension_numbers = #tpu.dot_dimension_numbers<[1], [0], [0], [1], [0, 0, 1, 1], [], []>} : vector<2x32xbf16>, vector<32x32xbf16>, vector<2x32xf32> -> vector<2x32xf32>
    %8 = arith.addf %3, %7 : vector<2x32xf32>
    %c0_7 = arith.constant 0 : index
    %c0_8 = arith.constant 0 : index
    %9 = vector.load %arg8[%c0_7, %c0_8] : memref<2x32xf32, #tpu.memory_space<vmem>>, vector<2x32xf32>
    tpu.vector_store %arg8[%c0_7, %c0_8], %8 {strides = array<i32>} : memref<2x32xf32, #tpu.memory_space<vmem>>, vector<2x32xf32>,
    %c0_i32_9 = arith.constant 0 : i32
    %10 = arith.cmpi eq, %arg2, %c0_i32_9 : i32
    %11 = arith.extui %10 : i1 to i32
    %c0_i32_10 = arith.constant 0 : i32
    %12 = arith.cmpi ne, %11, %c0_i32_10 : i32
    scf.if %12 {
      %c0_11 = arith.constant 0 : index
      %c0_12 = arith.constant 0 : index
      %13 = vector.load %arg8[%c0_11, %c0_12] : memref<2x32xf32, #tpu.memory_space<vmem>>, vector<2x32xf32>
      %c0_13 = arith.constant 0 : index
      %c0_14 = arith.constant 0 : index
      %14 = vector.load %arg5[%c0_13, %c0_14] : memref<1x32xf32, #tpu.memory_space<vmem>>, vector<1x32xf32>
      %15 = vector.broadcast %14 : vector<1x32xf32> to vector<2x32xf32>
      %16 = arith.mulf %13, %15 : vector<2x32xf32>
      %c0_15 = arith.constant 0 : index
      %c0_16 = arith.constant 0 : index
      %17 = vector.load %arg6[%c0_15, %c0_16] : memref<1x32xf32, #tpu.memory_space<vmem>>, vector<1x32xf32>
      %18 = vector.broadcast %17 : vector<1x32xf32> to vector<2x32xf32>
      %19 = arith.addf %16, %18 : vector<2x32xf32>
      %cst_17 = arith.constant 0.000000e+00 : f32
      %20 = vector.broadcast %cst_17 : f32 to vector<2x32xf32>
      %21 = arith.maximumf %19, %20 : vector<2x32xf32>
      %c0_18 = arith.constant 0 : index
      %c0_19 = arith.constant 0 : index
      %c0_20 = arith.constant 0 : index
      %22 = vector.load %arg7[%c0_18, %c0_19, %c0_20] : memref<1x2x32xf32, #tpu.memory_space<vmem>>, vector<1x2x32xf32>
      %23 = vector.shape_cast %22 : vector<1x2x32xf32> to vector<2x32xf32>
      %24 = vector.shape_cast %21 : vector<2x32xf32> to vector<1x2x32xf32>
      tpu.vector_store %arg7[%c0_18, %c0_19, %c0_20], %24 {strides = array<i32>} : memref<1x2x32xf32, #tpu.memory_space<vmem>>, vector<1x2x32xf32>,
    } else {
    }
    return
  }
  func.func @transform_0(%arg0: i32, %arg1: i32, %arg2: i32) -> (i32, i32, i32) {
    %c0_i32 = arith.constant 0 : i32
    return %arg0, %arg1, %arg2 : i32, i32, i32
  }
  func.func @transform_1(%arg0: i32, %arg1: i32, %arg2: i32) -> (i32, i32) {
    %c0_i32 = arith.constant 0 : i32
    %c0_i32_0 = arith.constant 0 : i32
    return %arg2, %c0_i32 : i32, i32
  }
  func.func @transform_2(%arg0: i32, %arg1: i32, %arg2: i32) -> (i32, i32) {
    %c0_i32 = arith.constant 0 : i32
    %c0_i32_0 = arith.constant 0 : i32
    %c0_i32_1 = arith.constant 0 : i32
    return %c0_i32, %c0_i32_0 : i32, i32
  }
  func.func @transform_3(%arg0: i32, %arg1: i32, %arg2: i32) -> (i32, i32) {
    %c0_i32 = arith.constant 0 : i32
    %c0_i32_0 = arith.constant 0 : i32
    %c0_i32_1 = arith.constant 0 : i32
    return %c0_i32, %c0_i32_0 : i32, i32
  }
  func.func @transform_4(%arg0: i32, %arg1: i32, %arg2: i32) -> (i32, i32, i32) {
    %c0_i32 = arith.constant 0 : i32
    %c0_i32_0 = arith.constant 0 : i32
    return %arg0, %arg1, %c0_i32 : i32, i32, i32
  }
}

module attributes {stable_mosaic.version = 11 : i64} {
  func.func @_matmul_affine_kernel(%arg0: i32, %arg1: i32, %arg2: i32, %arg3: memref<1x256x32xbf16, #tpu.memory_space<vmem>>, %arg4: memref<32x32xbf16, #tpu.memory_space<vmem>>, %arg5: memref<1x32xf32, #tpu.memory_space<vmem>>, %arg6: memref<1x32xf32, #tpu.memory_space<vmem>>, %arg7: memref<1x256x32xbf16, #tpu.memory_space<vmem>>, %arg8: memref<256x32xf32, #tpu.memory_space<vmem>>) attributes {dimension_semantics = [#tpu.dimension_semantics<parallel>, #tpu.dimension_semantics<parallel>, #tpu.dimension_semantics<arbitrary>], iteration_bounds = array<i64: 2, 1, 1>, scalar_prefetch = 0 : i64, scratch_operands = 1 : i64, tpu.core_type = #tpu.core_type<tc>, window_params = [{transform_indices = @transform_0, window_bounds = array<i64: 1, 256, 32>}, {transform_indices = @transform_1, window_bounds = array<i64: 32, 32>}, {pipeline_mode = #tpu.pipeline_mode<synchronous>, transform_indices = @transform_2, window_bounds = array<i64: 1, 32>}, {pipeline_mode = #tpu.pipeline_mode<synchronous>, transform_indices = @transform_3, window_bounds = array<i64: 1, 32>}, {transform_indices = @transform_4, window_bounds = array<i64: 1, 256, 32>}]} {
    %c0_i32 = arith.constant 0 : i32
    %0 = arith.cmpi eq, %arg2, %c0_i32 : i32
    %1 = arith.extui %0 : i1 to i32
    %c0_i32_0 = arith.constant 0 : i32
    %2 = arith.cmpi ne, %1, %c0_i32_0 : i32
    scf.if %2 {
      %cst_11 = arith.constant 0.000000e+00 : f32
      %13 = vector.broadcast %cst_11 : f32 to vector<256x32xf32>
      %c0_12 = arith.constant 0 : index
      %c0_13 = arith.constant 0 : index
      %14 = vector.load %arg8[%c0_12, %c0_13] : memref<256x32xf32, #tpu.memory_space<vmem>>, vector<256x32xf32>
      tpu.vector_store %arg8[%c0_12, %c0_13], %13 {strides = array<i32>} : memref<256x32xf32, #tpu.memory_space<vmem>>, vector<256x32xf32>,
    } else {
    }
    %c0 = arith.constant 0 : index
    %c0_1 = arith.constant 0 : index
    %3 = vector.load %arg8[%c0, %c0_1] : memref<256x32xf32, #tpu.memory_space<vmem>>, vector<256x32xf32>
    %c0_2 = arith.constant 0 : index
    %c0_3 = arith.constant 0 : index
    %c0_4 = arith.constant 0 : index
    %4 = vector.load %arg3[%c0_2, %c0_3, %c0_4] : memref<1x256x32xbf16, #tpu.memory_space<vmem>>, vector<1x256x32xbf16>
    %5 = vector.shape_cast %4 : vector<1x256x32xbf16> to vector<256x32xbf16>
    %c0_5 = arith.constant 0 : index
    %c0_6 = arith.constant 0 : index
    %6 = vector.load %arg4[%c0_5, %c0_6] : memref<32x32xbf16, #tpu.memory_space<vmem>>, vector<32x32xbf16>
    %cst = arith.constant dense<0.000000e+00> : vector<256x32xf32>
    %7 = tpu.matmul %5, %6, %cst {dimension_numbers = #tpu.dot_dimension_numbers<[1], [0], [0], [1], [0, 0, 1, 1], [], []>} : vector<256x32xbf16>, vector<32x32xbf16>, vector<256x32xf32> -> vector<256x32xf32>
    %8 = arith.addf %3, %7 : vector<256x32xf32>
    %c0_7 = arith.constant 0 : index
    %c0_8 = arith.constant 0 : index
    %9 = vector.load %arg8[%c0_7, %c0_8] : memref<256x32xf32, #tpu.memory_space<vmem>>, vector<256x32xf32>
    tpu.vector_store %arg8[%c0_7, %c0_8], %8 {strides = array<i32>} : memref<256x32xf32, #tpu.memory_space<vmem>>, vector<256x32xf32>,
    %c0_i32_9 = arith.constant 0 : i32
    %10 = arith.cmpi eq, %arg2, %c0_i32_9 : i32
    %11 = arith.extui %10 : i1 to i32
    %c0_i32_10 = arith.constant 0 : i32
    %12 = arith.cmpi ne, %11, %c0_i32_10 : i32
    scf.if %12 {
      %c0_11 = arith.constant 0 : index
      %c0_12 = arith.constant 0 : index
      %13 = vector.load %arg8[%c0_11, %c0_12] : memref<256x32xf32, #tpu.memory_space<vmem>>, vector<256x32xf32>
      %c0_13 = arith.constant 0 : index
      %c0_14 = arith.constant 0 : index
      %14 = vector.load %arg5[%c0_13, %c0_14] : memref<1x32xf32, #tpu.memory_space<vmem>>, vector<1x32xf32>
      %15 = vector.broadcast %14 : vector<1x32xf32> to vector<256x32xf32>
      %16 = arith.mulf %13, %15 : vector<256x32xf32>
      %c0_15 = arith.constant 0 : index
      %c0_16 = arith.constant 0 : index
      %17 = vector.load %arg6[%c0_15, %c0_16] : memref<1x32xf32, #tpu.memory_space<vmem>>, vector<1x32xf32>
      %18 = vector.broadcast %17 : vector<1x32xf32> to vector<256x32xf32>
      %19 = arith.addf %16, %18 : vector<256x32xf32>
      %cst_17 = arith.constant 0.000000e+00 : f32
      %20 = vector.broadcast %cst_17 : f32 to vector<256x32xf32>
      %21 = arith.maximumf %19, %20 : vector<256x32xf32>
      %22 = arith.truncf %21 : vector<256x32xf32> to vector<256x32xbf16>
      %c0_18 = arith.constant 0 : index
      %c0_19 = arith.constant 0 : index
      %c0_20 = arith.constant 0 : index
      %23 = vector.load %arg7[%c0_18, %c0_19, %c0_20] : memref<1x256x32xbf16, #tpu.memory_space<vmem>>, vector<1x256x32xbf16>
      %24 = vector.shape_cast %23 : vector<1x256x32xbf16> to vector<256x32xbf16>
      %25 = vector.shape_cast %22 : vector<256x32xbf16> to vector<1x256x32xbf16>
      tpu.vector_store %arg7[%c0_18, %c0_19, %c0_20], %25 {strides = array<i32>} : memref<1x256x32xbf16, #tpu.memory_space<vmem>>, vector<1x256x32xbf16>,
    } else {
    }
    return
  }
  func.func @transform_0(%arg0: i32, %arg1: i32, %arg2: i32) -> (i32, i32, i32) {
    %c0_i32 = arith.constant 0 : i32
    return %arg0, %arg1, %arg2 : i32, i32, i32
  }
  func.func @transform_1(%arg0: i32, %arg1: i32, %arg2: i32) -> (i32, i32) {
    %c0_i32 = arith.constant 0 : i32
    %c0_i32_0 = arith.constant 0 : i32
    return %arg2, %c0_i32 : i32, i32
  }
  func.func @transform_2(%arg0: i32, %arg1: i32, %arg2: i32) -> (i32, i32) {
    %c0_i32 = arith.constant 0 : i32
    %c0_i32_0 = arith.constant 0 : i32
    %c0_i32_1 = arith.constant 0 : i32
    return %c0_i32, %c0_i32_0 : i32, i32
  }
  func.func @transform_3(%arg0: i32, %arg1: i32, %arg2: i32) -> (i32, i32) {
    %c0_i32 = arith.constant 0 : i32
    %c0_i32_0 = arith.constant 0 : i32
    %c0_i32_1 = arith.constant 0 : i32
    return %c0_i32, %c0_i32_0 : i32, i32
  }
  func.func @transform_4(%arg0: i32, %arg1: i32, %arg2: i32) -> (i32, i32, i32) {
    %c0_i32 = arith.constant 0 : i32
    %c0_i32_0 = arith.constant 0 : i32
    return %arg0, %arg1, %c0_i32 : i32, i32, i32
  }
}

module attributes {stable_mosaic.version = 11 : i64} {
  func.func @_matmul_affine_kernel(%arg0: i32, %arg1: i32, %arg2: i32, %arg3: memref<1x2x160xbf16, #tpu.memory_space<vmem>>, %arg4: memref<160x32xbf16, #tpu.memory_space<vmem>>, %arg5: memref<1x32xf32, #tpu.memory_space<vmem>>, %arg6: memref<1x32xf32, #tpu.memory_space<vmem>>, %arg7: memref<1x2x32xf32, #tpu.memory_space<vmem>>, %arg8: memref<2x32xf32, #tpu.memory_space<vmem>>) attributes {dimension_semantics = [#tpu.dimension_semantics<parallel>, #tpu.dimension_semantics<parallel>, #tpu.dimension_semantics<arbitrary>], iteration_bounds = array<i64: 1, 1, 1>, scalar_prefetch = 0 : i64, scratch_operands = 1 : i64, tpu.core_type = #tpu.core_type<tc>, window_params = [{transform_indices = @transform_0, window_bounds = array<i64: 1, 2, 160>}, {transform_indices = @transform_1, window_bounds = array<i64: 160, 32>}, {pipeline_mode = #tpu.pipeline_mode<synchronous>, transform_indices = @transform_2, window_bounds = array<i64: 1, 32>}, {pipeline_mode = #tpu.pipeline_mode<synchronous>, transform_indices = @transform_3, window_bounds = array<i64: 1, 32>}, {transform_indices = @transform_4, window_bounds = array<i64: 1, 2, 32>}]} {
    %c0_i32 = arith.constant 0 : i32
    %0 = arith.cmpi eq, %arg2, %c0_i32 : i32
    %1 = arith.extui %0 : i1 to i32
    %c0_i32_0 = arith.constant 0 : i32
    %2 = arith.cmpi ne, %1, %c0_i32_0 : i32
    scf.if %2 {
      %cst_11 = arith.constant 0.000000e+00 : f32
      %13 = vector.broadcast %cst_11 : f32 to vector<2x32xf32>
      %c0_12 = arith.constant 0 : index
      %c0_13 = arith.constant 0 : index
      %14 = vector.load %arg8[%c0_12, %c0_13] : memref<2x32xf32, #tpu.memory_space<vmem>>, vector<2x32xf32>
      tpu.vector_store %arg8[%c0_12, %c0_13], %13 {strides = array<i32>} : memref<2x32xf32, #tpu.memory_space<vmem>>, vector<2x32xf32>,
    } else {
    }
    %c0 = arith.constant 0 : index
    %c0_1 = arith.constant 0 : index
    %3 = vector.load %arg8[%c0, %c0_1] : memref<2x32xf32, #tpu.memory_space<vmem>>, vector<2x32xf32>
    %c0_2 = arith.constant 0 : index
    %c0_3 = arith.constant 0 : index
    %c0_4 = arith.constant 0 : index
    %4 = vector.load %arg3[%c0_2, %c0_3, %c0_4] : memref<1x2x160xbf16, #tpu.memory_space<vmem>>, vector<1x2x160xbf16>
    %5 = vector.shape_cast %4 : vector<1x2x160xbf16> to vector<2x160xbf16>
    %c0_5 = arith.constant 0 : index
    %c0_6 = arith.constant 0 : index
    %6 = vector.load %arg4[%c0_5, %c0_6] : memref<160x32xbf16, #tpu.memory_space<vmem>>, vector<160x32xbf16>
    %cst = arith.constant dense<0.000000e+00> : vector<2x32xf32>
    %7 = tpu.matmul %5, %6, %cst {dimension_numbers = #tpu.dot_dimension_numbers<[1], [0], [0], [1], [0, 0, 1, 1], [], []>} : vector<2x160xbf16>, vector<160x32xbf16>, vector<2x32xf32> -> vector<2x32xf32>
    %8 = arith.addf %3, %7 : vector<2x32xf32>
    %c0_7 = arith.constant 0 : index
    %c0_8 = arith.constant 0 : index
    %9 = vector.load %arg8[%c0_7, %c0_8] : memref<2x32xf32, #tpu.memory_space<vmem>>, vector<2x32xf32>
    tpu.vector_store %arg8[%c0_7, %c0_8], %8 {strides = array<i32>} : memref<2x32xf32, #tpu.memory_space<vmem>>, vector<2x32xf32>,
    %c0_i32_9 = arith.constant 0 : i32
    %10 = arith.cmpi eq, %arg2, %c0_i32_9 : i32
    %11 = arith.extui %10 : i1 to i32
    %c0_i32_10 = arith.constant 0 : i32
    %12 = arith.cmpi ne, %11, %c0_i32_10 : i32
    scf.if %12 {
      %c0_11 = arith.constant 0 : index
      %c0_12 = arith.constant 0 : index
      %13 = vector.load %arg8[%c0_11, %c0_12] : memref<2x32xf32, #tpu.memory_space<vmem>>, vector<2x32xf32>
      %c0_13 = arith.constant 0 : index
      %c0_14 = arith.constant 0 : index
      %14 = vector.load %arg5[%c0_13, %c0_14] : memref<1x32xf32, #tpu.memory_space<vmem>>, vector<1x32xf32>
      %15 = vector.broadcast %14 : vector<1x32xf32> to vector<2x32xf32>
      %16 = arith.mulf %13, %15 : vector<2x32xf32>
      %c0_15 = arith.constant 0 : index
      %c0_16 = arith.constant 0 : index
      %17 = vector.load %arg6[%c0_15, %c0_16] : memref<1x32xf32, #tpu.memory_space<vmem>>, vector<1x32xf32>
      %18 = vector.broadcast %17 : vector<1x32xf32> to vector<2x32xf32>
      %19 = arith.addf %16, %18 : vector<2x32xf32>
      %c0_17 = arith.constant 0 : index
      %c0_18 = arith.constant 0 : index
      %c0_19 = arith.constant 0 : index
      %20 = vector.load %arg7[%c0_17, %c0_18, %c0_19] : memref<1x2x32xf32, #tpu.memory_space<vmem>>, vector<1x2x32xf32>
      %21 = vector.shape_cast %20 : vector<1x2x32xf32> to vector<2x32xf32>
      %22 = vector.shape_cast %19 : vector<2x32xf32> to vector<1x2x32xf32>
      tpu.vector_store %arg7[%c0_17, %c0_18, %c0_19], %22 {strides = array<i32>} : memref<1x2x32xf32, #tpu.memory_space<vmem>>, vector<1x2x32xf32>,
    } else {
    }
    return
  }
  func.func @transform_0(%arg0: i32, %arg1: i32, %arg2: i32) -> (i32, i32, i32) {
    %c0_i32 = arith.constant 0 : i32
    return %arg0, %arg1, %arg2 : i32, i32, i32
  }
  func.func @transform_1(%arg0: i32, %arg1: i32, %arg2: i32) -> (i32, i32) {
    %c0_i32 = arith.constant 0 : i32
    %c0_i32_0 = arith.constant 0 : i32
    return %arg2, %c0_i32 : i32, i32
  }
  func.func @transform_2(%arg0: i32, %arg1: i32, %arg2: i32) -> (i32, i32) {
    %c0_i32 = arith.constant 0 : i32
    %c0_i32_0 = arith.constant 0 : i32
    %c0_i32_1 = arith.constant 0 : i32
    return %c0_i32, %c0_i32_0 : i32, i32
  }
  func.func @transform_3(%arg0: i32, %arg1: i32, %arg2: i32) -> (i32, i32) {
    %c0_i32 = arith.constant 0 : i32
    %c0_i32_0 = arith.constant 0 : i32
    %c0_i32_1 = arith.constant 0 : i32
    return %c0_i32, %c0_i32_0 : i32, i32
  }
  func.func @transform_4(%arg0: i32, %arg1: i32, %arg2: i32) -> (i32, i32, i32) {
    %c0_i32 = arith.constant 0 : i32
    %c0_i32_0 = arith.constant 0 : i32
    return %arg0, %arg1, %c0_i32 : i32, i32, i32
  }
}

module attributes {stable_mosaic.version = 11 : i64} {
  func.func @_matmul_affine_kernel(%arg0: i32, %arg1: i32, %arg2: i32, %arg3: memref<1x8x32xbf16, #tpu.memory_space<vmem>>, %arg4: memref<32x32xbf16, #tpu.memory_space<vmem>>, %arg5: memref<1x32xf32, #tpu.memory_space<vmem>>, %arg6: memref<1x32xf32, #tpu.memory_space<vmem>>, %arg7: memref<1x8x32xf32, #tpu.memory_space<vmem>>, %arg8: memref<8x32xf32, #tpu.memory_space<vmem>>) attributes {dimension_semantics = [#tpu.dimension_semantics<parallel>, #tpu.dimension_semantics<parallel>, #tpu.dimension_semantics<arbitrary>], iteration_bounds = array<i64: 1, 1, 1>, scalar_prefetch = 0 : i64, scratch_operands = 1 : i64, tpu.core_type = #tpu.core_type<tc>, window_params = [{transform_indices = @transform_0, window_bounds = array<i64: 1, 8, 32>}, {transform_indices = @transform_1, window_bounds = array<i64: 32, 32>}, {pipeline_mode = #tpu.pipeline_mode<synchronous>, transform_indices = @transform_2, window_bounds = array<i64: 1, 32>}, {pipeline_mode = #tpu.pipeline_mode<synchronous>, transform_indices = @transform_3, window_bounds = array<i64: 1, 32>}, {transform_indices = @transform_4, window_bounds = array<i64: 1, 8, 32>}]} {
    %c0_i32 = arith.constant 0 : i32
    %0 = arith.cmpi eq, %arg2, %c0_i32 : i32
    %1 = arith.extui %0 : i1 to i32
    %c0_i32_0 = arith.constant 0 : i32
    %2 = arith.cmpi ne, %1, %c0_i32_0 : i32
    scf.if %2 {
      %cst_11 = arith.constant 0.000000e+00 : f32
      %13 = vector.broadcast %cst_11 : f32 to vector<8x32xf32>
      %c0_12 = arith.constant 0 : index
      %c0_13 = arith.constant 0 : index
      %14 = vector.load %arg8[%c0_12, %c0_13] : memref<8x32xf32, #tpu.memory_space<vmem>>, vector<8x32xf32>
      tpu.vector_store %arg8[%c0_12, %c0_13], %13 {strides = array<i32>} : memref<8x32xf32, #tpu.memory_space<vmem>>, vector<8x32xf32>,
    } else {
    }
    %c0 = arith.constant 0 : index
    %c0_1 = arith.constant 0 : index
    %3 = vector.load %arg8[%c0, %c0_1] : memref<8x32xf32, #tpu.memory_space<vmem>>, vector<8x32xf32>
    %c0_2 = arith.constant 0 : index
    %c0_3 = arith.constant 0 : index
    %c0_4 = arith.constant 0 : index
    %4 = vector.load %arg3[%c0_2, %c0_3, %c0_4] : memref<1x8x32xbf16, #tpu.memory_space<vmem>>, vector<1x8x32xbf16>
    %5 = vector.shape_cast %4 : vector<1x8x32xbf16> to vector<8x32xbf16>
    %c0_5 = arith.constant 0 : index
    %c0_6 = arith.constant 0 : index
    %6 = vector.load %arg4[%c0_5, %c0_6] : memref<32x32xbf16, #tpu.memory_space<vmem>>, vector<32x32xbf16>
    %cst = arith.constant dense<0.000000e+00> : vector<8x32xf32>
    %7 = tpu.matmul %5, %6, %cst {dimension_numbers = #tpu.dot_dimension_numbers<[1], [0], [0], [1], [0, 0, 1, 1], [], []>} : vector<8x32xbf16>, vector<32x32xbf16>, vector<8x32xf32> -> vector<8x32xf32>
    %8 = arith.addf %3, %7 : vector<8x32xf32>
    %c0_7 = arith.constant 0 : index
    %c0_8 = arith.constant 0 : index
    %9 = vector.load %arg8[%c0_7, %c0_8] : memref<8x32xf32, #tpu.memory_space<vmem>>, vector<8x32xf32>
    tpu.vector_store %arg8[%c0_7, %c0_8], %8 {strides = array<i32>} : memref<8x32xf32, #tpu.memory_space<vmem>>, vector<8x32xf32>,
    %c0_i32_9 = arith.constant 0 : i32
    %10 = arith.cmpi eq, %arg2, %c0_i32_9 : i32
    %11 = arith.extui %10 : i1 to i32
    %c0_i32_10 = arith.constant 0 : i32
    %12 = arith.cmpi ne, %11, %c0_i32_10 : i32
    scf.if %12 {
      %c0_11 = arith.constant 0 : index
      %c0_12 = arith.constant 0 : index
      %13 = vector.load %arg8[%c0_11, %c0_12] : memref<8x32xf32, #tpu.memory_space<vmem>>, vector<8x32xf32>
      %c0_13 = arith.constant 0 : index
      %c0_14 = arith.constant 0 : index
      %14 = vector.load %arg5[%c0_13, %c0_14] : memref<1x32xf32, #tpu.memory_space<vmem>>, vector<1x32xf32>
      %15 = vector.broadcast %14 : vector<1x32xf32> to vector<8x32xf32>
      %16 = arith.mulf %13, %15 : vector<8x32xf32>
      %c0_15 = arith.constant 0 : index
      %c0_16 = arith.constant 0 : index
      %17 = vector.load %arg6[%c0_15, %c0_16] : memref<1x32xf32, #tpu.memory_space<vmem>>, vector<1x32xf32>
      %18 = vector.broadcast %17 : vector<1x32xf32> to vector<8x32xf32>
      %19 = arith.addf %16, %18 : vector<8x32xf32>
      %cst_17 = arith.constant 0.000000e+00 : f32
      %20 = vector.broadcast %cst_17 : f32 to vector<8x32xf32>
      %21 = arith.maximumf %19, %20 : vector<8x32xf32>
      %c0_18 = arith.constant 0 : index
      %c0_19 = arith.constant 0 : index
      %c0_20 = arith.constant 0 : index
      %22 = vector.load %arg7[%c0_18, %c0_19, %c0_20] : memref<1x8x32xf32, #tpu.memory_space<vmem>>, vector<1x8x32xf32>
      %23 = vector.shape_cast %22 : vector<1x8x32xf32> to vector<8x32xf32>
      %24 = vector.shape_cast %21 : vector<8x32xf32> to vector<1x8x32xf32>
      tpu.vector_store %arg7[%c0_18, %c0_19, %c0_20], %24 {strides = array<i32>} : memref<1x8x32xf32, #tpu.memory_space<vmem>>, vector<1x8x32xf32>,
    } else {
    }
    return
  }
  func.func @transform_0(%arg0: i32, %arg1: i32, %arg2: i32) -> (i32, i32, i32) {
    %c0_i32 = arith.constant 0 : i32
    return %arg0, %arg1, %arg2 : i32, i32, i32
  }
  func.func @transform_1(%arg0: i32, %arg1: i32, %arg2: i32) -> (i32, i32) {
    %c0_i32 = arith.constant 0 : i32
    %c0_i32_0 = arith.constant 0 : i32
    return %arg2, %c0_i32 : i32, i32
  }
  func.func @transform_2(%arg0: i32, %arg1: i32, %arg2: i32) -> (i32, i32) {
    %c0_i32 = arith.constant 0 : i32
    %c0_i32_0 = arith.constant 0 : i32
    %c0_i32_1 = arith.constant 0 : i32
    return %c0_i32, %c0_i32_0 : i32, i32
  }
  func.func @transform_3(%arg0: i32, %arg1: i32, %arg2: i32) -> (i32, i32) {
    %c0_i32 = arith.constant 0 : i32
    %c0_i32_0 = arith.constant 0 : i32
    %c0_i32_1 = arith.constant 0 : i32
    return %c0_i32, %c0_i32_0 : i32, i32
  }
  func.func @transform_4(%arg0: i32, %arg1: i32, %arg2: i32) -> (i32, i32, i32) {
    %c0_i32 = arith.constant 0 : i32
    %c0_i32_0 = arith.constant 0 : i32
    return %arg0, %arg1, %c0_i32 : i32, i32, i32
  }
}

module attributes {stable_mosaic.version = 11 : i64} {
  func.func @_fused_conv2_kernel(%arg0: i32, %arg1: i32, %arg2: memref<1x256x32xbf16, #tpu.memory_space<vmem>>, %arg3: memref<1x256x32xbf16, #tpu.memory_space<vmem>>, %arg4: memref<1x256x32xbf16, #tpu.memory_space<vmem>>, %arg5: memref<1x256x32xbf16, #tpu.memory_space<vmem>>, %arg6: memref<1x5x32xf32, #tpu.memory_space<vmem>>, %arg7: memref<1x1x32xf32, #tpu.memory_space<vmem>>, %arg8: memref<2x5x32x32xbf16, #tpu.memory_space<vmem>>, %arg9: memref<1x32xf32, #tpu.memory_space<vmem>>, %arg10: memref<1x32xf32, #tpu.memory_space<vmem>>, %arg11: memref<1x256x32xf32, #tpu.memory_space<vmem>>) attributes {dimension_semantics = [#tpu.dimension_semantics<parallel>, #tpu.dimension_semantics<parallel>], iteration_bounds = array<i64: 2, 1>, scalar_prefetch = 0 : i64, scratch_operands = 0 : i64, tpu.core_type = #tpu.core_type<tc>, window_params = [{transform_indices = @transform_0, window_bounds = array<i64: 1, 256, 32>}, {transform_indices = @transform_1, window_bounds = array<i64: 1, 256, 32>}, {transform_indices = @transform_2, window_bounds = array<i64: 1, 256, 32>}, {transform_indices = @transform_3, window_bounds = array<i64: 1, 256, 32>}, {transform_indices = @transform_4, window_bounds = array<i64: 1, 5, 32>}, {transform_indices = @transform_5, window_bounds = array<i64: 1, 1, 32>}, {pipeline_mode = #tpu.pipeline_mode<synchronous>, transform_indices = @transform_6, window_bounds = array<i64: 2, 5, 32, 32>}, {pipeline_mode = #tpu.pipeline_mode<synchronous>, transform_indices = @transform_7, window_bounds = array<i64: 1, 32>}, {pipeline_mode = #tpu.pipeline_mode<synchronous>, transform_indices = @transform_8, window_bounds = array<i64: 1, 32>}, {transform_indices = @transform_9, window_bounds = array<i64: 1, 256, 32>}]} {
    %c0 = arith.constant 0 : index
    %c0_0 = arith.constant 0 : index
    %c0_1 = arith.constant 0 : index
    %0 = vector.load %arg6[%c0, %c0_0, %c0_1] : memref<1x5x32xf32, #tpu.memory_space<vmem>>, vector<1x5x32xf32>
    %1 = vector.shape_cast %0 : vector<1x5x32xf32> to vector<5x32xf32>
    %c0_2 = arith.constant 0 : index
    %c0_3 = arith.constant 0 : index
    %c0_4 = arith.constant 0 : index
    %2 = vector.load %arg7[%c0_2, %c0_3, %c0_4] : memref<1x1x32xf32, #tpu.memory_space<vmem>>, vector<1x1x32xf32>
    %3 = vector.shape_cast %2 : vector<1x1x32xf32> to vector<1x32xf32>
    %4 = vector.broadcast %3 : vector<1x32xf32> to vector<5x32xf32>
    %5 = arith.subf %1, %4 : vector<5x32xf32>
    %cst = arith.constant 9.99999997E-7 : f32
    %6 = vector.broadcast %cst : f32 to vector<5x32xf32>
    %7 = arith.addf %5, %6 : vector<5x32xf32>
    %8 = arith.mulf %7, %7 : vector<5x32xf32>
    %cst_5 = arith.constant dense<0.000000e+00> : vector<5xf32>
    %9 = vector.multi_reduction <add>, %8, %cst_5 [1] : vector<5x32xf32> to vector<5xf32>
    %10 = vector.shape_cast %9 : vector<5xf32> to vector<5x1xf32>
    %11 = math.sqrt %10 : vector<5x1xf32>
    %cst_6 = arith.constant 1.000000e+00 : f32
    %12 = vector.broadcast %cst_6 : f32 to vector<5x1xf32>
    %13 = arith.addf %12, %11 : vector<5x1xf32>
    %14 = tpu.reciprocal %13 {approx = true} : vector<5x1xf32> -> vector<5x1xf32>
    %cst_7 = arith.constant 0.000000e+00 : f32
    %15 = vector.broadcast %cst_7 : f32 to vector<256x32xf32>
    %c0_8 = arith.constant 0 : index
    %c0_9 = arith.constant 0 : index
    %c0_10 = arith.constant 0 : index
    %c0_11 = arith.constant 0 : index
    %16 = vector.load %arg8[%c0_8, %c0_9, %c0_10, %c0_11] : memref<2x5x32x32xbf16, #tpu.memory_space<vmem>>, vector<1x1x32x32xbf16>
    %17 = vector.shape_cast %16 : vector<1x1x32x32xbf16> to vector<32x32xbf16>
    %18 = arith.extf %17 : vector<32x32xbf16> to vector<32x32xf32>
    %19 = vector.extract_strided_slice %14 {offsets = [0, 0], sizes = [1, 1], strides = [1, 1]} : vector<5x1xf32> to vector<1x1xf32>
    %c1 = arith.constant 1 : index
    %c0_12 = arith.constant 0 : index
    %c0_13 = arith.constant 0 : index
    %c0_14 = arith.constant 0 : index
    %20 = vector.load %arg8[%c1, %c0_12, %c0_13, %c0_14] : memref<2x5x32x32xbf16, #tpu.memory_space<vmem>>, vector<1x1x32x32xbf16>
    %21 = vector.shape_cast %20 : vector<1x1x32x32xbf16> to vector<32x32xbf16>
    %22 = arith.extf %21 : vector<32x32xbf16> to vector<32x32xf32>
    %23 = vector.broadcast %19 : vector<1x1xf32> to vector<32x32xf32>
    %24 = arith.mulf %23, %22 : vector<32x32xf32>
    %25 = arith.addf %18, %24 : vector<32x32xf32>
    %26 = arith.truncf %25 : vector<32x32xf32> to vector<32x32xbf16>
    %c0_15 = arith.constant 0 : index
    %c0_16 = arith.constant 0 : index
    %c0_17 = arith.constant 0 : index
    %27 = vector.load %arg2[%c0_15, %c0_16, %c0_17] : memref<1x256x32xbf16, #tpu.memory_space<vmem>>, vector<1x256x32xbf16>
    %28 = vector.shape_cast %27 : vector<1x256x32xbf16> to vector<256x32xbf16>
    %cst_18 = arith.constant dense<0.000000e+00> : vector<256x32xf32>
    %29 = tpu.matmul %28, %26, %cst_18 {dimension_numbers = #tpu.dot_dimension_numbers<[1], [0], [0], [1], [0, 0, 1, 1], [], []>} : vector<256x32xbf16>, vector<32x32xbf16>, vector<256x32xf32> -> vector<256x32xf32>
    %30 = arith.addf %15, %29 : vector<256x32xf32>
    %c0_19 = arith.constant 0 : index
    %c1_20 = arith.constant 1 : index
    %c0_21 = arith.constant 0 : index
    %c0_22 = arith.constant 0 : index
    %31 = vector.load %arg8[%c0_19, %c1_20, %c0_21, %c0_22] : memref<2x5x32x32xbf16, #tpu.memory_space<vmem>>, vector<1x1x32x32xbf16>
    %32 = vector.shape_cast %31 : vector<1x1x32x32xbf16> to vector<32x32xbf16>
    %33 = arith.extf %32 : vector<32x32xbf16> to vector<32x32xf32>
    %34 = vector.extract_strided_slice %14 {offsets = [1, 0], sizes = [1, 1], strides = [1, 1]} : vector<5x1xf32> to vector<1x1xf32>
    %c1_23 = arith.constant 1 : index
    %c1_24 = arith.constant 1 : index
    %c0_25 = arith.constant 0 : index
    %c0_26 = arith.constant 0 : index
    %35 = vector.load %arg8[%c1_23, %c1_24, %c0_25, %c0_26] : memref<2x5x32x32xbf16, #tpu.memory_space<vmem>>, vector<1x1x32x32xbf16>
    %36 = vector.shape_cast %35 : vector<1x1x32x32xbf16> to vector<32x32xbf16>
    %37 = arith.extf %36 : vector<32x32xbf16> to vector<32x32xf32>
    %38 = vector.broadcast %34 : vector<1x1xf32> to vector<32x32xf32>
    %39 = arith.mulf %38, %37 : vector<32x32xf32>
    %40 = arith.addf %33, %39 : vector<32x32xf32>
    %41 = arith.truncf %40 : vector<32x32xf32> to vector<32x32xbf16>
    %c0_27 = arith.constant 0 : index
    %c0_28 = arith.constant 0 : index
    %c0_29 = arith.constant 0 : index
    %42 = vector.load %arg3[%c0_27, %c0_28, %c0_29] : memref<1x256x32xbf16, #tpu.memory_space<vmem>>, vector<1x256x32xbf16>
    %43 = vector.shape_cast %42 : vector<1x256x32xbf16> to vector<256x32xbf16>
    %cst_30 = arith.constant dense<0.000000e+00> : vector<256x32xf32>
    %44 = tpu.matmul %43, %41, %cst_30 {dimension_numbers = #tpu.dot_dimension_numbers<[1], [0], [0], [1], [0, 0, 1, 1], [], []>} : vector<256x32xbf16>, vector<32x32xbf16>, vector<256x32xf32> -> vector<256x32xf32>
    %45 = arith.addf %30, %44 : vector<256x32xf32>
    %c0_31 = arith.constant 0 : index
    %c2 = arith.constant 2 : index
    %c0_32 = arith.constant 0 : index
    %c0_33 = arith.constant 0 : index
    %46 = vector.load %arg8[%c0_31, %c2, %c0_32, %c0_33] : memref<2x5x32x32xbf16, #tpu.memory_space<vmem>>, vector<1x1x32x32xbf16>
    %47 = vector.shape_cast %46 : vector<1x1x32x32xbf16> to vector<32x32xbf16>
    %48 = arith.extf %47 : vector<32x32xbf16> to vector<32x32xf32>
    %49 = vector.extract_strided_slice %14 {offsets = [2, 0], sizes = [1, 1], strides = [1, 1]} : vector<5x1xf32> to vector<1x1xf32>
    %c1_34 = arith.constant 1 : index
    %c2_35 = arith.constant 2 : index
    %c0_36 = arith.constant 0 : index
    %c0_37 = arith.constant 0 : index
    %50 = vector.load %arg8[%c1_34, %c2_35, %c0_36, %c0_37] : memref<2x5x32x32xbf16, #tpu.memory_space<vmem>>, vector<1x1x32x32xbf16>
    %51 = vector.shape_cast %50 : vector<1x1x32x32xbf16> to vector<32x32xbf16>
    %52 = arith.extf %51 : vector<32x32xbf16> to vector<32x32xf32>
    %53 = vector.broadcast %49 : vector<1x1xf32> to vector<32x32xf32>
    %54 = arith.mulf %53, %52 : vector<32x32xf32>
    %55 = arith.addf %48, %54 : vector<32x32xf32>
    %56 = arith.truncf %55 : vector<32x32xf32> to vector<32x32xbf16>
    %c0_38 = arith.constant 0 : index
    %c0_39 = arith.constant 0 : index
    %c0_40 = arith.constant 0 : index
    %57 = vector.load %arg4[%c0_38, %c0_39, %c0_40] : memref<1x256x32xbf16, #tpu.memory_space<vmem>>, vector<1x256x32xbf16>
    %58 = vector.shape_cast %57 : vector<1x256x32xbf16> to vector<256x32xbf16>
    %cst_41 = arith.constant dense<0.000000e+00> : vector<256x32xf32>
    %59 = tpu.matmul %58, %56, %cst_41 {dimension_numbers = #tpu.dot_dimension_numbers<[1], [0], [0], [1], [0, 0, 1, 1], [], []>} : vector<256x32xbf16>, vector<32x32xbf16>, vector<256x32xf32> -> vector<256x32xf32>
    %60 = arith.addf %45, %59 : vector<256x32xf32>
    %c0_42 = arith.constant 0 : index
    %c3 = arith.constant 3 : index
    %c0_43 = arith.constant 0 : index
    %c0_44 = arith.constant 0 : index
    %61 = vector.load %arg8[%c0_42, %c3, %c0_43, %c0_44] : memref<2x5x32x32xbf16, #tpu.memory_space<vmem>>, vector<1x1x32x32xbf16>
    %62 = vector.shape_cast %61 : vector<1x1x32x32xbf16> to vector<32x32xbf16>
    %63 = arith.extf %62 : vector<32x32xbf16> to vector<32x32xf32>
    %64 = vector.extract_strided_slice %14 {offsets = [3, 0], sizes = [1, 1], strides = [1, 1]} : vector<5x1xf32> to vector<1x1xf32>
    %c1_45 = arith.constant 1 : index
    %c3_46 = arith.constant 3 : index
    %c0_47 = arith.constant 0 : index
    %c0_48 = arith.constant 0 : index
    %65 = vector.load %arg8[%c1_45, %c3_46, %c0_47, %c0_48] : memref<2x5x32x32xbf16, #tpu.memory_space<vmem>>, vector<1x1x32x32xbf16>
    %66 = vector.shape_cast %65 : vector<1x1x32x32xbf16> to vector<32x32xbf16>
    %67 = arith.extf %66 : vector<32x32xbf16> to vector<32x32xf32>
    %68 = vector.broadcast %64 : vector<1x1xf32> to vector<32x32xf32>
    %69 = arith.mulf %68, %67 : vector<32x32xf32>
    %70 = arith.addf %63, %69 : vector<32x32xf32>
    %71 = arith.truncf %70 : vector<32x32xf32> to vector<32x32xbf16>
    %c0_49 = arith.constant 0 : index
    %c0_50 = arith.constant 0 : index
    %c0_51 = arith.constant 0 : index
    %72 = vector.load %arg5[%c0_49, %c0_50, %c0_51] : memref<1x256x32xbf16, #tpu.memory_space<vmem>>, vector<1x256x32xbf16>
    %73 = vector.shape_cast %72 : vector<1x256x32xbf16> to vector<256x32xbf16>
    %cst_52 = arith.constant dense<0.000000e+00> : vector<256x32xf32>
    %74 = tpu.matmul %73, %71, %cst_52 {dimension_numbers = #tpu.dot_dimension_numbers<[1], [0], [0], [1], [0, 0, 1, 1], [], []>} : vector<256x32xbf16>, vector<32x32xbf16>, vector<256x32xf32> -> vector<256x32xf32>
    %75 = arith.addf %60, %74 : vector<256x32xf32>
    %76 = vector.extract_strided_slice %1 {offsets = [4, 0], sizes = [1, 32], strides = [1, 1]} : vector<5x32xf32> to vector<1x32xf32>
    %77 = arith.truncf %76 : vector<1x32xf32> to vector<1x32xbf16>
    %c0_53 = arith.constant 0 : index
    %c4 = arith.constant 4 : index
    %c0_54 = arith.constant 0 : index
    %c0_55 = arith.constant 0 : index
    %78 = vector.load %arg8[%c0_53, %c4, %c0_54, %c0_55] : memref<2x5x32x32xbf16, #tpu.memory_space<vmem>>, vector<1x1x32x32xbf16>
    %79 = vector.shape_cast %78 : vector<1x1x32x32xbf16> to vector<32x32xbf16>
    %80 = arith.extf %79 : vector<32x32xbf16> to vector<32x32xf32>
    %81 = vector.extract_strided_slice %14 {offsets = [4, 0], sizes = [1, 1], strides = [1, 1]} : vector<5x1xf32> to vector<1x1xf32>
    %c1_56 = arith.constant 1 : index
    %c4_57 = arith.constant 4 : index
    %c0_58 = arith.constant 0 : index
    %c0_59 = arith.constant 0 : index
    %82 = vector.load %arg8[%c1_56, %c4_57, %c0_58, %c0_59] : memref<2x5x32x32xbf16, #tpu.memory_space<vmem>>, vector<1x1x32x32xbf16>
    %83 = vector.shape_cast %82 : vector<1x1x32x32xbf16> to vector<32x32xbf16>
    %84 = arith.extf %83 : vector<32x32xbf16> to vector<32x32xf32>
    %85 = vector.broadcast %81 : vector<1x1xf32> to vector<32x32xf32>
    %86 = arith.mulf %85, %84 : vector<32x32xf32>
    %87 = arith.addf %80, %86 : vector<32x32xf32>
    %88 = arith.truncf %87 : vector<32x32xf32> to vector<32x32xbf16>
    %cst_60 = arith.constant dense<0.000000e+00> : vector<1x32xf32>
    %89 = tpu.matmul %77, %88, %cst_60 {dimension_numbers = #tpu.dot_dimension_numbers<[1], [0], [0], [1], [0, 0, 1, 1], [], []>} : vector<1x32xbf16>, vector<32x32xbf16>, vector<1x32xf32> -> vector<1x32xf32>
    %90 = vector.broadcast %89 : vector<1x32xf32> to vector<256x32xf32>
    %91 = arith.addf %75, %90 : vector<256x32xf32>
    %c0_61 = arith.constant 0 : index
    %c0_62 = arith.constant 0 : index
    %92 = vector.load %arg9[%c0_61, %c0_62] : memref<1x32xf32, #tpu.memory_space<vmem>>, vector<1x32xf32>
    %93 = vector.broadcast %92 : vector<1x32xf32> to vector<256x32xf32>
    %94 = arith.mulf %91, %93 : vector<256x32xf32>
    %c0_63 = arith.constant 0 : index
    %c0_64 = arith.constant 0 : index
    %95 = vector.load %arg10[%c0_63, %c0_64] : memref<1x32xf32, #tpu.memory_space<vmem>>, vector<1x32xf32>
    %96 = vector.broadcast %95 : vector<1x32xf32> to vector<256x32xf32>
    %97 = arith.addf %94, %96 : vector<256x32xf32>
    %cst_65 = arith.constant 0.000000e+00 : f32
    %98 = vector.broadcast %cst_65 : f32 to vector<256x32xf32>
    %99 = arith.maximumf %97, %98 : vector<256x32xf32>
    %c0_66 = arith.constant 0 : index
    %c0_67 = arith.constant 0 : index
    %c0_68 = arith.constant 0 : index
    %100 = vector.load %arg11[%c0_66, %c0_67, %c0_68] : memref<1x256x32xf32, #tpu.memory_space<vmem>>, vector<1x256x32xf32>
    %101 = vector.shape_cast %100 : vector<1x256x32xf32> to vector<256x32xf32>
    %102 = vector.shape_cast %99 : vector<256x32xf32> to vector<1x256x32xf32>
    tpu.vector_store %arg11[%c0_66, %c0_67, %c0_68], %102 {strides = array<i32>} : memref<1x256x32xf32, #tpu.memory_space<vmem>>, vector<1x256x32xf32>,
    return
  }
  func.func @transform_0(%arg0: i32, %arg1: i32) -> (i32, i32, i32) {
    %c0_i32 = arith.constant 0 : i32
    %c0_i32_0 = arith.constant 0 : i32
    return %arg0, %arg1, %c0_i32 : i32, i32, i32
  }
  func.func @transform_1(%arg0: i32, %arg1: i32) -> (i32, i32, i32) {
    %c0_i32 = arith.constant 0 : i32
    %c0_i32_0 = arith.constant 0 : i32
    return %arg0, %arg1, %c0_i32 : i32, i32, i32
  }
  func.func @transform_2(%arg0: i32, %arg1: i32) -> (i32, i32, i32) {
    %c0_i32 = arith.constant 0 : i32
    %c0_i32_0 = arith.constant 0 : i32
    return %arg0, %arg1, %c0_i32 : i32, i32, i32
  }
  func.func @transform_3(%arg0: i32, %arg1: i32) -> (i32, i32, i32) {
    %c0_i32 = arith.constant 0 : i32
    %c0_i32_0 = arith.constant 0 : i32
    return %arg0, %arg1, %c0_i32 : i32, i32, i32
  }
  func.func @transform_4(%arg0: i32, %arg1: i32) -> (i32, i32, i32) {
    %c0_i32 = arith.constant 0 : i32
    %c0_i32_0 = arith.constant 0 : i32
    %c0_i32_1 = arith.constant 0 : i32
    return %arg0, %c0_i32, %c0_i32_0 : i32, i32, i32
  }
  func.func @transform_5(%arg0: i32, %arg1: i32) -> (i32, i32, i32) {
    %c0_i32 = arith.constant 0 : i32
    %c0_i32_0 = arith.constant 0 : i32
    %c0_i32_1 = arith.constant 0 : i32
    return %arg0, %c0_i32, %c0_i32_0 : i32, i32, i32
  }
  func.func @transform_6(%arg0: i32, %arg1: i32) -> (i32, i32, i32, i32) {
    %c0_i32 = arith.constant 0 : i32
    %c0_i32_0 = arith.constant 0 : i32
    %c0_i32_1 = arith.constant 0 : i32
    %c0_i32_2 = arith.constant 0 : i32
    %c0_i32_3 = arith.constant 0 : i32
    return %c0_i32, %c0_i32_0, %c0_i32_1, %c0_i32_2 : i32, i32, i32, i32
  }
  func.func @transform_7(%arg0: i32, %arg1: i32) -> (i32, i32) {
    %c0_i32 = arith.constant 0 : i32
    %c0_i32_0 = arith.constant 0 : i32
    %c0_i32_1 = arith.constant 0 : i32
    return %c0_i32, %c0_i32_0 : i32, i32
  }
  func.func @transform_8(%arg0: i32, %arg1: i32) -> (i32, i32) {
    %c0_i32 = arith.constant 0 : i32
    %c0_i32_0 = arith.constant 0 : i32
    %c0_i32_1 = arith.constant 0 : i32
    return %c0_i32, %c0_i32_0 : i32, i32
  }
  func.func @transform_9(%arg0: i32, %arg1: i32) -> (i32, i32, i32) {
    %c0_i32 = arith.constant 0 : i32
    %c0_i32_0 = arith.constant 0 : i32
    return %arg0, %arg1, %c0_i32 : i32, i32, i32
  }
}

</mosaic_0001>

<bundles_post_ra>
// kernel: aspp_forward.21
= control target key start
LH: loop header
LB: loop body
LE: loop exit
PB: predicated region body
PF: predicated region fallthrough
CT: control target
= control target key end

     0   :  { %s501_s6 = smov 0   ;;  %s503_s7 = smov 0   ;;  %s594_s0 = inlined_call_operand.vmem [shape: bf16[2,256,32], index: 0, kind: input, shape index: {}]   ;;  %s595_s1 = inlined_call_operand.vmem [shape: f32[2,1,32], index: 1, kind: output, shape index: {}]  }
   0x1   :  { %s505_s8 = smov 0  }
   0x2 LB: > { %s23_s9 = sadd.s32 1, %s484_s7  ;;  %p356_p0 = scmp.ge.s32.totalorder %s488_s8, 1  ;;  %s488_s8 = sphi %s505_s8, %s11_s8   ;;  %s484_s7 = sphi %s503_s7, %s597_s7   ;;  %s480_s6 = sphi %s501_s6, %s596_s6  }
   0x3   : > { %p25_p1 = scmp.ge.s32.totalorder %s23_s9, 2  ;;  %p106_p2 = scmp.lt.s32.totalorder %s488_s8, 3 }
   0x5   : > { %s599_s9 = smov (%p25_p1, %s23_s9), 0  ;;  %p107_p3 = pnand %p356_p0, %p106_p2 }
   0x6   : > { %p129_p4 = scmp.lt.s32.totalorder (!%p107_p3), %s480_s6, 1 }
   0x7   : > { %110 = sbr.rel (%p107_p3) target bundleno = 106 (0x6a), region = 24 }
   0xc   : > { %s601_s6 = smov (!%p129_p4, %s480_s6), 1  ;;  %vm145_vm0 = vcmask 253952   ;;  %v490_v0 = vmov 0.0   ;;  %vm212_vm1 = vcmask 261120  }
   0xd   : > { %s361_s10 = sshll.u32 %s601_s6, 7  ;;  %s522_s13 = scalar_lea.vmem %s595_s1, %s601_s6 }
   0xe   : > { %s527_s16 = scalar_lea.vmem %s594_s0, %s361_s10  ;;  %146 = vst.msk [vmem:[%s522_s13] sm:$0x1] %vm145_vm0, %v490_v0 }
   0xf   : > { %v363_v1 = vld [vmem:[%s527_s16] sm:$0xff]   ;;  %v426_v2 = vld [vmem:[%s527_s16 + $0x8] sm:$0xff]   ;;  %v427_v6 = vld [vmem:[%s527_s16 + $0x10] sm:$0xff]  }
  0x10   : > { %v364_v3 = vunpack.c.l.bf16 %v363_v1  ;;  %v365_v4 = vunpack.c.h.bf16 %v363_v1  ;;  %v368_v5 = vunpack.c.l.bf16 %v426_v2  ;;  %v369_v7 = vunpack.c.h.bf16 %v426_v2  ;;  %v428_v12 = vld [vmem:[%s527_s16 + $0x18] sm:$0xff]   ;;  %v429_v19 = vld [vmem:[%s527_s16 + $0x20] sm:$0xff]   ;;  %v430_v26 = vld [vmem:[%s527_s16 + $0x28] sm:$0xff]  }
  0x11   : > { %v372_v8 = vunpack.c.l.bf16 %v427_v6  ;;  %v373_v14 = vunpack.c.h.bf16 %v427_v6  ;;  %v376_v17 = vunpack.c.l.bf16 %v428_v12  ;;  %v377_v21 = vunpack.c.h.bf16 %v428_v12  ;;  %v431_v33 = vld [vmem:[%s527_s16 + $0x30] sm:$0xff]   ;;  %v432_v40 = vld [vmem:[%s527_s16 + $0x38] sm:$0xff]   ;;  %v433_v47 = vld [vmem:[%s527_s16 + $0x40] sm:$0xff]  }
  0x12   : > { %v213_v9 = vsel %vm212_vm1, %v364_v3, 0.0  ;;  %v214_v10 = vsel %vm212_vm1, %v365_v4, 0.0  ;;  %v216_v11 = vsel %vm212_vm1, %v368_v5, 0.0  ;;  %v218_v15 = vsel %vm212_vm1, %v369_v7, 0.0  ;;  %v434_v54 = vld [vmem:[%s527_s16 + $0x48] sm:$0xff]   ;;  %v435_v61 = vld [vmem:[%s527_s16 + $0x50] sm:$0xff]  }
  0x13   : > { %v215_v13 = vadd.f32 %v214_v10, %v213_v9  ;;  %v220_v18 = vsel %vm212_vm1, %v372_v8, 0.0  ;;  %v222_v22 = vsel %vm212_vm1, %v373_v14, 0.0  ;;  %v380_v24 = vunpack.c.l.bf16 %v429_v19  ;;  %v436_v4 = vld [vmem:[%s527_s16 + $0x58] sm:$0xff]  }
  0x14   : > { %v224_v25 = vsel %vm212_vm1, %v376_v17, 0.0  ;;  %v381_v28 = vunpack.c.h.bf16 %v429_v19  ;;  %v226_v29 = vsel %vm212_vm1, %v377_v21, 0.0  ;;  %v384_v31 = vunpack.c.l.bf16 %v430_v26 }
  0x15   : > { %v217_v16 = vadd.f32 %v216_v11, %v215_v13  ;;  %v228_v32 = vsel %vm212_vm1, %v380_v24, 0.0  ;;  %v385_v35 = vunpack.c.h.bf16 %v430_v26  ;;  %v388_v38 = vunpack.c.l.bf16 %v431_v33  ;;  %v437_v11 = vld [vmem:[%s527_s16 + $0x60] sm:$0xff]  }
  0x16   : > { %v230_v36 = vsel %vm212_vm1, %v381_v28, 0.0  ;;  %v232_v39 = vsel %vm212_vm1, %v384_v31, 0.0  ;;  %v389_v42 = vunpack.c.h.bf16 %v431_v33  ;;  %v392_v45 = vunpack.c.l.bf16 %v432_v40 }
  0x17   : > { %v219_v20 = vadd.f32 %v218_v15, %v217_v16  ;;  %v234_v43 = vsel %vm212_vm1, %v385_v35, 0.0  ;;  %v236_v46 = vsel %vm212_vm1, %v388_v38, 0.0  ;;  %v393_v49 = vunpack.c.h.bf16 %v432_v40 }
  0x18   : > { %v238_v50 = vsel %vm212_vm1, %v389_v42, 0.0  ;;  %v396_v52 = vunpack.c.l.bf16 %v433_v47  ;;  %v240_v53 = vsel %vm212_vm1, %v392_v45, 0.0  ;;  %v397_v56 = vunpack.c.h.bf16 %v433_v47 }
  0x19   : > { %v221_v23 = vadd.f32 %v220_v18, %v219_v20  ;;  %v242_v57 = vsel %vm212_vm1, %v393_v49, 0.0  ;;  %v400_v59 = vunpack.c.l.bf16 %v434_v54  ;;  %v401_v63 = vunpack.c.h.bf16 %v434_v54  ;;  %v438_v18 = vld [vmem:[%s527_s16 + $0x68] sm:$0xff]  }
  0x1a   : > { %v244_v60 = vsel %vm212_vm1, %v396_v52, 0.0  ;;  %v246_v0 = vsel %vm212_vm1, %v397_v56, 0.0  ;;  %v404_v2 = vunpack.c.l.bf16 %v435_v61  ;;  %v405_v6 = vunpack.c.h.bf16 %v435_v61 }
  0x1b   : > { %v223_v27 = vadd.f32 %v222_v22, %v221_v23  ;;  %v248_v3 = vsel %vm212_vm1, %v400_v59, 0.0  ;;  %v250_v7 = vsel %vm212_vm1, %v401_v63, 0.0  ;;  %v408_v9 = vunpack.c.l.bf16 %v436_v4 }
  0x1c   : > { %v252_v10 = vsel %vm212_vm1, %v404_v2, 0.0  ;;  %v409_v13 = vunpack.c.h.bf16 %v436_v4  ;;  %v254_v14 = vsel %vm212_vm1, %v405_v6, 0.0  ;;  %v412_v16 = vunpack.c.l.bf16 %v437_v11 }
  0x1d   : > { %v225_v30 = vadd.f32 %v224_v25, %v223_v27  ;;  %v256_v17 = vsel %vm212_vm1, %v408_v9, 0.0  ;;  %v413_v20 = vunpack.c.h.bf16 %v437_v11  ;;  %v416_v23 = vunpack.c.l.bf16 %v438_v18  ;;  %v439_v25 = vld [vmem:[%s527_s16 + $0x70] sm:$0xff]  }
  0x1e   : > { %v258_v21 = vsel %vm212_vm1, %v409_v13, 0.0  ;;  %v260_v24 = vsel %vm212_vm1, %v412_v16, 0.0  ;;  %v417_v27 = vunpack.c.h.bf16 %v438_v18 }
  0x1f   : > { %v227_v34 = vadd.f32 %v226_v29, %v225_v30  ;;  %v262_v28 = vsel %vm212_vm1, %v413_v20, 0.0  ;;  %v420_v30 = vunpack.c.l.bf16 %v439_v25  ;;  %v264_v31 = vsel %vm212_vm1, %v416_v23, 0.0 }
  0x20   : > { %v266_v35 = vsel %vm212_vm1, %v417_v27, 0.0 }
  0x21   : > { %v229_v37 = vadd.f32 %v228_v32, %v227_v34  ;;  %v440_v32 = vld [vmem:[%s527_s16 + $0x78] sm:$0xff]   ;;  %v421_v34 = vunpack.c.h.bf16 %v439_v25  ;;  %v268_v38 = vsel %vm212_vm1, %v420_v30, 0.0 }
  0x22   : > { %v425_v40 = vunpack.c.h.bf16 %v440_v32 }
  0x23   : > { %v231_v41 = vadd.f32 %v230_v36, %v229_v37  ;;  %v424_v37 = vunpack.c.l.bf16 %v440_v32 }
  0x24   : > { %v274_v45 = vsel %vm212_vm1, %v425_v40, 0.0 }
  0x25   : > { %v233_v44 = vadd.f32 %v232_v39, %v231_v41  ;;  %v270_v41 = vsel %vm212_vm1, %v421_v34, 0.0 }
  0x27   : > { %v235_v48 = vadd.f32 %v234_v43, %v233_v44  ;;  %v272_v43 = vsel %vm212_vm1, %v424_v37, 0.0 }
  0x29   : > { %v237_v51 = vadd.f32 %v236_v46, %v235_v48 }
  0x2b   : > { %v239_v55 = vadd.f32 %v238_v50, %v237_v51 }
  0x2d   : > { %v241_v58 = vadd.f32 %v240_v53, %v239_v55  ;;  %v147_v53 = vld [vmem:[%s522_s13] sm:$0x1] }
  0x2f   : > { %v243_v62 = vadd.f32 %v242_v57, %v241_v58 }
  0x31   : > { %v245_v1 = vadd.f32 %v244_v60, %v243_v62 }
  0x33   : > { %v247_v5 = vadd.f32 %v246_v0, %v245_v1 }
  0x35   : > { %v249_v8 = vadd.f32 %v248_v3, %v247_v5 }
  0x37   : > { %v251_v12 = vadd.f32 %v250_v7, %v249_v8 }
  0x39   : > { %v253_v15 = vadd.f32 %v252_v10, %v251_v12 }
  0x3b   : > { %v255_v19 = vadd.f32 %v254_v14, %v253_v15 }
  0x3d   : > { %v257_v22 = vadd.f32 %v256_v17, %v255_v19 }
  0x3f   : > { %v259_v26 = vadd.f32 %v258_v21, %v257_v22 }
  0x41   : > { %v261_v29 = vadd.f32 %v260_v24, %v259_v26 }
  0x43   : > { %v263_v33 = vadd.f32 %v262_v28, %v261_v29 }
  0x45   : > { %v265_v36 = vadd.f32 %v264_v31, %v263_v33 }
  0x47   : > { %v267_v39 = vadd.f32 %v266_v35, %v265_v36 }
  0x49   : > { %v269_v42 = vadd.f32 %v268_v38, %v267_v39 }
  0x4b   : > { %v271_v44 = vadd.f32 %v270_v41, %v269_v42 }
  0x4d   : > { %v273_v46 = vadd.f32 %v272_v43, %v271_v44 }
  0x4f   : > { %v275_v47 = vadd.f32 %v274_v45, %v273_v46 }
  0x51   : > { %v276_v48 = vrot.slane %v275_v47, 4 }
  0x53   : > { %v277_v49 = vadd.f32 %v276_v48, %v275_v47 }
  0x55   : > { %v278_v50 = vrot.slane %v277_v49, 2 }
  0x57   : > { %v279_v51 = vadd.f32 %v278_v50, %v277_v49 }
  0x59   : > { %v280_v52 = vrot.slane %v279_v51, 1 }
  0x5b   : > { %v281_v54 = vadd.f32 %v280_v52, %v279_v51 }
  0x5d   : > { %v282_v55 = vadd.f32 %v281_v54, %v147_v53 }
  0x5f   : > { %284 = vst.msk [vmem:[%s522_s13] sm:$0x1] %vm145_vm0, %v282_v55 }
  0x66   : > { %v288_v56 = vld [vmem:[%s522_s13] sm:$0x1] }
  0x67   : > { %v289_v57 = vmul.f32 0.00390625, %v288_v56 }
  0x69   : > { %290 = vst.msk [vmem:[%s522_s13] sm:$0x1] %vm145_vm0, %v289_v57 }
  0x6a PF: > { %s11_s8 = sadd.s32 1, %s488_s8   ;;  %s596_s6 = smov %s484_s7 }
  0x6b   : > { %p8_p5 = scmp.ge.s32.totalorder %s11_s8, 4   ;;  %s597_s7 = smov %s599_s9 }
  0x6d   :  { %10 = sbr.rel (!%p8_p5) target bundleno = 2 (0x2), region = 62 }

// kernel: aspp_forward.17
= control target key start
LH: loop header
LB: loop body
LE: loop exit
PB: predicated region body
PF: predicated region fallthrough
CT: control target
= control target key end

     0   :  { %s1548_s21 = smov 0   ;;  %s1550_s22 = smov 0   ;;  %s1754_s0 = inlined_call_operand.vmem [shape: bf16[2,52,52,32], index: 0, kind: input, shape index: {}, may-alias: {0,1,2}]   ;;  %s1755_s1 = inlined_call_operand.vmem [shape: bf16[2,52,52,32], index: 1, kind: input, shape index: {}, may-alias: {0,1,2}]   ;;  %s1756_s2 = inlined_call_operand.vmem [shape: bf16[2,52,52,32], index: 2, kind: input, shape index: {}, may-alias: {0,1,2}]   ;;  %s1757_s3 = inlined_call_operand.vmem [shape: bf16[3,3,32,32], index: 3, kind: input, shape index: {}]   ;;  %s1758_s4 = inlined_call_operand.vmem [shape: f32[1,32], index: 4, kind: input, shape index: {}]   ;;  %s1759_s5 = inlined_call_operand.vmem [shape: f32[1,32], index: 5, kind: input, shape index: {}]   ;;  %s1760_s6 = inlined_call_operand.vmem [shape: bf16[2,16,16,32], index: 6, kind: output, shape index: {}]  }
   0x1   :  { %s1552_s23 = smov 0   ;;  %s1554_s24 = smov 0  }
   0x2   :  { %s1556_s25 = smov 0  }
   0x3 LB: > { %s25_s26 = sadd.s32 1, %s1501_s23  ;;  %s28_s27 = sadd.s32 1, %s1505_s24  ;;  %s1509_s25 = sphi %s1556_s25, %s16_s25   ;;  %s1505_s24 = sphi %s1554_s24, %s1765_s24   ;;  %s1501_s23 = sphi %s1552_s23, %s1764_s23   ;;  %s1497_s22 = sphi %s1550_s22, %s1763_s22   ;;  %s1493_s21 = sphi %s1548_s21, %s1762_s21  }
   0x4   : > { %p26_p0 = scmp.ge.s32.totalorder %s25_s26, 16  ;;  %p1204_p1 = scmp.ge.s32.totalorder %s1509_s25, 1 }
   0x5   : > { %p272_p2 = scmp.lt.s32.totalorder %s1509_s25, 33 }
   0x6   : > { %s1767_s26 = smov (%p26_p0, %s25_s26), 0  ;;  %s1769_s27 = smov (!%p26_p0, %s28_s27), %s1505_s24 }
   0x7   : > { %p273_p3 = pnand %p1204_p1, %p272_p2  ;;  %p30_p4 = scmp.ge.s32.totalorder %s1769_s27, 2 }
   0x8   : > { %p330_p5 = scmp.lt.s32.totalorder (!%p273_p3), %s1497_s22, 1  ;;  %p332_p6 = scmp.lt.s32.totalorder (!%p273_p3), %s1493_s21, 51 }
   0x9   : > { %s1771_s27 = smov (%p30_p4, %s1769_s27), 0  ;;  %276 = sbr.rel (%p273_p3) target bundleno = 268 (0x10c), region = 44 }
   0xa   : > { %s339_s15 = sadd.s32 (!%p273_p3), 18, %s1493_s21  ;;  %s350_s30 = sadd.s32 (!%p273_p3), 36, %s1493_s21 }
   0xb   : > { %p342_p7 = scmp.lt.s32.totalorder (!%p273_p3), %s339_s15, 51  ;;  %p1628_p8 = scmp.lt.s32.totalorder (!%p273_p3), %s350_s30, 51 }
   0xc   : > { %p363_p9 = scmp.lt.s32.totalorder (!%p273_p3), %s1493_s21, 15 }
   0xe   : > { %v1438_v0 = vld [vmem:[%s1757_s3 + $0x18] sm:$0xff]   ;;  %v1511_v1 = vmov 0.0   ;;  %v1439_v2 = vld [vmem:[%s1757_s3 + $0x8] sm:$0xff]   ;;  %v1440_v3 = vld [vmem:[%s1757_s3 + $0x10] sm:$0xff]   ;;  %vm1512_vm0 = vmmov 0   ;;  %s1773_s22 = smov (!%p330_p5, %s1497_s22), 1 }
   0xf   : > { %1320 = vmatprep.subr.bf16.mxu0 %v1511_v1  ;;  %1328 = vmatprep.subr.bf16.mxu1 %v1511_v1  ;;  %v1441_v4 = vld [vmem:[%s1757_s3] sm:$0xff]   ;;  %s333_s12 = scalar_select %p332_p6, %s1493_s21, 51  ;;  %vm411_vm1 = vcmask 261120   ;;  %v1447_v5 = vld [vmem:[%s1757_s3 + $0x38] sm:$0xff]   ;;  %v1446_v10 = vld [vmem:[%s1757_s3 + $0x28] sm:$0xff]   ;;  %vm395_vm2 = vcmask 1046528  }
  0x10   : > { %1321 = vmatpush3.bf16.msra.mxu0 %v1438_v0  ;;  %1324 = vmatprep.mubr.msk.bf16.mxu0 %vm1512_vm0, %v1511_v1  ;;  %s1609_s13 = smul.u32 364, %s1773_s22  ;;  %s1775_s15 = smov (!%p342_p7, %s339_s15), 51  ;;  %v1448_v17 = vld [vmem:[%s1757_s3 + $0x20] sm:$0xff]   ;;  %v1449_v18 = vld [vmem:[%s1757_s3 + $0x30] sm:$0xff]   ;;  %vm528_vm3 = vcmask 1045504   ;;  %v1453_v21 = vld [vmem:[%s1757_s3 + $0x58] sm:$0xff]  }
  0x11   : > { %1329 = vmatpush3.bf16.msra.mxu1 %v1439_v2  ;;  %1322 = vmatprep.subr.bf16.mxu0 %v1511_v1  ;;  %s1392_s14 = smul.u32 7, %s333_s12  ;;  %s1777_s30 = smov (!%p1628_p8, %s350_s30), 51  ;;  %v1452_v24 = vld [vmem:[%s1757_s3 + $0x48] sm:$0xff]   ;;  %v1455_v31 = vld [vmem:[%s1757_s3 + $0x50] sm:$0xff]   ;;  %v1454_v34 = vld [vmem:[%s1757_s3 + $0x40] sm:$0xff]   ;;  %vm1060_vm4 = vcmask 257024  }
  0x12   : > { %1330 = vmatprep.subr.bf16.mxu1 %v1511_v1  ;;  %1332 = vmatprep.mubr.msk.bf16.mxu1 %vm1512_vm0, %v1511_v1  ;;  %s1394_s9 = smul.u32 7, %s1775_s15  ;;  %v1461_v39 = vld [vmem:[%s1757_s3 + $0x78] sm:$0xff]   ;;  %v1460_v43 = vld [vmem:[%s1757_s3 + $0x68] sm:$0xff]   ;;  %v1463_v44 = vld [vmem:[%s1757_s3 + $0x70] sm:$0xff]   ;;  %s1779_s21 = smov (!%p363_p9, %s1493_s21), 15 }
  0x13   : > { %s336_s16 = sadd.s32 %s1609_s13, %s1392_s14  ;;  %v1462_v47 = vld [vmem:[%s1757_s3 + $0x60] sm:$0xff]   ;;  %v1467_v51 = vld [vmem:[%s1757_s3 + $0x88] sm:$0xff]   ;;  %s1208_s14 = sshll.u32 %s1779_s21, 1 }
  0x14   : > { %1323 = vmatpush3.bf16.msra.mxu0 %v1440_v3  ;;  %s1205_s17 = sshll.u32 %s336_s16, 2  ;;  %s346_s15 = sadd.s32 %s1394_s9, %s1609_s13  ;;  %v1468_v54 = vld [vmem:[%s1757_s3 + $0x80] sm:$0xff]  }
  0x15   : > { %1331 = vmatpush3.bf16.msra.mxu1 %v1441_v4  ;;  %1336 = vmatprep.subr.bf16.mxu0 %v1511_v1  ;;  %s338_s20 = scalar_lea.vmem %s1754_s0, %s1205_s17  ;;  %s1206_s17 = sshll.u32 %s346_s15, 2 }
  0x16   : > { %1344 = vmatprep.subr.bf16.mxu1 %v1511_v1  ;;  %v375_v6 = vld [vmem:[%s338_s20 + $0x10] sm:$0xf]  ;;  %v376_v7 = vld [vmem:[%s338_s20 + $0x14] sm:$0xf]  ;;  %v1442_v8 = vld [vmem:[%s338_s20 + $0x8] sm:$0xff]   ;;  %s1395_s9 = smul.u32 7, %s1777_s30 }
  0x17   : > { %v1216_v9 = vcombine.low %v375_v6, %v375_v6  ;;  %v1445_v11 = vld [vmem:[%s338_s20] sm:$0xff]   ;;  %v396_v12 = vrot.slane %v1442_v8, 1  ;;  %v1228_v14 = vcombine.low %v375_v6, %v376_v7  ;;  %v1450_v15 = vld [vmem:[%s338_s20 + $0x18] ss:$0 sps:$4 sm:$0x33]   ;;  %s348_s20 = scalar_lea.vmem %s1755_s1, %s1206_s17  ;;  %s1209_s16 = sshll.u32 %s1773_s22, 5 }
  0x18   : > { %1333 = vmatmul.mubr.msk.bf16.vlgmr.msra.gmra.mxu1 %vm411_vm1, %v1445_v11  ;;  %v530_v20 = vrot.slane %v1450_v15, 2  ;;  %v1451_v22 = vld [vmem:[%s348_s20] sm:$0xff]   ;;  %v594_v23 = vld [vmem:[%s348_s20 + $0x10] sm:$0xf]  ;;  %v595_v25 = vld [vmem:[%s348_s20 + $0x14] sm:$0xf]  ;;  %s357_s10 = sadd.s32 %s1395_s9, %s1609_s13 }
  0x19   : > { %v397_v13 = vrot.slane %v1216_v9, 1  ;;  %1345 = vmatpush3.bf16.msra.mxu1 %v1447_v5  ;;  %1348 = vmatprep.mubr.msk.bf16.mxu1 %vm1512_vm0, %v1511_v1  ;;  %v529_v19 = vrot.slane %v1228_v14, 2  ;;  %v1456_v27 = vld [vmem:[%s348_s20 + $0x8] sm:$0xff]   ;;  %v1246_v28 = vcombine.low %v594_v23, %v594_v23  ;;  %v1254_v29 = vcombine.low %v594_v23, %v595_v25  ;;  %v1459_v30 = vld [vmem:[%s348_s20 + $0x18] ss:$0 sps:$4 sm:$0x33]  }
  0x1a   : > { %1346 = vmatprep.subr.bf16.mxu1 %v1511_v1  ;;  %v751_v33 = vrot.slane %v1459_v30, 2  ;;  %s1207_s30 = sshll.u32 %s357_s10, 2  ;;  %v678_v35 = vrot.slane %v1456_v27, 1 }
  0x1b   : > { %v398_v16 = vsel %vm395_vm2, %v396_v12, %v397_v13  ;;  %v531_v26 = vsel %vm528_vm3, %v529_v19, %v530_v20  ;;  %v750_v32 = vrot.slane %v1254_v29, 2  ;;  %s1678_s17 = scalar_lea.vmem %s1756_s2, %s1207_s30  ;;  %v679_v36 = vrot.slane %v1246_v28, 1 }
  0x1c   : > { %1325 = vmatmul.mubr.msk.bf16.vlgmr.msra.gmra.mxu0 %vm411_vm1, %v398_v16  ;;  %v815_v37 = vld [vmem:[%s1678_s17 + $0x10] sm:$0xf]  ;;  %v1465_v40 = vld [vmem:[%s1678_s17 + $0x8] sm:$0xff]   ;;  %v816_v48 = vld [vmem:[%s1678_s17 + $0x14] sm:$0xf] }
  0x1d   : > { %1337 = vmatpush3.bf16.msra.mxu0 %v1446_v10  ;;  %1340 = vmatprep.mubr.msk.bf16.mxu0 %vm1512_vm0, %v1511_v1  ;;  %v752_v38 = vsel %vm528_vm3, %v750_v32, %v751_v33  ;;  %v1272_v41 = vcombine.low %v815_v37, %v815_v37  ;;  %v680_v42 = vsel %vm395_vm2, %v678_v35, %v679_v36  ;;  %v899_v45 = vrot.slane %v1465_v40, 1  ;;  %v1464_v50 = vld [vmem:[%s1678_s17] sm:$0xff]   ;;  %v1470_v53 = vld [vmem:[%s1678_s17 + $0x18] ss:$0 sps:$4 sm:$0x33]   ;;  %s367_s17 = sadd.s32 %s1209_s16, %s1208_s14 }
  0x1e   : > { %1338 = vmatprep.subr.bf16.mxu0 %v1511_v1  ;;  %1347 = vmatpush3.bf16.msra.mxu1 %v1449_v18  ;;  %v1280_v52 = vcombine.low %v815_v37, %v816_v48  ;;  %v972_v56 = vrot.slane %v1470_v53, 2  ;;  %v1285_v40 = vld [vmem:[%s1758_s4] ss:$0 sm:$0xff]  ;;  %s1210_s20 = sshll.u32 %s367_s17, 2 }
  0x1f   : > { %1360 = vmatprep.subr.bf16.mxu1 %v1511_v1  ;;  %v900_v46 = vrot.slane %v1272_v41, 1  ;;  %s369_s28 = scalar_lea.vmem %s1760_s6, %s1210_s20 }
  0x20   : > { %v971_v55 = vrot.slane %v1280_v52, 2 }
  0x21   : > { %1339 = vmatpush3.bf16.msra.mxu0 %v1448_v17  ;;  %1349 = vmatmul.mubr.msk.bf16.vlgmr.msra.gmra.mxu1 %vm411_vm1, %v1451_v22  ;;  %v901_v49 = vsel %vm395_vm2, %v899_v45, %v900_v46 }
  0x22   : > { %1352 = vmatprep.subr.bf16.mxu0 %v1511_v1  ;;  %1361 = vmatpush3.bf16.msra.mxu1 %v1453_v21  ;;  %v973_v57 = vsel %vm528_vm3, %v971_v55, %v972_v56 }
  0x23   : > { %1364 = vmatprep.mubr.msk.bf16.mxu1 %vm1512_vm0, %v1511_v1  ;;  %1362 = vmatprep.subr.bf16.mxu1 %v1511_v1 }
  0x24   : > { %1341 = vmatmul.mubr.msk.bf16.vlgmr.msra.gmra.mxu0 %vm411_vm1, %v531_v26 }
  0x25   : > { %1353 = vmatpush3.bf16.msra.mxu0 %v1452_v24  ;;  %1356 = vmatprep.mubr.msk.bf16.mxu0 %vm1512_vm0, %v1511_v1 }
  0x26   : > { %1354 = vmatprep.subr.bf16.mxu0 %v1511_v1  ;;  %1363 = vmatpush3.bf16.msra.mxu1 %v1455_v31 }
  0x27   : > { %1376 = vmatprep.subr.bf16.mxu1 %v1511_v1 }
  0x29   : > { %1355 = vmatpush3.bf16.msra.mxu0 %v1454_v34  ;;  %1365 = vmatmul.mubr.msk.bf16.vlgmr.msra.gmra.mxu1 %vm411_vm1, %v752_v38 }
  0x2a   : > { %1368 = vmatprep.subr.bf16.mxu0 %v1511_v1  ;;  %1377 = vmatpush3.bf16.msra.mxu1 %v1461_v39 }
  0x2b   : > { %1380 = vmatprep.mubr.msk.bf16.mxu1 %vm1512_vm0, %v1511_v1  ;;  %1378 = vmatprep.subr.bf16.mxu1 %v1511_v1 }
  0x2c   : > { %1357 = vmatmul.mubr.msk.bf16.vlgmr.msra.gmra.mxu0 %vm411_vm1, %v680_v42  ;;  %v1286_v42 = vld [vmem:[%s1759_s5] ss:$0 sm:$0xff] }
  0x2d   : > { %1369 = vmatpush3.bf16.msra.mxu0 %v1460_v43  ;;  %1372 = vmatprep.mubr.msk.bf16.mxu0 %vm1512_vm0, %v1511_v1 }
  0x2e   : > { %1370 = vmatprep.subr.bf16.mxu0 %v1511_v1  ;;  %1379 = vmatpush3.bf16.msra.mxu1 %v1463_v44 }
  0x31   : > { %1371 = vmatpush3.bf16.msra.mxu0 %v1462_v47  ;;  %1381 = vmatmul.mubr.msk.bf16.vlgmr.msra.gmra.mxu1 %vm411_vm1, %v901_v49 }
  0x32   : > { %1384 = vmatprep.subr.bf16.mxu0 %v1511_v1 }
  0x34   : > { %1373 = vmatmul.mubr.msk.bf16.vlgmr.msra.gmra.mxu0 %vm411_vm1, %v1464_v50 }
  0x35   : > { %1385 = vmatpush3.bf16.msra.mxu0 %v1467_v51  ;;  %1388 = vmatprep.mubr.msk.bf16.mxu0 %vm1512_vm0, %v1511_v1 }
  0x36   : > { %1386 = vmatprep.subr.bf16.mxu0 %v1511_v1 }
  0x39   : > { %1387 = vmatpush3.bf16.msra.mxu0 %v1468_v54 }
  0x3c   : > { %1389 = vmatmul.mubr.msk.bf16.vlgmr.msra.gmra.mxu0 %vm411_vm1, %v973_v57 }
  0xd8   : > { %v510_v58 = vpop.f32.mrf.mxu1 }
  0xda   : > { %v1334_v60 = vpop.f32.mrf.mxu1 }
  0xdc   : > { %v449_v59 = vpop.f32.mrf.mxu0  ;;  %v513_v62 = vpop.f32.mrf.mxu1 }
  0xdd   : > { %v511_v9 = vadd.f32 %v510_v58, %v449_v59 }
  0xde   : > { %v1326_v61 = vpop.f32.mrf.mxu0  ;;  %v1335_v0 = vpop.f32.mrf.mxu1 }
  0xe0   : > { %v452_v63 = vpop.f32.mrf.mxu0 }
  0xe1   : > { %v656_v3 = vpop.f32.mrf.mxu1  ;;  %v514_v15 = vadd.f32 %v513_v62, %v452_v63 }
  0xe2   : > { %v1327_v2 = vpop.f32.mrf.mxu0 }
  0xe3   : > { %v1350_v5 = vpop.f32.mrf.mxu1 }
  0xe4   : > { %v581_v4 = vpop.f32.mrf.mxu0 }
  0xe5   : > { %v659_v7 = vpop.f32.mrf.mxu1  ;;  %v588_v12 = vadd.f32 %v581_v4, %v511_v9 }
  0xe6   : > { %v1342_v6 = vpop.f32.mrf.mxu0 }
  0xe7   : > { %v1351_v1 = vpop.f32.mrf.mxu1  ;;  %v663_v18 = vadd.f32 %v656_v3, %v588_v12 }
  0xe8   : > { %v584_v8 = vpop.f32.mrf.mxu0 }
  0xe9   : > { %v802_v11 = vpop.f32.mrf.mxu1  ;;  %v589_v19 = vadd.f32 %v584_v8, %v514_v15 }
  0xea   : > { %v1343_v10 = vpop.f32.mrf.mxu0 }
  0xeb   : > { %v1366_v14 = vpop.f32.mrf.mxu1  ;;  %v664_v25 = vadd.f32 %v659_v7, %v589_v19 }
  0xec   : > { %v730_v13 = vpop.f32.mrf.mxu0 }
  0xed   : > { %v805_v17 = vpop.f32.mrf.mxu1  ;;  %v737_v22 = vadd.f32 %v730_v13, %v663_v18 }
  0xee   : > { %v1358_v16 = vpop.f32.mrf.mxu0 }
  0xef   : > { %v1367_v21 = vpop.f32.mrf.mxu1  ;;  %v809_v28 = vadd.f32 %v802_v11, %v737_v22 }
  0xf0   : > { %v733_v20 = vpop.f32.mrf.mxu0 }
  0xf1   : > { %v951_v24 = vpop.f32.mrf.mxu1  ;;  %v738_v29 = vadd.f32 %v733_v20, %v664_v25 }
  0xf2   : > { %v1359_v23 = vpop.f32.mrf.mxu0 }
  0xf3   : > { %v1382_v27 = vpop.f32.mrf.mxu1  ;;  %v810_v35 = vadd.f32 %v805_v17, %v738_v29 }
  0xf4   : > { %v877_v26 = vpop.f32.mrf.mxu0 }
  0xf5   : > { %v954_v31 = vpop.f32.mrf.mxu1  ;;  %v884_v32 = vadd.f32 %v877_v26, %v809_v28 }
  0xf6   : > { %v1374_v30 = vpop.f32.mrf.mxu0 }
  0xf7   : > { %v1383_v34 = vpop.f32.mrf.mxu1  ;;  %v958_v37 = vadd.f32 %v951_v24, %v884_v32 }
  0xf8   : > { %v880_v33 = vpop.f32.mrf.mxu0 }
  0xf9   : > { %v885_v38 = vadd.f32 %v880_v33, %v810_v35 }
  0xfa   : > { %v1375_v36 = vpop.f32.mrf.mxu0 }
  0xfb   : > { %v959_v44 = vadd.f32 %v954_v31, %v885_v38 }
  0xfc   : > { %v1023_v39 = vpop.f32.mrf.mxu0 }
  0xfd   : > { %v1030_v41 = vadd.f32 %v1023_v39, %v958_v37 }
  0xfe   : > { %v1390_v43 = vpop.f32.mrf.mxu0 }
  0xff   : > { %v1039_v45 = vmul.f32 %v1285_v40, %v1030_v41 }
 0x100   : > { %v1026_v46 = vpop.f32.mrf.mxu0 }
 0x101   : > { %v1048_v47 = vadd.f32 %v1286_v42, %v1039_v45  ;;  %v1031_v48 = vadd.f32 %v1026_v46, %v959_v44 }
 0x102   : > { %v1391_v49 = vpop.f32.mrf.mxu0 }
 0x103   : > { %v1050_v50 = vmax.f32 %v1048_v47, 0.0  ;;  %v1040_v51 = vmul.f32 %v1285_v40, %v1031_v48 }
 0x105   : > { %v1291_v52 = vpack.c.bf16 %v1050_v50, %v1050_v50  ;;  %v1049_v53 = vadd.f32 %v1286_v42, %v1040_v51 }
 0x107   : > { %1061 = vst.msk [vmem:[%s369_s28] sm:$0xf] %vm1060_vm4, %v1291_v52  ;;  %v1051_v54 = vmax.f32 %v1049_v53, 0.0 }
 0x109   : > { %v1292_v55 = vpack.c.bf16 %v1051_v54, %v1051_v54 }
 0x10b   : > { %1062 = vst.msk [vmem:[%s369_s28 + $0x4] sm:$0xf] %vm1060_vm4, %v1292_v55 }
 0x10c PF: > { %s16_s25 = sadd.s32 1, %s1509_s25   ;;  %s1762_s21 = smov %s1501_s23 }
 0x10d   : > { %p13_p10 = scmp.ge.s32.totalorder %s16_s25, 34   ;;  %s1763_s22 = smov %s1505_s24 }
 0x10e   : > { %s1764_s23 = smov %s1767_s26  ;;  %s1765_s24 = smov %s1771_s27 }
 0x10f   :  { %15 = sbr.rel (!%p13_p10) target bundleno = 3 (0x3), region = 88 }

// kernel: aspp_forward.16
= control target key start
LH: loop header
LB: loop body
LE: loop exit
PB: predicated region body
PF: predicated region fallthrough
CT: control target
= control target key end

     0   :  { %s1564_s21 = smov 0   ;;  %s1566_s22 = smov 0   ;;  %s1778_s0 = inlined_call_operand.vmem [shape: bf16[2,52,52,32], index: 0, kind: input, shape index: {}, may-alias: {0,1,2}]   ;;  %s1779_s1 = inlined_call_operand.vmem [shape: bf16[2,52,52,32], index: 1, kind: input, shape index: {}, may-alias: {0,1,2}]   ;;  %s1780_s2 = inlined_call_operand.vmem [shape: bf16[2,52,52,32], index: 2, kind: input, shape index: {}, may-alias: {0,1,2}]   ;;  %s1781_s3 = inlined_call_operand.vmem [shape: bf16[3,3,32,32], index: 3, kind: input, shape index: {}]   ;;  %s1782_s4 = inlined_call_operand.vmem [shape: f32[1,32], index: 4, kind: input, shape index: {}]   ;;  %s1783_s5 = inlined_call_operand.vmem [shape: f32[1,32], index: 5, kind: input, shape index: {}]   ;;  %s1784_s6 = inlined_call_operand.vmem [shape: bf16[2,16,16,32], index: 6, kind: output, shape index: {}]  }
   0x1   :  { %s1568_s23 = smov 0   ;;  %s1570_s24 = smov 0  }
   0x2   :  { %s1572_s25 = smov 0  }
   0x3 LB: > { %s25_s26 = sadd.s32 1, %s1517_s23  ;;  %s28_s27 = sadd.s32 1, %s1521_s24  ;;  %s1525_s25 = sphi %s1572_s25, %s16_s25   ;;  %s1521_s24 = sphi %s1570_s24, %s1790_s24   ;;  %s1517_s23 = sphi %s1568_s23, %s1789_s23   ;;  %s1513_s22 = sphi %s1566_s22, %s1788_s22   ;;  %s1509_s21 = sphi %s1564_s21, %s1787_s21  }
   0x4   : > { %p26_p0 = scmp.ge.s32.totalorder %s25_s26, 16  ;;  %p1214_p1 = scmp.ge.s32.totalorder %s1525_s25, 1 }
   0x5   : > { %p276_p2 = scmp.lt.s32.totalorder %s1525_s25, 33 }
   0x6   : > { %s1792_s26 = smov (%p26_p0, %s25_s26), 0  ;;  %s1794_s27 = smov (!%p26_p0, %s28_s27), %s1521_s24 }
   0x7   : > { %p277_p3 = pnand %p1214_p1, %p276_p2  ;;  %p30_p4 = scmp.ge.s32.totalorder %s1794_s27, 2 }
   0x8   : > { %s335_s10 = sadd.s32 (!%p277_p3), 6, %s1509_s21  ;;  %p336_p5 = scmp.lt.s32.totalorder (!%p277_p3), %s1513_s22, 1 }
   0x9   : > { %s1796_s27 = smov (%p30_p4, %s1794_s27), 0  ;;  %280 = sbr.rel (%p277_p3) target bundleno = 267 (0x10b), region = 44 }
   0xa   : > { %p338_p6 = scmp.lt.s32.totalorder (!%p277_p3), %s335_s10, 51  ;;  %s346_s15 = sadd.s32 (!%p277_p3), 18, %s1509_s21 }
   0xb   : > { %p1629_p7 = scmp.lt.s32.totalorder (!%p277_p3), %s346_s15, 51  ;;  %s357_s29 = sadd.s32 (!%p277_p3), 30, %s1509_s21 }
   0xc   : > { %p1654_p8 = scmp.lt.s32.totalorder (!%p277_p3), %s357_s29, 51  ;;  %p370_p9 = scmp.lt.s32.totalorder (!%p277_p3), %s1509_s21, 15 }
   0xe   : > { %v1451_v0 = vld [vmem:[%s1781_s3 + $0x18] sm:$0xff]   ;;  %v1527_v1 = vmov 0.0   ;;  %v1452_v2 = vld [vmem:[%s1781_s3 + $0x8] sm:$0xff]   ;;  %v1453_v3 = vld [vmem:[%s1781_s3 + $0x10] sm:$0xff]   ;;  %vm1528_vm0 = vmmov 0   ;;  %s1798_s22 = smov (!%p336_p5, %s1513_s22), 1 }
   0xf   : > { %1333 = vmatprep.subr.bf16.mxu0 %v1527_v1  ;;  %1341 = vmatprep.subr.bf16.mxu1 %v1527_v1  ;;  %v1454_v4 = vld [vmem:[%s1781_s3] sm:$0xff]   ;;  %s1800_s10 = smov (!%p338_p6, %s335_s10), 51  ;;  %s1625_s13 = smul.u32 364, %s1798_s22  ;;  %vm401_vm1 = vcmask 1046528   ;;  %vm417_vm2 = vcmask 261120   ;;  %vm468_vm3 = vcmask 1044480  }
  0x10   : > { %1334 = vmatpush3.bf16.msra.mxu0 %v1451_v0  ;;  %1337 = vmatprep.mubr.msk.bf16.mxu0 %vm1528_vm0, %v1527_v1  ;;  %s1405_s14 = smul.u32 7, %s1800_s10  ;;  %v1460_v12 = vld [vmem:[%s1781_s3 + $0x28] sm:$0xff]   ;;  %s1802_s15 = smov (!%p1629_p7, %s346_s15), 51  ;;  %v1461_v19 = vld [vmem:[%s1781_s3 + $0x38] sm:$0xff]   ;;  %v1462_v22 = vld [vmem:[%s1781_s3 + $0x20] sm:$0xff]   ;;  %vm1070_vm4 = vcmask 257024  }
  0x11   : > { %1342 = vmatpush3.bf16.msra.mxu1 %v1452_v2  ;;  %1335 = vmatprep.subr.bf16.mxu0 %v1527_v1  ;;  %s1407_s10 = smul.u32 7, %s1802_s15  ;;  %v1463_v23 = vld [vmem:[%s1781_s3 + $0x30] sm:$0xff]   ;;  %s1804_s29 = smov (!%p1654_p8, %s357_s29), 51  ;;  %v1467_v31 = vld [vmem:[%s1781_s3 + $0x48] sm:$0xff]   ;;  %v1468_v39 = vld [vmem:[%s1781_s3 + $0x58] sm:$0xff]  }
  0x12   : > { %1343 = vmatprep.subr.bf16.mxu1 %v1527_v1  ;;  %1345 = vmatprep.mubr.msk.bf16.mxu1 %vm1528_vm0, %v1527_v1  ;;  %s342_s17 = sadd.s32 %s1625_s13, %s1405_s14  ;;  %v1469_v45 = vld [vmem:[%s1781_s3 + $0x40] sm:$0xff]   ;;  %v1470_v46 = vld [vmem:[%s1781_s3 + $0x50] sm:$0xff]   ;;  %v1475_v52 = vld [vmem:[%s1781_s3 + $0x68] sm:$0xff]   ;;  %s1806_s21 = smov (!%p370_p9, %s1509_s21), 15 }
  0x13   : > { %s1215_s18 = sshll.u32 %s342_s17, 2  ;;  %s353_s14 = sadd.s32 %s1407_s10, %s1625_s13  ;;  %v1476_v53 = vld [vmem:[%s1781_s3 + $0x78] sm:$0xff]   ;;  %v1477_v58 = vld [vmem:[%s1781_s3 + $0x60] sm:$0xff]   ;;  %v1478_v59 = vld [vmem:[%s1781_s3 + $0x70] sm:$0xff]  }
  0x14   : > { %1336 = vmatpush3.bf16.msra.mxu0 %v1453_v3  ;;  %s344_s28 = scalar_lea.vmem %s1778_s0, %s1215_s18  ;;  %s1216_s18 = sshll.u32 %s353_s14, 2  ;;  %v1483_v3 = vld [vmem:[%s1781_s3 + $0x88] sm:$0xff]  }
  0x15   : > { %1344 = vmatpush3.bf16.msra.mxu1 %v1454_v4  ;;  %1349 = vmatprep.subr.bf16.mxu0 %v1527_v1  ;;  %v380_v5 = vld [vmem:[%s344_s28 + $0x8] sm:$0xf]  ;;  %v381_v6 = vld [vmem:[%s344_s28 + $0xc] sm:$0xf]  ;;  %v382_v7 = vld [vmem:[%s344_s28 + $0x10] sm:$0xf] }
  0x16   : > { %1357 = vmatprep.subr.bf16.mxu1 %v1527_v1  ;;  %v1225_v8 = vcombine.low %v380_v5, %v381_v6  ;;  %v1226_v9 = vcombine.low %v382_v7, %v382_v7  ;;  %v1458_v10 = vld [vmem:[%s344_s28] sm:$0xff]   ;;  %v1231_v11 = vcombine.low %v380_v5, %v380_v5  ;;  %v1239_v13 = vcombine.low %v381_v6, %v382_v7  ;;  %v1464_v14 = vld [vmem:[%s344_s28 + $0x14] ss:$0 sps:$4 sm:$0xff]   ;;  %s355_s28 = scalar_lea.vmem %s1779_s1, %s1216_s18  ;;  %s1408_s10 = smul.u32 7, %s1804_s29 }
  0x17   : > { %v469_v17 = vrot.slane %v1458_v10, 3  ;;  %v538_v25 = vrot.slane %v1464_v14, 3  ;;  %v600_v26 = vld [vmem:[%s355_s28 + $0x8] sm:$0xf]  ;;  %v1465_v27 = vld [vmem:[%s355_s28] sm:$0xff]   ;;  %s1218_s16 = sshll.u32 %s1806_s21, 1 }
  0x18   : > { %v402_v15 = vrot.slane %v1225_v8, 1  ;;  %v403_v16 = vrot.slane %v1226_v9, 1  ;;  %v470_v18 = vrot.slane %v1231_v11, 3  ;;  %v537_v24 = vrot.slane %v1239_v13, 3  ;;  %v601_v29 = vld [vmem:[%s355_s28 + $0xc] sm:$0xf]  ;;  %s364_s11 = sadd.s32 %s1408_s10, %s1625_s13 }
  0x19   : > { %v1249_v28 = vcombine.low %v600_v26, %v600_v26  ;;  %v602_v30 = vld [vmem:[%s355_s28 + $0x10] sm:$0xf]  ;;  %v1257_v32 = vcombine.low %v600_v26, %v601_v29  ;;  %v1474_v35 = vld [vmem:[%s355_s28 + $0x14] ss:$0 sps:$4 sm:$0xff]   ;;  %v617_v37 = vrot.slane %v1465_v27, 3  ;;  %s1217_s12 = sshll.u32 %s364_s11, 2 }
  0x1a   : > { %v404_v20 = vsel %vm401_vm1, %v402_v15, %v403_v16  ;;  %v471_v21 = vsel %vm468_vm3, %v469_v17, %v470_v18  ;;  %v1258_v33 = vcombine.low %v602_v30, %v602_v30  ;;  %v1266_v34 = vcombine.low %v601_v29, %v602_v30  ;;  %s1698_s18 = scalar_lea.vmem %s1780_s2, %s1217_s12  ;;  %v1484_v6 = vld [vmem:[%s1781_s3 + $0x80] sm:$0xff]   ;;  %s1219_s17 = sshll.u32 %s1798_s22, 5 }
  0x1b   : > { %1338 = vmatmul.mubr.msk.bf16.vlgmr.msra.gmra.mxu0 %vm417_vm2, %v404_v20  ;;  %1346 = vmatmul.mubr.msk.bf16.vlgmr.msra.gmra.mxu1 %vm417_vm2, %v471_v21  ;;  %v539_v36 = vsel %vm468_vm3, %v537_v24, %v538_v25  ;;  %v618_v38 = vrot.slane %v1249_v28, 3  ;;  %v689_v41 = vrot.slane %v1257_v32, 1  ;;  %v760_v44 = vrot.slane %v1474_v35, 3  ;;  %v822_v47 = vld [vmem:[%s1698_s18 + $0x8] sm:$0xf]  ;;  %v1479_v54 = vld [vmem:[%s1698_s18] sm:$0xff]  }
  0x1c   : > { %1350 = vmatpush3.bf16.msra.mxu0 %v1460_v12  ;;  %1358 = vmatpush3.bf16.msra.mxu1 %v1461_v19  ;;  %v690_v42 = vrot.slane %v1258_v33, 1  ;;  %v759_v43 = vrot.slane %v1266_v34, 3  ;;  %v823_v48 = vld [vmem:[%s1698_s18 + $0xc] sm:$0xf]  ;;  %v824_v49 = vld [vmem:[%s1698_s18 + $0x10] sm:$0xf]  ;;  %v1276_v55 = vcombine.low %v822_v47, %v822_v47 }
  0x1d   : > { %1351 = vmatprep.subr.bf16.mxu0 %v1527_v1  ;;  %1359 = vmatprep.subr.bf16.mxu1 %v1527_v1  ;;  %v619_v40 = vsel %vm468_vm3, %v617_v37, %v618_v38  ;;  %v1284_v56 = vcombine.low %v822_v47, %v823_v48  ;;  %v1285_v57 = vcombine.low %v824_v49, %v824_v49  ;;  %v839_v60 = vrot.slane %v1479_v54, 3  ;;  %v1486_v5 = vld [vmem:[%s1698_s18 + $0x14] ss:$0 sps:$4 sm:$0xff]   ;;  %s374_s18 = sadd.s32 %s1219_s17, %s1218_s16 }
  0x1e   : > { %1353 = vmatprep.mubr.msk.bf16.mxu0 %vm1528_vm0, %v1527_v1  ;;  %1361 = vmatprep.mubr.msk.bf16.mxu1 %vm1528_vm0, %v1527_v1  ;;  %v691_v50 = vsel %vm401_vm1, %v689_v41, %v690_v42  ;;  %v761_v51 = vsel %vm468_vm3, %v759_v43, %v760_v44  ;;  %v840_v61 = vrot.slane %v1276_v55, 3  ;;  %v1293_v4 = vcombine.low %v823_v48, %v824_v49  ;;  %v1298_v55 = vld [vmem:[%s1782_s4] ss:$0 sm:$0xff]  ;;  %s1220_s28 = sshll.u32 %s374_s18, 2 }
  0x1f   : > { %v911_v62 = vrot.slane %v1284_v56, 1  ;;  %v912_v63 = vrot.slane %v1285_v57, 1  ;;  %v982_v8 = vrot.slane %v1486_v5, 3  ;;  %v1299_v57 = vld [vmem:[%s1783_s5] ss:$0 sm:$0xff]  ;;  %s376_s30 = scalar_lea.vmem %s1784_s6, %s1220_s28 }
  0x20   : > { %1352 = vmatpush3.bf16.msra.mxu0 %v1462_v22  ;;  %1360 = vmatpush3.bf16.msra.mxu1 %v1463_v23  ;;  %v841_v0 = vsel %vm468_vm3, %v839_v60, %v840_v61  ;;  %v981_v7 = vrot.slane %v1293_v4, 3 }
  0x21   : > { %1365 = vmatprep.subr.bf16.mxu0 %v1527_v1  ;;  %1373 = vmatprep.subr.bf16.mxu1 %v1527_v1  ;;  %v913_v2 = vsel %vm401_vm1, %v911_v62, %v912_v63 }
  0x22   : > { %v983_v9 = vsel %vm468_vm3, %v981_v7, %v982_v8 }
  0x23   : > { %1354 = vmatmul.mubr.msk.bf16.vlgmr.msra.gmra.mxu0 %vm417_vm2, %v539_v36  ;;  %1362 = vmatmul.mubr.msk.bf16.vlgmr.msra.gmra.mxu1 %vm417_vm2, %v619_v40 }
  0x24   : > { %1366 = vmatpush3.bf16.msra.mxu0 %v1467_v31  ;;  %1374 = vmatpush3.bf16.msra.mxu1 %v1468_v39 }
  0x25   : > { %1367 = vmatprep.subr.bf16.mxu0 %v1527_v1  ;;  %1375 = vmatprep.subr.bf16.mxu1 %v1527_v1 }
  0x26   : > { %1369 = vmatprep.mubr.msk.bf16.mxu0 %vm1528_vm0, %v1527_v1  ;;  %1377 = vmatprep.mubr.msk.bf16.mxu1 %vm1528_vm0, %v1527_v1 }
  0x28   : > { %1368 = vmatpush3.bf16.msra.mxu0 %v1469_v45  ;;  %1376 = vmatpush3.bf16.msra.mxu1 %v1470_v46 }
  0x29   : > { %1381 = vmatprep.subr.bf16.mxu0 %v1527_v1  ;;  %1389 = vmatprep.subr.bf16.mxu1 %v1527_v1 }
  0x2b   : > { %1370 = vmatmul.mubr.msk.bf16.vlgmr.msra.gmra.mxu0 %vm417_vm2, %v691_v50  ;;  %1378 = vmatmul.mubr.msk.bf16.vlgmr.msra.gmra.mxu1 %vm417_vm2, %v761_v51 }
  0x2c   : > { %1382 = vmatpush3.bf16.msra.mxu0 %v1475_v52  ;;  %1390 = vmatpush3.bf16.msra.mxu1 %v1476_v53 }
  0x2d   : > { %1383 = vmatprep.subr.bf16.mxu0 %v1527_v1  ;;  %1391 = vmatprep.subr.bf16.mxu1 %v1527_v1 }
  0x2e   : > { %1385 = vmatprep.mubr.msk.bf16.mxu0 %vm1528_vm0, %v1527_v1  ;;  %1393 = vmatprep.mubr.msk.bf16.mxu1 %vm1528_vm0, %v1527_v1 }
  0x30   : > { %1384 = vmatpush3.bf16.msra.mxu0 %v1477_v58  ;;  %1392 = vmatpush3.bf16.msra.mxu1 %v1478_v59 }
  0x31   : > { %1397 = vmatprep.subr.bf16.mxu0 %v1527_v1 }
  0x33   : > { %1386 = vmatmul.mubr.msk.bf16.vlgmr.msra.gmra.mxu0 %vm417_vm2, %v841_v0  ;;  %1394 = vmatmul.mubr.msk.bf16.vlgmr.msra.gmra.mxu1 %vm417_vm2, %v913_v2 }
  0x34   : > { %1398 = vmatpush3.bf16.msra.mxu0 %v1483_v3  ;;  %1401 = vmatprep.mubr.msk.bf16.mxu0 %vm1528_vm0, %v1527_v1 }
  0x35   : > { %1399 = vmatprep.subr.bf16.mxu0 %v1527_v1 }
  0x38   : > { %1400 = vmatpush3.bf16.msra.mxu0 %v1484_v6 }
  0x3b   : > { %1402 = vmatmul.mubr.msk.bf16.vlgmr.msra.gmra.mxu0 %vm417_vm2, %v983_v9 }
  0xdb   : > { %v455_v10 = vpop.f32.mrf.mxu0  ;;  %v521_v11 = vpop.f32.mrf.mxu1 }
  0xdc   : > { %v522_v1 = vadd.f32 %v521_v11, %v455_v10 }
  0xdd   : > { %v1339_v12 = vpop.f32.mrf.mxu0  ;;  %v1347_v13 = vpop.f32.mrf.mxu1 }
  0xdf   : > { %v458_v14 = vpop.f32.mrf.mxu0  ;;  %v524_v15 = vpop.f32.mrf.mxu1 }
  0xe0   : > { %v525_v29 = vadd.f32 %v524_v15, %v458_v14 }
  0xe1   : > { %v1340_v16 = vpop.f32.mrf.mxu0  ;;  %v1348_v17 = vpop.f32.mrf.mxu1 }
  0xe3   : > { %v589_v18 = vpop.f32.mrf.mxu0  ;;  %v669_v19 = vpop.f32.mrf.mxu1 }
  0xe4   : > { %v596_v26 = vadd.f32 %v589_v18, %v522_v1 }
  0xe5   : > { %v1355_v20 = vpop.f32.mrf.mxu0  ;;  %v1363_v21 = vpop.f32.mrf.mxu1 }
  0xe6   : > { %v676_v32 = vadd.f32 %v669_v19, %v596_v26 }
  0xe7   : > { %v592_v22 = vpop.f32.mrf.mxu0  ;;  %v672_v23 = vpop.f32.mrf.mxu1 }
  0xe8   : > { %v597_v33 = vadd.f32 %v592_v22, %v525_v29 }
  0xe9   : > { %v1356_v24 = vpop.f32.mrf.mxu0  ;;  %v1364_v25 = vpop.f32.mrf.mxu1 }
  0xea   : > { %v677_v39 = vadd.f32 %v672_v23, %v597_v33 }
  0xeb   : > { %v741_v27 = vpop.f32.mrf.mxu0  ;;  %v811_v28 = vpop.f32.mrf.mxu1 }
  0xec   : > { %v748_v36 = vadd.f32 %v741_v27, %v676_v32 }
  0xed   : > { %v1371_v30 = vpop.f32.mrf.mxu0  ;;  %v1379_v31 = vpop.f32.mrf.mxu1 }
  0xee   : > { %v818_v42 = vadd.f32 %v811_v28, %v748_v36 }
  0xef   : > { %v744_v34 = vpop.f32.mrf.mxu0  ;;  %v814_v35 = vpop.f32.mrf.mxu1 }
  0xf0   : > { %v749_v43 = vadd.f32 %v744_v34, %v677_v39 }
  0xf1   : > { %v1372_v37 = vpop.f32.mrf.mxu0  ;;  %v1380_v38 = vpop.f32.mrf.mxu1 }
  0xf2   : > { %v819_v49 = vadd.f32 %v814_v35, %v749_v43 }
  0xf3   : > { %v891_v40 = vpop.f32.mrf.mxu0  ;;  %v963_v41 = vpop.f32.mrf.mxu1 }
  0xf4   : > { %v898_v46 = vadd.f32 %v891_v40, %v818_v42 }
  0xf5   : > { %v1387_v44 = vpop.f32.mrf.mxu0  ;;  %v1395_v45 = vpop.f32.mrf.mxu1 }
  0xf6   : > { %v970_v52 = vadd.f32 %v963_v41, %v898_v46 }
  0xf7   : > { %v894_v47 = vpop.f32.mrf.mxu0  ;;  %v966_v48 = vpop.f32.mrf.mxu1 }
  0xf8   : > { %v899_v53 = vadd.f32 %v894_v47, %v819_v49 }
  0xf9   : > { %v1388_v50 = vpop.f32.mrf.mxu0  ;;  %v1396_v51 = vpop.f32.mrf.mxu1 }
  0xfa   : > { %v971_v59 = vadd.f32 %v966_v48, %v899_v53 }
  0xfb   : > { %v1033_v54 = vpop.f32.mrf.mxu0 }
  0xfc   : > { %v1040_v56 = vadd.f32 %v1033_v54, %v970_v52 }
  0xfd   : > { %v1403_v58 = vpop.f32.mrf.mxu0 }
  0xfe   : > { %v1049_v60 = vmul.f32 %v1298_v55, %v1040_v56 }
  0xff   : > { %v1036_v61 = vpop.f32.mrf.mxu0 }
 0x100   : > { %v1058_v62 = vadd.f32 %v1299_v57, %v1049_v60  ;;  %v1041_v63 = vadd.f32 %v1036_v61, %v971_v59 }
 0x101   : > { %v1404_v0 = vpop.f32.mrf.mxu0 }
 0x102   : > { %v1060_v2 = vmax.f32 %v1058_v62, 0.0  ;;  %v1050_v3 = vmul.f32 %v1298_v55, %v1041_v63 }
 0x104   : > { %v1304_v4 = vpack.c.bf16 %v1060_v2, %v1060_v2  ;;  %v1059_v5 = vadd.f32 %v1299_v57, %v1050_v3 }
 0x106   : > { %1071 = vst.msk [vmem:[%s376_s30] sm:$0xf] %vm1070_vm4, %v1304_v4  ;;  %v1061_v6 = vmax.f32 %v1059_v5, 0.0 }
 0x108   : > { %v1305_v7 = vpack.c.bf16 %v1061_v6, %v1061_v6 }
 0x10a   : > { %1072 = vst.msk [vmem:[%s376_s30 + $0x4] sm:$0xf] %vm1070_vm4, %v1305_v7 }
 0x10b PF: > { %s16_s25 = sadd.s32 1, %s1525_s25   ;;  %s1787_s21 = smov %s1517_s23 }
 0x10c   : > { %p13_p10 = scmp.ge.s32.totalorder %s16_s25, 34   ;;  %s1788_s22 = smov %s1521_s24 }
 0x10d   : > { %s1789_s23 = smov %s1792_s26  ;;  %s1790_s24 = smov %s1796_s27 }
 0x10e   :  { %15 = sbr.rel (!%p13_p10) target bundleno = 3 (0x3), region = 88 }

// kernel: aspp_forward.23
= control target key start
LH: loop header
LB: loop body
LE: loop exit
PB: predicated region body
PF: predicated region fallthrough
CT: control target
= control target key end

     0   :  { %vm22_vm0 = vcmask 254976   ;;  %v135_v0 = vmov 0.0   ;;  %vm136_vm1 = vmmov 0   ;;  %vm42_vm2 = vcmask 261120   ;;  %s183_s1 = inlined_call_operand.vmem [shape: bf16[32,32], index: 1, kind: input, shape index: {}]   ;;  %s184_s0 = inlined_call_operand.vmem [shape: bf16[1,2,32], index: 0, kind: input, shape index: {}]   ;;  %s185_s2 = inlined_call_operand.vmem [shape: f32[1,32], index: 2, kind: input, shape index: {}]   ;;  %s186_s3 = inlined_call_operand.vmem [shape: f32[1,32], index: 3, kind: input, shape index: {}]   ;;  %s187_s4 = inlined_call_operand.vmem [shape: f32[1,2,32], index: 4, kind: output, shape index: {}]  }
   0x1   :  { %23 = vst.msk [vmem:[#allocation2] sm:$0x3] %vm22_vm0, %v135_v0  ;;  %123 = vmatprep.subr.bf16.mxu0 %v135_v0  ;;  %v133_v1 = vld [vmem:[%s183_s1 + $0x8] sm:$0xff]   ;;  %127 = vmatprep.mubr.msk.bf16.mxu0 %vm136_vm1, %v135_v0  ;;  %v134_v2 = vld [vmem:[%s183_s1] sm:$0xff]  }
   0x2   :  { %124 = vmatpush3.bf16.msra.mxu0 %v133_v1  ;;  %v25_v3 = vld [vmem:[%s184_s0] sm:$0x1] }
   0x3   :  { %125 = vmatprep.subr.bf16.mxu0 %v135_v0  ;;  %v118_v10 = vld [vmem:[%s185_s2] ss:$0 sm:$0xff] }
   0x4   :  { %v119_v12 = vld [vmem:[%s186_s3] ss:$0 sm:$0xff] }
   0x6   :  { %126 = vmatpush3.bf16.msra.mxu0 %v134_v2 }
   0x8   :  { %v24_v4 = vld [vmem:[#allocation2] sm:$0x3] }
   0x9   :  { %128 = vmatmul.mubr.msk.bf16.vlgmr.msra.gmra.mxu0 %vm42_vm2, %v25_v3 }
  0xc9   :  { %v80_v5 = vpop.f32.mrf.mxu0 }
  0xca   :  { %v86_v6 = vadd.f32 %v80_v5, %v24_v4 }
  0xcb   :  { %v129_v7 = vpop.f32.mrf.mxu0 }
  0xcc   :  { %88 = vst.msk [vmem:[#allocation2] sm:$0x3] %vm22_vm0, %v86_v6 }
  0xcd   :  { %v83_v8 = vpop.f32.mrf.mxu0 }
  0xcf   :  { %v130_v9 = vpop.f32.mrf.mxu0 }
  0xd3   :  { %v92_v11 = vld [vmem:[#allocation2] sm:$0x3] }
  0xd4   :  { %v100_v13 = vmul.f32 %v118_v10, %v92_v11 }
  0xd6   :  { %v108_v14 = vadd.f32 %v119_v12, %v100_v13 }
  0xd8   :  { %v109_v15 = vmax.f32 %v108_v14, 0.0 }
  0xda   :  { %110 = vst.msk [vmem:[%s187_s4] sm:$0x3] %vm22_vm0, %v109_v15 }

// kernel: aspp_forward.15
= control target key start
LH: loop header
LB: loop body
LE: loop exit
PB: predicated region body
PF: predicated region fallthrough
CT: control target
= control target key end

     0   :  { %s1528_s21 = smov 0   ;;  %s1530_s22 = smov 0   ;;  %s1728_s0 = inlined_call_operand.vmem [shape: bf16[2,52,52,32], index: 0, kind: input, shape index: {}, may-alias: {0,1,2}]   ;;  %s1729_s1 = inlined_call_operand.vmem [shape: bf16[2,52,52,32], index: 1, kind: input, shape index: {}, may-alias: {0,1,2}]   ;;  %s1730_s2 = inlined_call_operand.vmem [shape: bf16[2,52,52,32], index: 2, kind: input, shape index: {}, may-alias: {0,1,2}]   ;;  %s1731_s3 = inlined_call_operand.vmem [shape: bf16[3,3,32,32], index: 3, kind: input, shape index: {}]   ;;  %s1732_s4 = inlined_call_operand.vmem [shape: f32[1,32], index: 4, kind: input, shape index: {}]   ;;  %s1733_s5 = inlined_call_operand.vmem [shape: f32[1,32], index: 5, kind: input, shape index: {}]   ;;  %s1734_s6 = inlined_call_operand.vmem [shape: bf16[2,16,16,32], index: 6, kind: output, shape index: {}]  }
   0x1   :  { %s1532_s23 = smov 0   ;;  %s1534_s24 = smov 0  }
   0x2   :  { %s1536_s25 = smov 0  }
   0x3 LB: > { %s25_s26 = sadd.s32 1, %s1481_s23  ;;  %s28_s27 = sadd.s32 1, %s1485_s24  ;;  %s1489_s25 = sphi %s1536_s25, %s16_s25   ;;  %s1485_s24 = sphi %s1534_s24, %s1740_s24   ;;  %s1481_s23 = sphi %s1532_s23, %s1739_s23   ;;  %s1477_s22 = sphi %s1530_s22, %s1738_s22   ;;  %s1473_s21 = sphi %s1528_s21, %s1737_s21  }
   0x4   : > { %p26_p0 = scmp.ge.s32.totalorder %s25_s26, 16  ;;  %p1184_p1 = scmp.ge.s32.totalorder %s1489_s25, 1 }
   0x5   : > { %p276_p2 = scmp.lt.s32.totalorder %s1489_s25, 33 }
   0x6   : > { %s1742_s26 = smov (%p26_p0, %s25_s26), 0  ;;  %s1744_s27 = smov (!%p26_p0, %s28_s27), %s1485_s24 }
   0x7   : > { %p277_p3 = pnand %p1184_p1, %p276_p2  ;;  %p30_p4 = scmp.ge.s32.totalorder %s1744_s27, 2 }
   0x8   : > { %s335_s10 = sadd.s32 (!%p277_p3), 12, %s1473_s21  ;;  %p336_p5 = scmp.lt.s32.totalorder (!%p277_p3), %s1477_s22, 1 }
   0x9   : > { %s1746_s27 = smov (%p30_p4, %s1744_s27), 0  ;;  %280 = sbr.rel (%p277_p3) target bundleno = 267 (0x10b), region = 44 }
   0xa   : > { %p338_p6 = scmp.lt.s32.totalorder (!%p277_p3), %s335_s10, 51  ;;  %s346_s15 = sadd.s32 (!%p277_p3), 18, %s1473_s21 }
   0xb   : > { %p1593_p7 = scmp.lt.s32.totalorder (!%p277_p3), %s346_s15, 51  ;;  %s357_s7 = sadd.s32 (!%p277_p3), 24, %s1473_s21 }
   0xc   : > { %p1612_p8 = scmp.lt.s32.totalorder (!%p277_p3), %s357_s7, 51  ;;  %p370_p9 = scmp.lt.s32.totalorder (!%p277_p3), %s1473_s21, 15 }
   0xe   : > { %v1418_v0 = vld [vmem:[%s1731_s3 + $0x18] sm:$0xff]   ;;  %v1491_v1 = vmov 0.0   ;;  %v1419_v2 = vld [vmem:[%s1731_s3 + $0x8] sm:$0xff]   ;;  %v1420_v3 = vld [vmem:[%s1731_s3 + $0x10] sm:$0xff]   ;;  %vm1492_vm0 = vmmov 0   ;;  %s1748_s22 = smov (!%p336_p5, %s1477_s22), 1 }
   0xf   : > { %1300 = vmatprep.subr.bf16.mxu0 %v1491_v1  ;;  %1308 = vmatprep.subr.bf16.mxu1 %v1491_v1  ;;  %v1421_v4 = vld [vmem:[%s1731_s3] sm:$0xff]   ;;  %s1750_s10 = smov (!%p338_p6, %s335_s10), 51  ;;  %s1589_s13 = smul.u32 364, %s1748_s22  ;;  %vm399_vm1 = vcmask 1046528   ;;  %vm415_vm2 = vcmask 261120   ;;  %vm464_vm3 = vcmask 1045504  }
  0x10   : > { %1301 = vmatpush3.bf16.msra.mxu0 %v1418_v0  ;;  %1304 = vmatprep.mubr.msk.bf16.mxu0 %vm1492_vm0, %v1491_v1  ;;  %s1372_s14 = smul.u32 7, %s1750_s10  ;;  %s1752_s15 = smov (!%p1593_p7, %s346_s15), 51  ;;  %v1427_v13 = vld [vmem:[%s1731_s3 + $0x28] sm:$0xff]   ;;  %v1428_v18 = vld [vmem:[%s1731_s3 + $0x38] sm:$0xff]   ;;  %v1429_v21 = vld [vmem:[%s1731_s3 + $0x20] sm:$0xff]   ;;  %vm1040_vm4 = vcmask 257024  }
  0x11   : > { %1309 = vmatpush3.bf16.msra.mxu1 %v1419_v2  ;;  %1302 = vmatprep.subr.bf16.mxu0 %v1491_v1  ;;  %s1374_s8 = smul.u32 7, %s1752_s15  ;;  %v1430_v22 = vld [vmem:[%s1731_s3 + $0x30] sm:$0xff]   ;;  %s1754_s7 = smov (!%p1612_p8, %s357_s7), 51  ;;  %v1433_v32 = vld [vmem:[%s1731_s3 + $0x48] sm:$0xff]   ;;  %v1434_v35 = vld [vmem:[%s1731_s3 + $0x58] sm:$0xff]  }
  0x12   : > { %1310 = vmatprep.subr.bf16.mxu1 %v1491_v1  ;;  %1312 = vmatprep.mubr.msk.bf16.mxu1 %vm1492_vm0, %v1491_v1  ;;  %s342_s17 = sadd.s32 %s1589_s13, %s1372_s14  ;;  %v1435_v37 = vld [vmem:[%s1731_s3 + $0x40] sm:$0xff]   ;;  %v1436_v38 = vld [vmem:[%s1731_s3 + $0x50] sm:$0xff]   ;;  %v1440_v47 = vld [vmem:[%s1731_s3 + $0x68] sm:$0xff]   ;;  %s1756_s21 = smov (!%p370_p9, %s1473_s21), 15 }
  0x13   : > { %s1185_s18 = sshll.u32 %s342_s17, 2  ;;  %s353_s11 = sadd.s32 %s1374_s8, %s1589_s13  ;;  %v1441_v50 = vld [vmem:[%s1731_s3 + $0x78] sm:$0xff]   ;;  %v1442_v53 = vld [vmem:[%s1731_s3 + $0x60] sm:$0xff]   ;;  %v1443_v56 = vld [vmem:[%s1731_s3 + $0x70] sm:$0xff]  }
  0x14   : > { %1303 = vmatpush3.bf16.msra.mxu0 %v1420_v3  ;;  %s344_s28 = scalar_lea.vmem %s1728_s0, %s1185_s18  ;;  %s1186_s14 = sshll.u32 %s353_s11, 2  ;;  %v1448_v60 = vld [vmem:[%s1731_s3 + $0x88] sm:$0xff]   ;;  %v1449_v62 = vld [vmem:[%s1731_s3 + $0x80] sm:$0xff]  }
  0x15   : > { %1311 = vmatpush3.bf16.msra.mxu1 %v1421_v4  ;;  %1316 = vmatprep.subr.bf16.mxu0 %v1491_v1  ;;  %v379_v5 = vld [vmem:[%s344_s28 + $0x8] sm:$0xf]  ;;  %v380_v6 = vld [vmem:[%s344_s28 + $0xc] sm:$0xf]  ;;  %v381_v7 = vld [vmem:[%s344_s28 + $0x10] sm:$0xf] }
  0x16   : > { %1324 = vmatprep.subr.bf16.mxu1 %v1491_v1  ;;  %v1195_v8 = vcombine.low %v379_v5, %v380_v6  ;;  %v1196_v9 = vcombine.low %v381_v7, %v381_v7  ;;  %v378_v10 = vld [vmem:[%s344_s28 + $0x4] sm:$0xf]  ;;  %v1201_v11 = vcombine.low %v380_v6, %v380_v6  ;;  %s355_s28 = scalar_lea.vmem %s1729_s1, %s1186_s14  ;;  %v1209_v29 = vcombine.low %v380_v6, %v381_v7  ;;  %s1375_s8 = smul.u32 7, %s1754_s7 }
  0x17   : > { %v1200_v12 = vcombine.low %v378_v10, %v379_v5  ;;  %v588_v23 = vld [vmem:[%s355_s28 + $0x4] sm:$0xf]  ;;  %v589_v24 = vld [vmem:[%s355_s28 + $0x8] sm:$0xf]  ;;  %v590_v25 = vld [vmem:[%s355_s28 + $0xc] sm:$0xf] }
  0x18   : > { %v400_v14 = vrot.slane %v1195_v8, 1  ;;  %v401_v15 = vrot.slane %v1196_v9, 1  ;;  %v466_v16 = vrot.slane %v1201_v11, 2  ;;  %v1217_v26 = vcombine.low %v588_v23, %v589_v24  ;;  %v591_v28 = vld [vmem:[%s355_s28 + $0x10] sm:$0xf]  ;;  %s364_s11 = sadd.s32 %s1375_s8, %s1589_s13  ;;  %s1188_s15 = sshll.u32 %s1756_s21, 1 }
  0x19   : > { %v465_v17 = vrot.slane %v1200_v12, 2  ;;  %v1218_v27 = vcombine.low %v590_v25, %v590_v25  ;;  %v1226_v33 = vcombine.low %v589_v24, %v590_v25  ;;  %v1227_v34 = vcombine.low %v591_v28, %v591_v28  ;;  %s1187_s12 = sshll.u32 %s364_s11, 2  ;;  %s1189_s16 = sshll.u32 %s1748_s22, 5 }
  0x1a   : > { %v402_v19 = vsel %vm399_vm1, %v400_v14, %v401_v15  ;;  %v605_v30 = vrot.slane %v1217_v26, 2  ;;  %s366_s13 = scalar_lea.vmem %s1730_s2, %s1187_s12  ;;  %v1235_v46 = vcombine.low %v590_v25, %v591_v28 }
  0x1b   : > { %1305 = vmatmul.mubr.msk.bf16.vlgmr.msra.gmra.mxu0 %vm415_vm2, %v402_v19  ;;  %v467_v20 = vsel %vm464_vm3, %v465_v17, %v466_v16  ;;  %v606_v31 = vrot.slane %v1218_v27, 2  ;;  %v675_v39 = vrot.slane %v1226_v33, 1  ;;  %v676_v40 = vrot.slane %v1227_v34, 1  ;;  %v800_v41 = vld [vmem:[%s366_s13 + $0x4] sm:$0xf] }
  0x1c   : > { %1313 = vmatmul.mubr.msk.bf16.vlgmr.msra.gmra.mxu1 %vm415_vm2, %v467_v20  ;;  %1317 = vmatpush3.bf16.msra.mxu0 %v1427_v13  ;;  %v801_v42 = vld [vmem:[%s366_s13 + $0x8] sm:$0xf]  ;;  %v802_v43 = vld [vmem:[%s366_s13 + $0xc] sm:$0xf]  ;;  %v803_v44 = vld [vmem:[%s366_s13 + $0x10] sm:$0xf]  ;;  %s374_s13 = sadd.s32 %s1189_s16, %s1188_s15 }
  0x1d   : > { %1325 = vmatpush3.bf16.msra.mxu1 %v1428_v18  ;;  %1318 = vmatprep.subr.bf16.mxu0 %v1491_v1  ;;  %v607_v36 = vsel %vm464_vm3, %v605_v30, %v606_v31  ;;  %v677_v45 = vsel %vm399_vm1, %v675_v39, %v676_v40  ;;  %v1243_v48 = vcombine.low %v800_v41, %v801_v42  ;;  %s1190_s28 = sshll.u32 %s374_s13, 2 }
  0x1e   : > { %1326 = vmatprep.subr.bf16.mxu1 %v1491_v1  ;;  %1320 = vmatprep.mubr.msk.bf16.mxu0 %vm1492_vm0, %v1491_v1  ;;  %v1244_v49 = vcombine.low %v802_v43, %v802_v43  ;;  %v1252_v51 = vcombine.low %v801_v42, %v802_v43  ;;  %v1253_v52 = vcombine.low %v803_v44, %v803_v44  ;;  %s376_s29 = scalar_lea.vmem %s1734_s6, %s1190_s28 }
  0x1f   : > { %1328 = vmatprep.mubr.msk.bf16.mxu1 %vm1492_vm0, %v1491_v1  ;;  %v817_v54 = vrot.slane %v1243_v48, 2  ;;  %v1261_v63 = vcombine.low %v802_v43, %v803_v44  ;;  %v1266_v48 = vld [vmem:[%s1733_s5] ss:$0 sm:$0xff] }
  0x20   : > { %1319 = vmatpush3.bf16.msra.mxu0 %v1429_v21  ;;  %v818_v55 = vrot.slane %v1244_v49, 2  ;;  %v887_v57 = vrot.slane %v1252_v51, 1  ;;  %v888_v58 = vrot.slane %v1253_v52, 1 }
  0x21   : > { %1327 = vmatpush3.bf16.msra.mxu1 %v1430_v22  ;;  %1332 = vmatprep.subr.bf16.mxu0 %v1491_v1 }
  0x22   : > { %1340 = vmatprep.subr.bf16.mxu1 %v1491_v1  ;;  %v819_v59 = vsel %vm464_vm3, %v817_v54, %v818_v55  ;;  %v889_v61 = vsel %vm399_vm1, %v887_v57, %v888_v58 }
  0x23   : > { %1321 = vmatmul.mubr.msk.bf16.vlgmr.msra.gmra.mxu0 %vm415_vm2, %v1209_v29 }
  0x24   : > { %1329 = vmatmul.mubr.msk.bf16.vlgmr.msra.gmra.mxu1 %vm415_vm2, %v607_v36  ;;  %1333 = vmatpush3.bf16.msra.mxu0 %v1433_v32 }
  0x25   : > { %1341 = vmatpush3.bf16.msra.mxu1 %v1434_v35  ;;  %1334 = vmatprep.subr.bf16.mxu0 %v1491_v1 }
  0x26   : > { %1342 = vmatprep.subr.bf16.mxu1 %v1491_v1  ;;  %1336 = vmatprep.mubr.msk.bf16.mxu0 %vm1492_vm0, %v1491_v1 }
  0x27   : > { %1344 = vmatprep.mubr.msk.bf16.mxu1 %vm1492_vm0, %v1491_v1 }
  0x28   : > { %1335 = vmatpush3.bf16.msra.mxu0 %v1435_v37 }
  0x29   : > { %1343 = vmatpush3.bf16.msra.mxu1 %v1436_v38  ;;  %1348 = vmatprep.subr.bf16.mxu0 %v1491_v1 }
  0x2a   : > { %1356 = vmatprep.subr.bf16.mxu1 %v1491_v1 }
  0x2b   : > { %1337 = vmatmul.mubr.msk.bf16.vlgmr.msra.gmra.mxu0 %vm415_vm2, %v677_v45 }
  0x2c   : > { %1345 = vmatmul.mubr.msk.bf16.vlgmr.msra.gmra.mxu1 %vm415_vm2, %v1235_v46  ;;  %1349 = vmatpush3.bf16.msra.mxu0 %v1440_v47  ;;  %v1265_v46 = vld [vmem:[%s1732_s4] ss:$0 sm:$0xff] }
  0x2d   : > { %1357 = vmatpush3.bf16.msra.mxu1 %v1441_v50  ;;  %1350 = vmatprep.subr.bf16.mxu0 %v1491_v1 }
  0x2e   : > { %1358 = vmatprep.subr.bf16.mxu1 %v1491_v1  ;;  %1352 = vmatprep.mubr.msk.bf16.mxu0 %vm1492_vm0, %v1491_v1 }
  0x2f   : > { %1360 = vmatprep.mubr.msk.bf16.mxu1 %vm1492_vm0, %v1491_v1 }
  0x30   : > { %1351 = vmatpush3.bf16.msra.mxu0 %v1442_v53 }
  0x31   : > { %1359 = vmatpush3.bf16.msra.mxu1 %v1443_v56  ;;  %1364 = vmatprep.subr.bf16.mxu0 %v1491_v1 }
  0x33   : > { %1353 = vmatmul.mubr.msk.bf16.vlgmr.msra.gmra.mxu0 %vm415_vm2, %v819_v59 }
  0x34   : > { %1361 = vmatmul.mubr.msk.bf16.vlgmr.msra.gmra.mxu1 %vm415_vm2, %v889_v61  ;;  %1365 = vmatpush3.bf16.msra.mxu0 %v1448_v60 }
  0x35   : > { %1366 = vmatprep.subr.bf16.mxu0 %v1491_v1  ;;  %1368 = vmatprep.mubr.msk.bf16.mxu0 %vm1492_vm0, %v1491_v1 }
  0x38   : > { %1367 = vmatpush3.bf16.msra.mxu0 %v1449_v62 }
  0x3b   : > { %1369 = vmatmul.mubr.msk.bf16.vlgmr.msra.gmra.mxu0 %vm415_vm2, %v1261_v63 }
  0xdb   : > { %v453_v0 = vpop.f32.mrf.mxu0 }
  0xdc   : > { %v517_v2 = vpop.f32.mrf.mxu1 }
  0xdd   : > { %v1306_v3 = vpop.f32.mrf.mxu0  ;;  %v518_v14 = vadd.f32 %v517_v2, %v453_v0 }
  0xde   : > { %v1314_v4 = vpop.f32.mrf.mxu1 }
  0xdf   : > { %v456_v5 = vpop.f32.mrf.mxu0 }
  0xe0   : > { %v520_v6 = vpop.f32.mrf.mxu1 }
  0xe1   : > { %v1307_v7 = vpop.f32.mrf.mxu0  ;;  %v521_v19 = vadd.f32 %v520_v6, %v456_v5 }
  0xe2   : > { %v1315_v8 = vpop.f32.mrf.mxu1 }
  0xe3   : > { %v579_v9 = vpop.f32.mrf.mxu0 }
  0xe4   : > { %v657_v10 = vpop.f32.mrf.mxu1  ;;  %v586_v16 = vadd.f32 %v579_v9, %v518_v14 }
  0xe5   : > { %v1322_v11 = vpop.f32.mrf.mxu0 }
  0xe6   : > { %v1330_v12 = vpop.f32.mrf.mxu1  ;;  %v664_v22 = vadd.f32 %v657_v10, %v586_v16 }
  0xe7   : > { %v582_v13 = vpop.f32.mrf.mxu0 }
  0xe8   : > { %v660_v15 = vpop.f32.mrf.mxu1  ;;  %v587_v23 = vadd.f32 %v582_v13, %v521_v19 }
  0xe9   : > { %v1323_v1 = vpop.f32.mrf.mxu0 }
  0xea   : > { %v1331_v17 = vpop.f32.mrf.mxu1  ;;  %v665_v29 = vadd.f32 %v660_v15, %v587_v23 }
  0xeb   : > { %v727_v18 = vpop.f32.mrf.mxu0 }
  0xec   : > { %v791_v20 = vpop.f32.mrf.mxu1  ;;  %v734_v26 = vadd.f32 %v727_v18, %v664_v22 }
  0xed   : > { %v1338_v21 = vpop.f32.mrf.mxu0 }
  0xee   : > { %v1346_v24 = vpop.f32.mrf.mxu1  ;;  %v798_v32 = vadd.f32 %v791_v20, %v734_v26 }
  0xef   : > { %v730_v25 = vpop.f32.mrf.mxu0 }
  0xf0   : > { %v794_v27 = vpop.f32.mrf.mxu1  ;;  %v735_v33 = vadd.f32 %v730_v25, %v665_v29 }
  0xf1   : > { %v1339_v28 = vpop.f32.mrf.mxu0 }
  0xf2   : > { %v1347_v30 = vpop.f32.mrf.mxu1  ;;  %v799_v39 = vadd.f32 %v794_v27, %v735_v33 }
  0xf3   : > { %v869_v31 = vpop.f32.mrf.mxu0 }
  0xf4   : > { %v939_v34 = vpop.f32.mrf.mxu1  ;;  %v876_v36 = vadd.f32 %v869_v31, %v798_v32 }
  0xf5   : > { %v1354_v35 = vpop.f32.mrf.mxu0 }
  0xf6   : > { %v1362_v37 = vpop.f32.mrf.mxu1  ;;  %v946_v42 = vadd.f32 %v939_v34, %v876_v36 }
  0xf7   : > { %v872_v38 = vpop.f32.mrf.mxu0 }
  0xf8   : > { %v942_v40 = vpop.f32.mrf.mxu1  ;;  %v877_v43 = vadd.f32 %v872_v38, %v799_v39 }
  0xf9   : > { %v1355_v41 = vpop.f32.mrf.mxu0 }
  0xfa   : > { %v1363_v44 = vpop.f32.mrf.mxu1  ;;  %v947_v50 = vadd.f32 %v942_v40, %v877_v43 }
  0xfb   : > { %v1003_v45 = vpop.f32.mrf.mxu0 }
  0xfc   : > { %v1010_v47 = vadd.f32 %v1003_v45, %v946_v42 }
  0xfd   : > { %v1370_v49 = vpop.f32.mrf.mxu0 }
  0xfe   : > { %v1019_v51 = vmul.f32 %v1265_v46, %v1010_v47 }
  0xff   : > { %v1006_v52 = vpop.f32.mrf.mxu0 }
 0x100   : > { %v1028_v53 = vadd.f32 %v1266_v48, %v1019_v51  ;;  %v1011_v54 = vadd.f32 %v1006_v52, %v947_v50 }
 0x101   : > { %v1371_v55 = vpop.f32.mrf.mxu0 }
 0x102   : > { %v1030_v56 = vmax.f32 %v1028_v53, 0.0  ;;  %v1020_v57 = vmul.f32 %v1265_v46, %v1011_v54 }
 0x104   : > { %v1271_v58 = vpack.c.bf16 %v1030_v56, %v1030_v56  ;;  %v1029_v59 = vadd.f32 %v1266_v48, %v1020_v57 }
 0x106   : > { %1041 = vst.msk [vmem:[%s376_s29] sm:$0xf] %vm1040_vm4, %v1271_v58  ;;  %v1031_v60 = vmax.f32 %v1029_v59, 0.0 }
 0x108   : > { %v1272_v61 = vpack.c.bf16 %v1031_v60, %v1031_v60 }
 0x10a   : > { %1042 = vst.msk [vmem:[%s376_s29 + $0x4] sm:$0xf] %vm1040_vm4, %v1272_v61 }
 0x10b PF: > { %s16_s25 = sadd.s32 1, %s1489_s25   ;;  %s1737_s21 = smov %s1481_s23 }
 0x10c   : > { %p13_p10 = scmp.ge.s32.totalorder %s16_s25, 34   ;;  %s1738_s22 = smov %s1485_s24 }
 0x10d   : > { %s1739_s23 = smov %s1742_s26  ;;  %s1740_s24 = smov %s1746_s27 }
 0x10e   :  { %15 = sbr.rel (!%p13_p10) target bundleno = 3 (0x3), region = 88 }

// kernel: aspp_forward.14
= control target key start
LH: loop header
LB: loop body
LE: loop exit
PB: predicated region body
PF: predicated region fallthrough
CT: control target
= control target key end

     0   :  { %s1428_s15 = smov 0   ;;  %s1430_s16 = smov 0   ;;  %s1736_s0 = inlined_call_operand.vmem [shape: bf16[2,256,32], index: 0, kind: input, shape index: {}]   ;;  %s1737_s1 = inlined_call_operand.vmem [shape: bf16[32,32], index: 1, kind: input, shape index: {}]   ;;  %s1738_s2 = inlined_call_operand.vmem [shape: f32[1,32], index: 2, kind: input, shape index: {}]   ;;  %s1739_s3 = inlined_call_operand.vmem [shape: f32[1,32], index: 3, kind: input, shape index: {}]   ;;  %s1740_s4 = inlined_call_operand.vmem [shape: bf16[2,256,32], index: 4, kind: output, shape index: {}]  }
   0x1   :  { %s1432_s17 = smov 0  }
   0x2 LB: > { %s33_s18 = sadd.s32 1, %s1396_s16  ;;  %p1168_p0 = scmp.ge.s32.totalorder %s1400_s17, 1  ;;  %s1400_s17 = sphi %s1432_s17, %s14_s17   ;;  %s1396_s16 = sphi %s1430_s16, %s1742_s16   ;;  %s1392_s15 = sphi %s1428_s15, %s1741_s15  }
   0x3   : > { %p35_p1 = scmp.ge.s32.totalorder %s33_s18, 2  ;;  %p206_p2 = scmp.lt.s32.totalorder %s1400_s17, 3 }
   0x5   : > { %s1744_s18 = smov (%p35_p1, %s33_s18), 0  ;;  %p207_p3 = pnand %p1168_p0, %p206_p2 }
   0x6   : > { %p249_p4 = scmp.lt.s32.totalorder (!%p207_p3), %s1392_s15, 1 }
   0x7   : > { %210 = sbr.rel (%p207_p3) target bundleno = 274 (0x112), region = 36 }
   0xc   : > { %v1360_v0 = vld [vmem:[%s1737_s1 + $0x8] sm:$0xff]   ;;  %v1361_v1 = vld [vmem:[%s1737_s1] sm:$0xff]   ;;  %s1746_s15 = smov (!%p249_p4, %s1392_s15), 1  ;;  %vm282_vm0 = vcmask 261120   ;;  %v1402_v2 = vmov 0.0   ;;  %vm1022_vm1 = vcmask 257024  }
   0xd   : > { %1295 = vmatprep.subr.bf16.mxu0 %v1360_v0  ;;  %1331 = vmatprep.subr.bf16.mxu1 %v1360_v0  ;;  %285 = vst.msk [vmem:[#allocation2 + $0x10] sm:$0xff] %vm282_vm0, %v1402_v2  ;;  %283 = vst.msk [vmem:[#allocation2] sm:$0xff] %vm282_vm0, %v1402_v2  ;;  %s1243_s23 = sshll.u32 %s1746_s15, 7  ;;  %v1534_v44 = vld [vmem:[%s1738_s2] ss:$0 sm:$0xff] }
   0xe   : > { %1296 = vmatpush3.bf16.msra.mxu0 %v1360_v0  ;;  %1333 = vmatpush3.bf16.msra.mxu1 %v1360_v0  ;;  %284 = vst.msk [vmem:[#allocation2 + $0x8] sm:$0xff] %vm282_vm0, %v1402_v2  ;;  %286 = vst.msk [vmem:[#allocation2 + $0x18] sm:$0xff] %vm282_vm0, %v1402_v2  ;;  %s1492_s26 = scalar_lea.vmem %s1736_s0, %s1243_s23  ;;  %v1541_v52 = vld [vmem:[%s1739_s3] ss:$0 sm:$0xff]  ;;  %s1562_s7 = scalar_lea.vmem %s1740_s4, %s1243_s23 }
   0xf   : > { %287 = vst.msk [vmem:[#allocation2 + $0x20] sm:$0xff] %vm282_vm0, %v1402_v2  ;;  %288 = vst.msk [vmem:[#allocation2 + $0x28] sm:$0xff] %vm282_vm0, %v1402_v2  ;;  %1297 = vmatprep.subr.bf16.mxu0 %v1361_v1  ;;  %1332 = vmatprep.subr.bf16.mxu1 %v1361_v1  ;;  %v1362_v3 = vld [vmem:[%s1492_s26] sm:$0xff]   ;;  %v1364_v5 = vld [vmem:[%s1492_s26 + $0x8] sm:$0xff]  }
  0x10   : > { %289 = vst.msk [vmem:[#allocation2 + $0x30] sm:$0xff] %vm282_vm0, %v1402_v2  ;;  %290 = vst.msk [vmem:[#allocation2 + $0x38] sm:$0xff] %vm282_vm0, %v1402_v2  ;;  %v1363_v4 = vld [vmem:[%s1492_s26 + $0x40] sm:$0xff]   ;;  %1299 = vmatprep.mubr.msk.bf16.mxu0 %vm282_vm0, %v1362_v3  ;;  %v1365_v6 = vld [vmem:[%s1492_s26 + $0x48] sm:$0xff]  }
  0x11   : > { %291 = vst.msk [vmem:[#allocation2 + $0x40] sm:$0xff] %vm282_vm0, %v1402_v2  ;;  %292 = vst.msk [vmem:[#allocation2 + $0x48] sm:$0xff] %vm282_vm0, %v1402_v2  ;;  %1315 = vmatprep.mubr.msk.bf16.mxu1 %vm282_vm0, %v1363_v4  ;;  %v1366_v7 = vld [vmem:[%s1492_s26 + $0x10] sm:$0xff]   ;;  %v1368_v9 = vld [vmem:[%s1492_s26 + $0x18] sm:$0xff]  }
  0x12   : > { %293 = vst.msk [vmem:[#allocation2 + $0x50] sm:$0xff] %vm282_vm0, %v1402_v2  ;;  %294 = vst.msk [vmem:[#allocation2 + $0x58] sm:$0xff] %vm282_vm0, %v1402_v2  ;;  %1298 = vmatpush3.bf16.msra.mxu0 %v1361_v1  ;;  %1334 = vmatpush3.bf16.msra.mxu1 %v1361_v1  ;;  %v1367_v8 = vld [vmem:[%s1492_s26 + $0x50] sm:$0xff]   ;;  %v1369_v10 = vld [vmem:[%s1492_s26 + $0x58] sm:$0xff]  }
  0x13   : > { %295 = vst.msk [vmem:[#allocation2 + $0x60] sm:$0xff] %vm282_vm0, %v1402_v2  ;;  %296 = vst.msk [vmem:[#allocation2 + $0x68] sm:$0xff] %vm282_vm0, %v1402_v2  ;;  %v1370_v11 = vld [vmem:[%s1492_s26 + $0x20] sm:$0xff]   ;;  %v1372_v13 = vld [vmem:[%s1492_s26 + $0x28] sm:$0xff]  }
  0x14   : > { %297 = vst.msk [vmem:[#allocation2 + $0x70] sm:$0xff] %vm282_vm0, %v1402_v2  ;;  %298 = vst.msk [vmem:[#allocation2 + $0x78] sm:$0xff] %vm282_vm0, %v1402_v2  ;;  %v1371_v12 = vld [vmem:[%s1492_s26 + $0x60] sm:$0xff]   ;;  %v1373_v14 = vld [vmem:[%s1492_s26 + $0x68] sm:$0xff]  }
  0x15   : > { %299 = vst.msk [vmem:[#allocation2 + $0x80] sm:$0xff] %vm282_vm0, %v1402_v2  ;;  %300 = vst.msk [vmem:[#allocation2 + $0x88] sm:$0xff] %vm282_vm0, %v1402_v2  ;;  %1300 = vmatmul.mubr.msk.bf16.vlgmr.msra.gmra.mxu0 %vm282_vm0, %v1364_v5  ;;  %1316 = vmatmul.mubr.msk.bf16.vlgmr.msra.gmra.mxu1 %vm282_vm0, %v1365_v6  ;;  %v1374_v15 = vld [vmem:[%s1492_s26 + $0x30] sm:$0xff]   ;;  %v1376_v17 = vld [vmem:[%s1492_s26 + $0x38] sm:$0xff]  }
  0x16   : > { %301 = vst.msk [vmem:[#allocation2 + $0x90] sm:$0xff] %vm282_vm0, %v1402_v2  ;;  %302 = vst.msk [vmem:[#allocation2 + $0x98] sm:$0xff] %vm282_vm0, %v1402_v2  ;;  %1303 = vmatprep.mubr.msk.bf16.mxu0 %vm282_vm0, %v1366_v7  ;;  %1319 = vmatprep.mubr.msk.bf16.mxu1 %vm282_vm0, %v1367_v8  ;;  %v1375_v16 = vld [vmem:[%s1492_s26 + $0x70] sm:$0xff]   ;;  %v1377_v18 = vld [vmem:[%s1492_s26 + $0x78] sm:$0xff]  }
  0x17   : > { %303 = vst.msk [vmem:[#allocation2 + $0xa0] sm:$0xff] %vm282_vm0, %v1402_v2  ;;  %304 = vst.msk [vmem:[#allocation2 + $0xa8] sm:$0xff] %vm282_vm0, %v1402_v2  ;;  %v317_v19 = vld [vmem:[#allocation2 + $0x10] sm:$0xff]  ;;  %v315_v22 = vld [vmem:[#allocation2] sm:$0xff] }
  0x18   : > { %305 = vst.msk [vmem:[#allocation2 + $0xb0] sm:$0xff] %vm282_vm0, %v1402_v2  ;;  %306 = vst.msk [vmem:[#allocation2 + $0xb8] sm:$0xff] %vm282_vm0, %v1402_v2  ;;  %v318_v28 = vld [vmem:[#allocation2 + $0x18] sm:$0xff]  ;;  %v316_v34 = vld [vmem:[#allocation2 + $0x8] sm:$0xff] }
  0x19   : > { %307 = vst.msk [vmem:[#allocation2 + $0xc0] sm:$0xff] %vm282_vm0, %v1402_v2  ;;  %308 = vst.msk [vmem:[#allocation2 + $0xc8] sm:$0xff] %vm282_vm0, %v1402_v2  ;;  %v321_v40 = vld [vmem:[#allocation2 + $0x30] sm:$0xff]  ;;  %v319_v47 = vld [vmem:[#allocation2 + $0x20] sm:$0xff] }
  0x1a   : > { %309 = vst.msk [vmem:[#allocation2 + $0xd0] sm:$0xff] %vm282_vm0, %v1402_v2  ;;  %310 = vst.msk [vmem:[#allocation2 + $0xd8] sm:$0xff] %vm282_vm0, %v1402_v2  ;;  %v322_v55 = vld [vmem:[#allocation2 + $0x38] sm:$0xff]  ;;  %v320_v1 = vld [vmem:[#allocation2 + $0x28] sm:$0xff] }
  0x1b   : > { %311 = vst.msk [vmem:[#allocation2 + $0xe0] sm:$0xff] %vm282_vm0, %v1402_v2  ;;  %312 = vst.msk [vmem:[#allocation2 + $0xe8] sm:$0xff] %vm282_vm0, %v1402_v2 }
  0x1c   : > { %313 = vst.msk [vmem:[#allocation2 + $0xf0] sm:$0xff] %vm282_vm0, %v1402_v2  ;;  %314 = vst.msk [vmem:[#allocation2 + $0xf8] sm:$0xff] %vm282_vm0, %v1402_v2  ;;  %v331_v25 = vld [vmem:[#allocation2 + $0x80] sm:$0xff]  ;;  %v332_v37 = vld [vmem:[#allocation2 + $0x88] sm:$0xff] }
  0x1d   : > { %1304 = vmatmul.mubr.msk.bf16.gmra.mxu0 %vm282_vm0, %v1368_v9  ;;  %1320 = vmatmul.mubr.msk.bf16.gmra.mxu1 %vm282_vm0, %v1369_v10  ;;  %v333_v20 = vld [vmem:[#allocation2 + $0x90] sm:$0xff]  ;;  %v334_v31 = vld [vmem:[#allocation2 + $0x98] sm:$0xff] }
  0x1e   : > { %1307 = vmatprep.mubr.msk.bf16.mxu0 %vm282_vm0, %v1370_v11  ;;  %1323 = vmatprep.mubr.msk.bf16.mxu1 %vm282_vm0, %v1371_v12  ;;  %v335_v50 = vld [vmem:[#allocation2 + $0xa0] sm:$0xff]  ;;  %v336_v7 = vld [vmem:[#allocation2 + $0xa8] sm:$0xff] }
  0x1f   : > { %v337_v43 = vld [vmem:[#allocation2 + $0xb0] sm:$0xff]  ;;  %v338_v60 = vld [vmem:[#allocation2 + $0xb8] sm:$0xff] }
  0x25   : > { %1308 = vmatmul.mubr.msk.bf16.gmra.mxu0 %vm282_vm0, %v1372_v13  ;;  %1324 = vmatmul.mubr.msk.bf16.gmra.mxu1 %vm282_vm0, %v1373_v14 }
  0x26   : > { %1311 = vmatprep.mubr.msk.bf16.mxu0 %vm282_vm0, %v1374_v15  ;;  %1327 = vmatprep.mubr.msk.bf16.mxu1 %vm282_vm0, %v1375_v16 }
  0x2d   : > { %1312 = vmatmul.mubr.msk.bf16.gmra.mxu0 %vm282_vm0, %v1376_v17  ;;  %1328 = vmatmul.mubr.msk.bf16.gmra.mxu1 %vm282_vm0, %v1377_v18 }
  0xd5   : > { %v1301_v21 = vpop.f32.mrf.mxu0  ;;  %v1317_v24 = vpop.f32.mrf.mxu1 }
  0xd6   : > { %v687_v23 = vadd.f32 %v1301_v21, %v317_v19  ;;  %v703_v26 = vadd.f32 %v1317_v24, %v333_v20 }
  0xd7   : > { %v558_v27 = vpop.f32.mrf.mxu0  ;;  %v622_v30 = vpop.f32.mrf.mxu1 }
  0xd8   : > { %719 = vst.msk [vmem:[#allocation2 + $0x10] sm:$0xff] %vm282_vm0, %v687_v23  ;;  %v685_v29 = vadd.f32 %v558_v27, %v315_v22  ;;  %735 = vst.msk [vmem:[#allocation2 + $0x90] sm:$0xff] %vm282_vm0, %v703_v26  ;;  %v701_v32 = vadd.f32 %v622_v30, %v331_v25 }
  0xd9   : > { %v1302_v33 = vpop.f32.mrf.mxu0  ;;  %v1318_v36 = vpop.f32.mrf.mxu1 }
  0xda   : > { %717 = vst.msk [vmem:[#allocation2] sm:$0xff] %vm282_vm0, %v685_v29  ;;  %v688_v35 = vadd.f32 %v1302_v33, %v318_v28  ;;  %733 = vst.msk [vmem:[#allocation2 + $0x80] sm:$0xff] %vm282_vm0, %v701_v32  ;;  %v704_v38 = vadd.f32 %v1318_v36, %v334_v31 }
  0xdb   : > { %v561_v39 = vpop.f32.mrf.mxu0  ;;  %v625_v42 = vpop.f32.mrf.mxu1 }
  0xdc   : > { %720 = vst.msk [vmem:[#allocation2 + $0x18] sm:$0xff] %vm282_vm0, %v688_v35  ;;  %v686_v41 = vadd.f32 %v561_v39, %v316_v34  ;;  %736 = vst.msk [vmem:[#allocation2 + $0x98] sm:$0xff] %vm282_vm0, %v704_v38  ;;  %v702_v45 = vadd.f32 %v625_v42, %v332_v37 }
  0xdd   : > { %v1305_v46 = vpop.f32.mrf.mxu0  ;;  %v1321_v49 = vpop.f32.mrf.mxu1 }
  0xde   : > { %718 = vst.msk [vmem:[#allocation2 + $0x8] sm:$0xff] %vm282_vm0, %v686_v41  ;;  %v691_v48 = vadd.f32 %v1305_v46, %v321_v40  ;;  %734 = vst.msk [vmem:[#allocation2 + $0x88] sm:$0xff] %vm282_vm0, %v702_v45  ;;  %v707_v53 = vadd.f32 %v1321_v49, %v337_v43 }
  0xdf   : > { %v754_v51 = vld [vmem:[#allocation2 + $0x10] sm:$0xff]  ;;  %v574_v54 = vpop.f32.mrf.mxu0  ;;  %v638_v59 = vpop.f32.mrf.mxu1 }
  0xe0   : > { %v793_v56 = vmul.f32 %v1534_v44, %v754_v51  ;;  %v770_v57 = vld [vmem:[#allocation2 + $0x90] sm:$0xff]  ;;  %723 = vst.msk [vmem:[#allocation2 + $0x30] sm:$0xff] %vm282_vm0, %v691_v48  ;;  %v689_v58 = vadd.f32 %v574_v54, %v319_v47  ;;  %739 = vst.msk [vmem:[#allocation2 + $0xb0] sm:$0xff] %vm282_vm0, %v707_v53  ;;  %v705_v63 = vadd.f32 %v638_v59, %v335_v50 }
  0xe1   : > { %v809_v61 = vmul.f32 %v1534_v44, %v770_v57  ;;  %v752_v62 = vld [vmem:[#allocation2] sm:$0xff]  ;;  %v1306_v0 = vpop.f32.mrf.mxu0  ;;  %v1322_v6 = vpop.f32.mrf.mxu1 }
  0xe2   : > { %v832_v2 = vadd.f32 %v1541_v52, %v793_v56  ;;  %v791_v3 = vmul.f32 %v1534_v44, %v752_v62  ;;  %v768_v4 = vld [vmem:[#allocation2 + $0x80] sm:$0xff]  ;;  %721 = vst.msk [vmem:[#allocation2 + $0x20] sm:$0xff] %vm282_vm0, %v689_v58  ;;  %v692_v5 = vadd.f32 %v1306_v0, %v322_v55  ;;  %737 = vst.msk [vmem:[#allocation2 + $0xa0] sm:$0xff] %vm282_vm0, %v705_v63 }
  0xe3   : > { %v848_v8 = vadd.f32 %v1541_v52, %v809_v61  ;;  %v807_v9 = vmul.f32 %v1534_v44, %v768_v4  ;;  %v755_v10 = vld [vmem:[#allocation2 + $0x18] sm:$0xff]  ;;  %v708_v11 = vadd.f32 %v1322_v6, %v338_v60  ;;  %v577_v12 = vpop.f32.mrf.mxu0  ;;  %v641_v18 = vpop.f32.mrf.mxu1 }
  0xe4   : > { %v864_v13 = vmax.f32 %v832_v2, 0.0  ;;  %v830_v14 = vadd.f32 %v1541_v52, %v791_v3  ;;  %v794_v15 = vmul.f32 %v1534_v44, %v755_v10  ;;  %v771_v16 = vld [vmem:[#allocation2 + $0x98] sm:$0xff]  ;;  %724 = vst.msk [vmem:[#allocation2 + $0x38] sm:$0xff] %vm282_vm0, %v692_v5  ;;  %v690_v17 = vadd.f32 %v577_v12, %v320_v1  ;;  %v325_v10 = vld [vmem:[#allocation2 + $0x50] sm:$0xff] }
  0xe5   : > { %v880_v19 = vmax.f32 %v848_v8, 0.0  ;;  %v846_v20 = vadd.f32 %v1541_v52, %v807_v9  ;;  %v810_v21 = vmul.f32 %v1534_v44, %v771_v16  ;;  %v753_v22 = vld [vmem:[#allocation2 + $0x8] sm:$0xff]  ;;  %740 = vst.msk [vmem:[#allocation2 + $0xb8] sm:$0xff] %vm282_vm0, %v708_v11  ;;  %v706_v23 = vadd.f32 %v641_v18, %v336_v7  ;;  %v1567_v24 = vpop.f32.mrf.mxu0  ;;  %v1572_v30 = vpop.f32.mrf.mxu1 }
  0xe6   : > { %v1247_v25 = vpack.c.bf16 %v864_v13, %v864_v13  ;;  %v862_v26 = vmax.f32 %v830_v14, 0.0  ;;  %v833_v27 = vadd.f32 %v1541_v52, %v794_v15  ;;  %v792_v28 = vmul.f32 %v1534_v44, %v753_v22  ;;  %v769_v29 = vld [vmem:[#allocation2 + $0x88] sm:$0xff]  ;;  %722 = vst.msk [vmem:[#allocation2 + $0x28] sm:$0xff] %vm282_vm0, %v690_v17  ;;  %v341_v17 = vld [vmem:[#allocation2 + $0xd0] sm:$0xff] }
  0xe7   : > { %v1263_v31 = vpack.c.bf16 %v880_v19, %v880_v19  ;;  %v878_v32 = vmax.f32 %v846_v20, 0.0  ;;  %v849_v33 = vadd.f32 %v1541_v52, %v810_v21  ;;  %v808_v34 = vmul.f32 %v1534_v44, %v769_v29  ;;  %v758_v35 = vld [vmem:[#allocation2 + $0x30] sm:$0xff]  ;;  %738 = vst.msk [vmem:[#allocation2 + $0xa8] sm:$0xff] %vm282_vm0, %v706_v23  ;;  %v1577_v36 = vpop.f32.mrf.mxu0  ;;  %v1583_v42 = vpop.f32.mrf.mxu1  ;;  %v323_v23 = vld [vmem:[#allocation2 + $0x40] sm:$0xff] }
  0xe8   : > { %1025 = vst.msk [vmem:[%s1562_s7 + $0x8] sm:$0xf] %vm1022_vm1, %v1247_v25  ;;  %v1245_v37 = vpack.c.bf16 %v862_v26, %v862_v26  ;;  %v865_v38 = vmax.f32 %v833_v27, 0.0  ;;  %v831_v39 = vadd.f32 %v1541_v52, %v792_v28  ;;  %v797_v40 = vmul.f32 %v1534_v44, %v758_v35  ;;  %v774_v41 = vld [vmem:[#allocation2 + $0xb0] sm:$0xff]  ;;  %v339_v25 = vld [vmem:[#allocation2 + $0xc0] sm:$0xff] }
  0xe9   : > { %1041 = vst.msk [vmem:[%s1562_s7 + $0x48] sm:$0xf] %vm1022_vm1, %v1263_v31  ;;  %v1261_v43 = vpack.c.bf16 %v878_v32, %v878_v32  ;;  %v881_v45 = vmax.f32 %v849_v33, 0.0  ;;  %v847_v46 = vadd.f32 %v1541_v52, %v808_v34  ;;  %v813_v47 = vmul.f32 %v1534_v44, %v774_v41  ;;  %v756_v48 = vld [vmem:[#allocation2 + $0x20] sm:$0xff]  ;;  %v1589_v49 = vpop.f32.mrf.mxu0  ;;  %v1595_v56 = vpop.f32.mrf.mxu1  ;;  %v326_v32 = vld [vmem:[#allocation2 + $0x58] sm:$0xff]  ;;  %v324_v34 = vld [vmem:[#allocation2 + $0x48] sm:$0xff] }
  0xea   : > { %1023 = vst.msk [vmem:[%s1562_s7] sm:$0xf] %vm1022_vm1, %v1245_v37  ;;  %v1248_v50 = vpack.c.bf16 %v865_v38, %v865_v38  ;;  %v863_v51 = vmax.f32 %v831_v39, 0.0  ;;  %v836_v53 = vadd.f32 %v1541_v52, %v797_v40  ;;  %v795_v54 = vmul.f32 %v1534_v44, %v756_v48  ;;  %v772_v55 = vld [vmem:[#allocation2 + $0xa0] sm:$0xff]  ;;  %v342_v33 = vld [vmem:[#allocation2 + $0xd8] sm:$0xff]  ;;  %v340_v41 = vld [vmem:[#allocation2 + $0xc8] sm:$0xff] }
  0xeb   : > { %1039 = vst.msk [vmem:[%s1562_s7 + $0x40] sm:$0xf] %vm1022_vm1, %v1261_v43  ;;  %v1264_v57 = vpack.c.bf16 %v881_v45, %v881_v45  ;;  %v879_v58 = vmax.f32 %v847_v46, 0.0  ;;  %v852_v59 = vadd.f32 %v1541_v52, %v813_v47  ;;  %v811_v60 = vmul.f32 %v1534_v44, %v772_v55  ;;  %v759_v61 = vld [vmem:[#allocation2 + $0x38] sm:$0xff]  ;;  %v1601_v62 = vpop.f32.mrf.mxu0  ;;  %v1607_v4 = vpop.f32.mrf.mxu1  ;;  %v329_v43 = vld [vmem:[#allocation2 + $0x70] sm:$0xff] }
  0xec   : > { %1026 = vst.msk [vmem:[%s1562_s7 + $0xc] sm:$0xf] %vm1022_vm1, %v1248_v50  ;;  %v1246_v63 = vpack.c.bf16 %v863_v51, %v863_v51  ;;  %v868_v0 = vmax.f32 %v836_v53, 0.0  ;;  %v834_v1 = vadd.f32 %v1541_v52, %v795_v54  ;;  %v798_v2 = vmul.f32 %v1534_v44, %v759_v61  ;;  %v775_v3 = vld [vmem:[#allocation2 + $0xb8] sm:$0xff]  ;;  %v345_v45 = vld [vmem:[#allocation2 + $0xf0] sm:$0xff]  ;;  %v327_v51 = vld [vmem:[#allocation2 + $0x60] sm:$0xff] }
  0xed   : > { %1042 = vst.msk [vmem:[%s1562_s7 + $0x4c] sm:$0xf] %vm1022_vm1, %v1264_v57  ;;  %v1262_v5 = vpack.c.bf16 %v879_v58, %v879_v58  ;;  %v884_v6 = vmax.f32 %v852_v59, 0.0  ;;  %v850_v7 = vadd.f32 %v1541_v52, %v811_v60  ;;  %v814_v8 = vmul.f32 %v1534_v44, %v775_v3  ;;  %v757_v9 = vld [vmem:[#allocation2 + $0x28] sm:$0xff]  ;;  %v1313_v11 = vpop.f32.mrf.mxu0  ;;  %v1329_v18 = vpop.f32.mrf.mxu1  ;;  %v343_v53 = vld [vmem:[#allocation2 + $0xe0] sm:$0xff]  ;;  %v330_v54 = vld [vmem:[#allocation2 + $0x78] sm:$0xff] }
  0xee   : > { %1024 = vst.msk [vmem:[%s1562_s7 + $0x4] sm:$0xf] %vm1022_vm1, %v1246_v63  ;;  %v1251_v12 = vpack.c.bf16 %v868_v0, %v868_v0  ;;  %v866_v13 = vmax.f32 %v834_v1, 0.0  ;;  %v837_v14 = vadd.f32 %v1541_v52, %v798_v2  ;;  %v796_v15 = vmul.f32 %v1534_v44, %v757_v9  ;;  %v773_v16 = vld [vmem:[#allocation2 + $0xa8] sm:$0xff]  ;;  %v346_v60 = vld [vmem:[#allocation2 + $0xf8] sm:$0xff] }
  0xef   : > { %1040 = vst.msk [vmem:[%s1562_s7 + $0x44] sm:$0xf] %vm1022_vm1, %v1262_v5  ;;  %v1267_v19 = vpack.c.bf16 %v884_v6, %v884_v6  ;;  %v882_v20 = vmax.f32 %v850_v7, 0.0  ;;  %v853_v21 = vadd.f32 %v1541_v52, %v814_v8  ;;  %v812_v22 = vmul.f32 %v1534_v44, %v773_v16  ;;  %v606_v26 = vpop.f32.mrf.mxu0  ;;  %v670_v35 = vpop.f32.mrf.mxu1  ;;  %v344_v63 = vld [vmem:[#allocation2 + $0xe8] sm:$0xff] }
  0xf0   : > { %1029 = vst.msk [vmem:[%s1562_s7 + $0x18] sm:$0xf] %vm1022_vm1, %v1251_v12  ;;  %v1249_v27 = vpack.c.bf16 %v866_v13, %v866_v13  ;;  %v869_v28 = vmax.f32 %v837_v14, 0.0  ;;  %v835_v29 = vadd.f32 %v1541_v52, %v796_v15  ;;  %v695_v31 = vadd.f32 %v1567_v24, %v325_v10 }
  0xf1   : > { %1045 = vst.msk [vmem:[%s1562_s7 + $0x58] sm:$0xf] %vm1022_vm1, %v1267_v19  ;;  %v1265_v37 = vpack.c.bf16 %v882_v20, %v882_v20  ;;  %v885_v38 = vmax.f32 %v853_v21, 0.0  ;;  %v851_v39 = vadd.f32 %v1541_v52, %v812_v22  ;;  %v711_v40 = vadd.f32 %v1572_v30, %v341_v17  ;;  %v1314_v46 = vpop.f32.mrf.mxu0  ;;  %v1330_v55 = vpop.f32.mrf.mxu1 }
  0xf2   : > { %1027 = vst.msk [vmem:[%s1562_s7 + $0x10] sm:$0xf] %vm1022_vm1, %v1249_v27  ;;  %v1252_v24 = vpack.c.bf16 %v869_v28, %v869_v28  ;;  %v867_v47 = vmax.f32 %v835_v29, 0.0  ;;  %v693_v48 = vadd.f32 %v1577_v36, %v323_v23  ;;  %v709_v50 = vadd.f32 %v1583_v42, %v339_v25  ;;  %v328_v36 = vld [vmem:[#allocation2 + $0x68] sm:$0xff] }
  0xf3   : > { %727 = vst.msk [vmem:[#allocation2 + $0x50] sm:$0xff] %vm282_vm0, %v695_v31  ;;  %v1268_v30 = vpack.c.bf16 %v885_v38, %v885_v38  ;;  %v883_v57 = vmax.f32 %v851_v39, 0.0  ;;  %743 = vst.msk [vmem:[#allocation2 + $0xd0] sm:$0xff] %vm282_vm0, %v711_v40  ;;  %v696_v58 = vadd.f32 %v1589_v49, %v326_v32  ;;  %v712_v59 = vadd.f32 %v1595_v56, %v342_v33  ;;  %v609_v61 = vpop.f32.mrf.mxu0  ;;  %v673_v49 = vpop.f32.mrf.mxu1 }
  0xf4   : > { %1043 = vst.msk [vmem:[%s1562_s7 + $0x50] sm:$0xf] %vm1022_vm1, %v1265_v37  ;;  %1030 = vst.msk [vmem:[%s1562_s7 + $0x1c] sm:$0xf] %vm1022_vm1, %v1252_v24  ;;  %v1250_v42 = vpack.c.bf16 %v867_v47, %v867_v47  ;;  %v694_v0 = vadd.f32 %v1601_v62, %v324_v34  ;;  %v710_v1 = vadd.f32 %v1607_v4, %v340_v41 }
  0xf5   : > { %725 = vst.msk [vmem:[#allocation2 + $0x40] sm:$0xff] %vm282_vm0, %v693_v48  ;;  %741 = vst.msk [vmem:[#allocation2 + $0xc0] sm:$0xff] %vm282_vm0, %v709_v50  ;;  %v699_v2 = vadd.f32 %v1313_v11, %v329_v43  ;;  %v1266_v56 = vpack.c.bf16 %v883_v57, %v883_v57  ;;  %v715_v3 = vadd.f32 %v1329_v18, %v345_v45 }
  0xf6   : > { %1046 = vst.msk [vmem:[%s1562_s7 + $0x5c] sm:$0xf] %vm1022_vm1, %v1268_v30  ;;  %v697_v5 = vadd.f32 %v606_v26, %v327_v51  ;;  %v713_v6 = vadd.f32 %v670_v35, %v343_v53  ;;  %1028 = vst.msk [vmem:[%s1562_s7 + $0x14] sm:$0xf] %vm1022_vm1, %v1250_v42  ;;  %v700_v62 = vadd.f32 %v1314_v46, %v330_v54 }
  0xf7   : > { %728 = vst.msk [vmem:[#allocation2 + $0x58] sm:$0xff] %vm282_vm0, %v696_v58  ;;  %744 = vst.msk [vmem:[#allocation2 + $0xd8] sm:$0xff] %vm282_vm0, %v712_v59  ;;  %v716_v4 = vadd.f32 %v1330_v55, %v346_v60  ;;  %v698_v7 = vadd.f32 %v609_v61, %v328_v36  ;;  %v714_v8 = vadd.f32 %v673_v49, %v344_v63 }
  0xf8   : > { %726 = vst.msk [vmem:[#allocation2 + $0x48] sm:$0xff] %vm282_vm0, %v694_v0  ;;  %742 = vst.msk [vmem:[#allocation2 + $0xc8] sm:$0xff] %vm282_vm0, %v710_v1 }
  0xf9   : > { %731 = vst.msk [vmem:[#allocation2 + $0x70] sm:$0xff] %vm282_vm0, %v699_v2  ;;  %747 = vst.msk [vmem:[#allocation2 + $0xf0] sm:$0xff] %vm282_vm0, %v715_v3 }
  0xfa   : > { %1044 = vst.msk [vmem:[%s1562_s7 + $0x54] sm:$0xf] %vm1022_vm1, %v1266_v56  ;;  %v762_v9 = vld [vmem:[#allocation2 + $0x50] sm:$0xff] }
  0xfb   : > { %729 = vst.msk [vmem:[#allocation2 + $0x60] sm:$0xff] %vm282_vm0, %v697_v5  ;;  %745 = vst.msk [vmem:[#allocation2 + $0xe0] sm:$0xff] %vm282_vm0, %v713_v6  ;;  %v801_v10 = vmul.f32 %v1534_v44, %v762_v9  ;;  %v778_v11 = vld [vmem:[#allocation2 + $0xd0] sm:$0xff] }
  0xfc   : > { %732 = vst.msk [vmem:[#allocation2 + $0x78] sm:$0xff] %vm282_vm0, %v700_v62  ;;  %748 = vst.msk [vmem:[#allocation2 + $0xf8] sm:$0xff] %vm282_vm0, %v716_v4  ;;  %v817_v12 = vmul.f32 %v1534_v44, %v778_v11  ;;  %v760_v13 = vld [vmem:[#allocation2 + $0x40] sm:$0xff] }
  0xfd   : > { %730 = vst.msk [vmem:[#allocation2 + $0x68] sm:$0xff] %vm282_vm0, %v698_v7  ;;  %746 = vst.msk [vmem:[#allocation2 + $0xe8] sm:$0xff] %vm282_vm0, %v714_v8  ;;  %v776_v14 = vld [vmem:[#allocation2 + $0xc0] sm:$0xff]  ;;  %v840_v15 = vadd.f32 %v1541_v52, %v801_v10  ;;  %v799_v16 = vmul.f32 %v1534_v44, %v760_v13 }
  0xfe   : > { %v815_v17 = vmul.f32 %v1534_v44, %v776_v14  ;;  %v763_v18 = vld [vmem:[#allocation2 + $0x58] sm:$0xff]  ;;  %v856_v20 = vadd.f32 %v1541_v52, %v817_v12 }
  0xff   : > { %v779_v19 = vld [vmem:[#allocation2 + $0xd8] sm:$0xff]  ;;  %v802_v21 = vmul.f32 %v1534_v44, %v763_v18  ;;  %v761_v23 = vld [vmem:[#allocation2 + $0x48] sm:$0xff]  ;;  %v872_v26 = vmax.f32 %v840_v15, 0.0  ;;  %v838_v27 = vadd.f32 %v1541_v52, %v799_v16 }
 0x100   : > { %v818_v22 = vmul.f32 %v1534_v44, %v779_v19  ;;  %v777_v25 = vld [vmem:[#allocation2 + $0xc8] sm:$0xff]  ;;  %v854_v28 = vadd.f32 %v1541_v52, %v815_v17  ;;  %v800_v29 = vmul.f32 %v1534_v44, %v761_v23  ;;  %v888_v31 = vmax.f32 %v856_v20, 0.0  ;;  %v766_v35 = vld [vmem:[#allocation2 + $0x70] sm:$0xff] }
 0x101   : > { %v841_v32 = vadd.f32 %v1541_v52, %v802_v21  ;;  %v816_v34 = vmul.f32 %v1534_v44, %v777_v25  ;;  %v1255_v37 = vpack.c.bf16 %v872_v26, %v872_v26  ;;  %v870_v38 = vmax.f32 %v838_v27, 0.0  ;;  %v782_v41 = vld [vmem:[#allocation2 + $0xf0] sm:$0xff] }
 0x102   : > { %v857_v33 = vadd.f32 %v1541_v52, %v818_v22  ;;  %v886_v39 = vmax.f32 %v854_v28, 0.0  ;;  %v839_v40 = vadd.f32 %v1541_v52, %v800_v29  ;;  %v1271_v43 = vpack.c.bf16 %v888_v31, %v888_v31  ;;  %v764_v47 = vld [vmem:[#allocation2 + $0x60] sm:$0xff] }
 0x103   : > { %v873_v45 = vmax.f32 %v841_v32, 0.0  ;;  %v855_v24 = vadd.f32 %v1541_v52, %v816_v34  ;;  %v780_v48 = vld [vmem:[#allocation2 + $0xe0] sm:$0xff]  ;;  %1033 = vst.msk [vmem:[%s1562_s7 + $0x28] sm:$0xf] %vm1022_vm1, %v1255_v37  ;;  %v1253_v50 = vpack.c.bf16 %v870_v38, %v870_v38  ;;  %v805_v54 = vmul.f32 %v1534_v44, %v766_v35  ;;  %v767_v55 = vld [vmem:[#allocation2 + $0x78] sm:$0xff] }
 0x104   : > { %v889_v46 = vmax.f32 %v857_v33, 0.0  ;;  %v1269_v51 = vpack.c.bf16 %v886_v39, %v886_v39  ;;  %v871_v53 = vmax.f32 %v839_v40, 0.0  ;;  %v783_v30 = vld [vmem:[#allocation2 + $0xf8] sm:$0xff]  ;;  %1049 = vst.msk [vmem:[%s1562_s7 + $0x68] sm:$0xf] %vm1022_vm1, %v1271_v43  ;;  %v821_v60 = vmul.f32 %v1534_v44, %v782_v41  ;;  %v765_v36 = vld [vmem:[#allocation2 + $0x68] sm:$0xff] }
 0x105   : > { %v1256_v57 = vpack.c.bf16 %v873_v45, %v873_v45  ;;  %v887_v59 = vmax.f32 %v855_v24, 0.0  ;;  %1031 = vst.msk [vmem:[%s1562_s7 + $0x20] sm:$0xf] %vm1022_vm1, %v1253_v50  ;;  %v844_v63 = vadd.f32 %v1541_v52, %v805_v54  ;;  %v803_v42 = vmul.f32 %v1534_v44, %v764_v47  ;;  %v781_v1 = vld [vmem:[#allocation2 + $0xe8] sm:$0xff] }
 0x106   : > { %v1272_v58 = vpack.c.bf16 %v889_v46, %v889_v46  ;;  %1047 = vst.msk [vmem:[%s1562_s7 + $0x60] sm:$0xf] %vm1022_vm1, %v1269_v51  ;;  %v1254_v61 = vpack.c.bf16 %v871_v53, %v871_v53  ;;  %v819_v0 = vmul.f32 %v1534_v44, %v780_v48  ;;  %v860_v49 = vadd.f32 %v1541_v52, %v821_v60 }
 0x107   : > { %1034 = vst.msk [vmem:[%s1562_s7 + $0x2c] sm:$0xf] %vm1022_vm1, %v1256_v57  ;;  %v1270_v2 = vpack.c.bf16 %v887_v59, %v887_v59  ;;  %v806_v56 = vmul.f32 %v1534_v44, %v767_v55  ;;  %v822_v3 = vmul.f32 %v1534_v44, %v783_v30  ;;  %v876_v5 = vmax.f32 %v844_v63, 0.0 }
 0x108   : > { %1050 = vst.msk [vmem:[%s1562_s7 + $0x6c] sm:$0xf] %vm1022_vm1, %v1272_v58  ;;  %1032 = vst.msk [vmem:[%s1562_s7 + $0x24] sm:$0xf] %vm1022_vm1, %v1254_v61  ;;  %v842_v6 = vadd.f32 %v1541_v52, %v803_v42  ;;  %v858_v62 = vadd.f32 %v1541_v52, %v819_v0  ;;  %v804_v4 = vmul.f32 %v1534_v44, %v765_v36  ;;  %v892_v7 = vmax.f32 %v860_v49, 0.0 }
 0x109   : > { %1048 = vst.msk [vmem:[%s1562_s7 + $0x64] sm:$0xf] %vm1022_vm1, %v1270_v2  ;;  %v845_v8 = vadd.f32 %v1541_v52, %v806_v56  ;;  %v861_v9 = vadd.f32 %v1541_v52, %v822_v3  ;;  %v820_v10 = vmul.f32 %v1534_v44, %v781_v1  ;;  %v1259_v11 = vpack.c.bf16 %v876_v5, %v876_v5 }
 0x10a   : > { %v874_v12 = vmax.f32 %v842_v6, 0.0  ;;  %v890_v13 = vmax.f32 %v858_v62, 0.0  ;;  %v843_v14 = vadd.f32 %v1541_v52, %v804_v4  ;;  %v1275_v15 = vpack.c.bf16 %v892_v7, %v892_v7 }
 0x10b   : > { %v877_v16 = vmax.f32 %v845_v8, 0.0  ;;  %v893_v17 = vmax.f32 %v861_v9, 0.0  ;;  %v859_v18 = vadd.f32 %v1541_v52, %v820_v10  ;;  %1037 = vst.msk [vmem:[%s1562_s7 + $0x38] sm:$0xf] %vm1022_vm1, %v1259_v11 }
 0x10c   : > { %v1257_v19 = vpack.c.bf16 %v874_v12, %v874_v12  ;;  %v1273_v44 = vpack.c.bf16 %v890_v13, %v890_v13  ;;  %v875_v20 = vmax.f32 %v843_v14, 0.0  ;;  %1053 = vst.msk [vmem:[%s1562_s7 + $0x78] sm:$0xf] %vm1022_vm1, %v1275_v15 }
 0x10d   : > { %v1260_v21 = vpack.c.bf16 %v877_v16, %v877_v16  ;;  %v1276_v22 = vpack.c.bf16 %v893_v17, %v893_v17  ;;  %v891_v23 = vmax.f32 %v859_v18, 0.0 }
 0x10e   : > { %1035 = vst.msk [vmem:[%s1562_s7 + $0x30] sm:$0xf] %vm1022_vm1, %v1257_v19  ;;  %1051 = vst.msk [vmem:[%s1562_s7 + $0x70] sm:$0xf] %vm1022_vm1, %v1273_v44  ;;  %v1258_v25 = vpack.c.bf16 %v875_v20, %v875_v20 }
 0x10f   : > { %1038 = vst.msk [vmem:[%s1562_s7 + $0x3c] sm:$0xf] %vm1022_vm1, %v1260_v21  ;;  %1054 = vst.msk [vmem:[%s1562_s7 + $0x7c] sm:$0xf] %vm1022_vm1, %v1276_v22  ;;  %v1274_v52 = vpack.c.bf16 %v891_v23, %v891_v23 }
 0x110   : > { %1036 = vst.msk [vmem:[%s1562_s7 + $0x34] sm:$0xf] %vm1022_vm1, %v1258_v25 }
 0x111   : > { %1052 = vst.msk [vmem:[%s1562_s7 + $0x74] sm:$0xf] %vm1022_vm1, %v1274_v52 }
 0x112 PF: > { %s14_s17 = sadd.s32 1, %s1400_s17   ;;  %s1741_s15 = smov %s1396_s16 }
 0x113   : > { %p11_p5 = scmp.ge.s32.totalorder %s14_s17, 4   ;;  %s1742_s16 = smov %s1744_s18 }
 0x115   :  { %13 = sbr.rel (!%p11_p5) target bundleno = 2 (0x2), region = 77 }

// kernel: aspp_forward.25
= control target key start
LH: loop header
LB: loop body
LE: loop exit
PB: predicated region body
PF: predicated region fallthrough
CT: control target
= control target key end

     0   :  { %v229_v0 = vmov 0   ;;  %vm22_vm0 = vcmask 254976   ;;  %v230_v2 = vmov 1966171168   ;;  %v58_v4 = vlaneseq  ;;  %s302_s1 = inlined_call_operand.vmem [shape: bf16[160,32], index: 1, kind: input, shape index: {}]   ;;  %s303_s0 = inlined_call_operand.vmem [shape: bf16[1,2,160], index: 0, kind: input, shape index: {}]   ;;  %s304_s2 = inlined_call_operand.vmem [shape: f32[1,32], index: 2, kind: input, shape index: {}]   ;;  %s305_s3 = inlined_call_operand.vmem [shape: f32[1,32], index: 3, kind: input, shape index: {}]   ;;  %s306_s4 = inlined_call_operand.vmem [shape: f32[1,2,32], index: 4, kind: output, shape index: {}]  }
   0x1   :  { %134 = vmatprep.subr.bf16.mxu0 %v229_v0  ;;  %v219_v1 = vld [vmem:[%s302_s1 + $0x38] sm:$0xff]   ;;  %v56_v3 = vunpack.c.l.s4 %v230_v2  ;;  %v220_v5 = vld [vmem:[%s302_s1 + $0x30] sm:$0xff]   ;;  %v231_v6 = vmov 0.0   ;;  %v221_v9 = vld [vmem:[%s302_s1 + $0x28] sm:$0xff]   ;;  %vm130_vm1 = vcmask 261120  }
   0x2   :  { %135 = vmatpush1.bf16.msra.mxu0 %v219_v1  ;;  %23 = vst.msk [vmem:[#allocation2] sm:$0x3] %vm22_vm0, %v231_v6  ;;  %v59_v8 = vshrl.u32 %v58_v4, 7  ;;  %v222_v11 = vld [vmem:[%s302_s1 + $0x20] sm:$0xff]   ;;  %v223_v15 = vld [vmem:[%s302_s1 + $0x18] sm:$0xff]   ;;  %v224_v16 = vld [vmem:[%s302_s1 + $0x10] sm:$0xff]  }
   0x3   :  { %136 = vmatprep.subr.bf16.mxu0 %v229_v0  ;;  %v57_v7 = vunpack.c.0.s8 %v56_v3  ;;  %v202_v12 = vld.sshfl [vmem:[%s303_s0] sm:$0x11 pattern:$0x75316420]  ;;  %v225_v17 = vld [vmem:[%s302_s1 + $0x8] sm:$0xff]  }
   0x4   :  { %v54_v13 = vcombine.high %v202_v12, %v202_v12  ;;  %v226_v18 = vld [vmem:[%s302_s1] sm:$0xff]   ;;  %v227_v19 = vld [vmem:[%s302_s1 + $0x48] sm:$0xff]  }
   0x5   :  { %v60_v10 = vsub.s32 %v57_v7, %v59_v8  ;;  %v228_v20 = vld [vmem:[%s302_s1 + $0x40] sm:$0xff]  }
   0x6   :  { %137 = vmatpush1.bf16.msra.mxu0 %v220_v5  ;;  %v214_v28 = vld [vmem:[%s304_s2] ss:$0 sm:$0xff] }
   0x7   :  { %138 = vmatprep.subr.bf16.mxu0 %v229_v0  ;;  %v68_v14 = vrot.slane %v54_v13, %v60_v10  ;;  %v61_v21 = vrot.slane %v202_v12, %v60_v10  ;;  %v215_v30 = vld [vmem:[%s305_s3] ss:$0 sm:$0xff] }
   0x9   :  { %213 = vmatprep.mubr.msk.bf16.mxu0 %vm130_vm1, %v68_v14  ;;  %v24_v22 = vld [vmem:[#allocation2] sm:$0x3] }
   0xa   :  { %139 = vmatpush1.bf16.msra.mxu0 %v221_v9 }
   0xb   :  { %140 = vmatprep.subr.bf16.mxu0 %v229_v0 }
   0xe   :  { %141 = vmatpush1.bf16.msra.mxu0 %v222_v11 }
   0xf   :  { %142 = vmatprep.subr.bf16.mxu0 %v229_v0 }
  0x12   :  { %143 = vmatpush1.bf16.msra.mxu0 %v223_v15 }
  0x13   :  { %144 = vmatprep.subr.bf16.mxu0 %v229_v0 }
  0x16   :  { %145 = vmatpush1.bf16.msra.mxu0 %v224_v16 }
  0x17   :  { %146 = vmatprep.subr.bf16.mxu0 %v229_v0 }
  0x1a   :  { %147 = vmatpush1.bf16.msra.mxu0 %v225_v17 }
  0x1b   :  { %148 = vmatprep.subr.bf16.mxu0 %v229_v0 }
  0x1e   :  { %149 = vmatpush1.bf16.msra.mxu0 %v226_v18 }
  0x1f   :  { %162 = vmatprep.subr.bf16.mxu0 %v229_v0 }
  0x22   :  { %163 = vmatpush2.bf16.msra.mxu0 %v227_v19 }
  0x23   :  { %164 = vmatprep.subr.bf16.mxu0 %v229_v0 }
  0x26   :  { %165 = vmatpush2.bf16.msra.mxu0 %v228_v20 }
  0x29   :  { %167 = vmatmul.mubr.bf16.vlgmr.msra.gmra.mxu0 %v61_v21 }
  0xe9   :  { %v168_v23 = vpop.f32.mrf.mxu0 }
  0xea   :  { %v174_v24 = vadd.f32 %v168_v23, %v24_v22 }
  0xeb   :  { %v170_v25 = vpop.f32.mrf.mxu0 }
  0xec   :  { %176 = vst.msk [vmem:[#allocation2] sm:$0x3] %vm22_vm0, %v174_v24 }
  0xed   :  { %v171_v26 = vpop.f32.mrf.mxu0 }
  0xef   :  { %v172_v27 = vpop.f32.mrf.mxu0 }
  0xf3   :  { %v180_v29 = vld [vmem:[#allocation2] sm:$0x3] }
  0xf4   :  { %v188_v31 = vmul.f32 %v214_v28, %v180_v29 }
  0xf6   :  { %v196_v32 = vadd.f32 %v215_v30, %v188_v31 }
  0xf8   :  { %197 = vst.msk [vmem:[%s306_s4] sm:$0x3] %vm22_vm0, %v196_v32 }

// kernel: aspp_forward.24
= control target key start
LH: loop header
LB: loop body
LE: loop exit
PB: predicated region body
PF: predicated region fallthrough
CT: control target
= control target key end

     0   :  { %vm22_vm0 = vcmask 261120   ;;  %v134_v0 = vmov 0.0   ;;  %vm135_vm1 = vmmov 0   ;;  %s183_s1 = inlined_call_operand.vmem [shape: bf16[32,32], index: 1, kind: input, shape index: {}]   ;;  %s184_s0 = inlined_call_operand.vmem [shape: bf16[1,8,32], index: 0, kind: input, shape index: {}]   ;;  %s185_s2 = inlined_call_operand.vmem [shape: f32[1,32], index: 2, kind: input, shape index: {}]   ;;  %s186_s3 = inlined_call_operand.vmem [shape: f32[1,32], index: 3, kind: input, shape index: {}]   ;;  %s187_s4 = inlined_call_operand.vmem [shape: f32[1,8,32], index: 4, kind: output, shape index: {}]  }
   0x1   :  { %122 = vmatprep.subr.bf16.mxu0 %v134_v0  ;;  %v132_v1 = vld [vmem:[%s183_s1 + $0x8] sm:$0xff]   ;;  %126 = vmatprep.mubr.msk.bf16.mxu0 %vm135_vm1, %v134_v0  ;;  %23 = vst.msk [vmem:[#allocation2] sm:$0xff] %vm22_vm0, %v134_v0  ;;  %v133_v2 = vld [vmem:[%s183_s1] sm:$0xff]  }
   0x2   :  { %123 = vmatpush3.bf16.msra.mxu0 %v132_v1  ;;  %v25_v3 = vld [vmem:[%s184_s0] sm:$0xf] }
   0x3   :  { %124 = vmatprep.subr.bf16.mxu0 %v134_v0  ;;  %v117_v10 = vld [vmem:[%s185_s2] ss:$0 sm:$0xff] }
   0x4   :  { %v118_v12 = vld [vmem:[%s186_s3] ss:$0 sm:$0xff] }
   0x6   :  { %125 = vmatpush3.bf16.msra.mxu0 %v133_v2 }
   0x8   :  { %v24_v4 = vld [vmem:[#allocation2] sm:$0xff] }
   0x9   :  { %127 = vmatmul.mubr.msk.bf16.vlgmr.msra.gmra.mxu0 %vm22_vm0, %v25_v3 }
  0xc9   :  { %v80_v5 = vpop.f32.mrf.mxu0 }
  0xca   :  { %v86_v6 = vadd.f32 %v80_v5, %v24_v4 }
  0xcb   :  { %v128_v7 = vpop.f32.mrf.mxu0 }
  0xcc   :  { %87 = vst.msk [vmem:[#allocation2] sm:$0xff] %vm22_vm0, %v86_v6 }
  0xcd   :  { %v83_v8 = vpop.f32.mrf.mxu0 }
  0xcf   :  { %v129_v9 = vpop.f32.mrf.mxu0 }
  0xd3   :  { %v91_v11 = vld [vmem:[#allocation2] sm:$0xff] }
  0xd4   :  { %v99_v13 = vmul.f32 %v117_v10, %v91_v11 }
  0xd6   :  { %v107_v14 = vadd.f32 %v118_v12, %v99_v13 }
  0xd8   :  { %v108_v15 = vmax.f32 %v107_v14, 0.0 }
  0xda   :  { %109 = vst.msk [vmem:[%s187_s4] sm:$0xff] %vm22_vm0, %v108_v15 }

// kernel: aspp_forward.27
= control target key start
LH: loop header
LB: loop body
LE: loop exit
PB: predicated region body
PF: predicated region fallthrough
CT: control target
= control target key end

     0   :  { %14 = vsyncpa [#allocation3], 0  ;;  %s3865_s0 = inlined_call_operand.vmem [shape: bf16[2,256,32], index: 0, kind: input, shape index: {}]   ;;  %s3866_s1 = inlined_call_operand.vmem [shape: bf16[2,256,32], index: 1, kind: input, shape index: {}]   ;;  %s3867_s2 = inlined_call_operand.vmem [shape: bf16[2,256,32], index: 2, kind: input, shape index: {}]   ;;  %s3868_s3 = inlined_call_operand.vmem [shape: bf16[2,256,32], index: 3, kind: input, shape index: {}]   ;;  %s3869_s4 = inlined_call_operand.vmem [shape: f32[2,5,32], index: 4, kind: input, shape index: {}]   ;;  %s3870_s5 = inlined_call_operand.vmem [shape: f32[2,1,32], index: 5, kind: input, shape index: {}]   ;;  %s3871_s6 = inlined_call_operand.vmem [shape: bf16[2,5,32,32], index: 6, kind: input, shape index: {}]   ;;  %s3872_s7 = inlined_call_operand.vmem [shape: f32[1,32], index: 7, kind: input, shape index: {}]   ;;  %s3873_s8 = inlined_call_operand.vmem [shape: f32[1,32], index: 8, kind: input, shape index: {}]   ;;  %s3874_s9 = inlined_call_operand.hbm [shape: f32[2,256,32], index: 9, kind: output, shape index: {}]  }
   0x1   :  { %16 = vsyncpa [#allocation3 + $0x1], 0  ;;  %s3207_s30 = smov 0   ;;  %s3209_s10 = smov 0  }
   0x2   :  { %s3211_s11 = smov 0   ;;  %s3213_s12 = smov 0  }
   0x3   :  { %s3215_s13 = smov 0   ;;  %s3217_s14 = smov 0  }
   0x4 LB: > { %3880 = sst [smem:[#allocation5_spill]] %s3138_s11  ;;  %s2428_s15 = sadd.s32 4294967295, %s3150_s14   ;;  %s3150_s14 = sphi %s3217_s14, %s22_s14   ;;  %s3146_s13 = sphi %s3215_s13, %s3940_s13   ;;  %s3142_s12 = sphi %s3213_s12, %s3939_s12   ;;  %s3138_s11 = sphi %s3211_s11, %s3938_s11   ;;  %s3134_s10 = sphi %s3209_s10, %s3942_s10   ;;  %s3130_s30 = sphi %s3207_s30, %s3941_s30  }
   0x5   : > { %3881 = sst [smem:[#allocation6_spill]] %s3146_s13  ;;  %s2429_s16 = sadd.s32 4294967294, %s3150_s14  }
   0x6   : > { %s34_s17 = sadd.s32 1, %s3146_s13  ;;  %s270_s18 = sadd.s32 1, %s3138_s11 }
   0x7   : > { %p36_p0 = scmp.ge.s32.totalorder %s34_s17, 2  ;;  %p280_p1 = scmp.ne.s32.totalorder %s3138_s11, %s3134_s10 }
   0x8   : > { %p281_p2 = scmp.eq.s32.totalorder %s2428_s15, 1  ;;  %p286_p3 = scmp.ne.s32.totalorder %s3134_s10, %s3130_s30 }
   0x9   : > { %s3944_s17 = smov (%p36_p0, %s34_s17), 0  ;;  %p287_p5 = scmp.eq.s32.totalorder %s2429_s16, 1 }
   0xa   : > { %3882 = sst [smem:[#allocation7_spill]] %s3944_s17  ;;  %p3247_p4 = por %p281_p2, %p280_p1 }
   0xb   : > { %s265_s20 = ssub.s32 %s3146_s13, %s3944_s17  ;;  %p2432_p6 = scmp.ge.s32.totalorder %s3150_s14, 1 }
   0xc   : > { %p268_p7 = scmp.eq.s32.totalorder %s265_s20, 0  ;;  %p3254_p8 = por %p287_p5, %p286_p3 }
   0xd   : > { %p379_p9 = scmp.lt.s32.totalorder %s3150_s14, 3 }
   0xe   : > { %s3260_s22 = scalar_select %p268_p7, %s3138_s11, %s270_s18  }
   0xf   : > { %p380_p10 = pnand %p2432_p6, %p379_p9 }
  0x10   : > { %3885 = sst [smem:[#allocation8_spill]] %s3260_s22 }
  0x11   : > { %383 = sbr.rel (%p380_p10) target bundleno = 604 (0x25c), region = 56 }
  0x16   : > { %p454_p11 = scmp.lt.s32.totalorder %s3142_s12, 1  ;;  %vm513_vm0 = vcmask 258048   ;;  %vm733_vm1 = vcmask 261120   ;;  %v543_v15 = vlaneseq  ;;  %v3302_v17 = vld [vmem:[%s3871_s6 + $0x18] sm:$0xff]   ;;  %v2707_v18 = vld [vmem:[%s3871_s6 + $0x68] sm:$0xff]   ;;  %v2706_v20 = vld [vmem:[%s3871_s6 + $0x60] sm:$0xff]  }
  0x17   : > { %v2703_v19 = vld [vmem:[%s3871_s6 + $0x58] sm:$0xff]   ;;  %v2702_v21 = vld [vmem:[%s3871_s6 + $0x50] sm:$0xff]   ;;  %v2643_v22 = vunpack.c.l.bf16 %v3302_v17  ;;  %v2644_v23 = vunpack.c.h.bf16 %v3302_v17  ;;  %v2651_v24 = vunpack.c.l.bf16 %v2707_v18  ;;  %v2652_v25 = vunpack.c.h.bf16 %v2707_v18  ;;  %v2701_v26 = vld [vmem:[%s3871_s6 + $0x8] sm:$0xff]   ;;  %s450_s26 = sand.u32 1, %s3134_s10   ;;  %s2620_s15 = sshll.u32 %s3142_s12, 12 }
  0x18   : > { %s455_s23 = scalar_select %p454_p11, %s3142_s12, 1  ;;  %v3297_v16 = vshrl.u32 %v543_v15, 7  ;;  %v3324_v27 = vld [vmem:[%s3871_s6 + $0x78] sm:$0xff]   ;;  %v2635_v29 = vunpack.c.l.bf16 %v2703_v19  ;;  %v2704_v31 = vld [vmem:[%s3871_s6 + $0x10] sm:$0xff]   ;;  %v2622_v32 = vld [vmem:[%s3871_s6] sm:$0xff]   ;;  %v2636_v34 = vunpack.c.h.bf16 %v2703_v19  ;;  %v2647_v35 = vunpack.c.l.bf16 %v2706_v20 }
  0x19   : > { %v2648_v36 = vunpack.c.h.bf16 %v2706_v20  ;;  %v2631_v37 = vunpack.c.l.bf16 %v2702_v21  ;;  %v3338_v38 = vld [vmem:[%s3871_s6 + $0x28] sm:$0xff]   ;;  %v2627_v39 = vunpack.c.l.bf16 %v2701_v26  ;;  %v2632_v40 = vunpack.c.h.bf16 %v2702_v21  ;;  %v3348_v44 = vld [vmem:[%s3871_s6 + $0x70] sm:$0xff]   ;;  %v2713_v49 = vld [vmem:[%s3871_s6 + $0x38] sm:$0xff]   ;;  %s2433_s27 = sshll.u32 %s450_s26, 8  ;;  %s3786_s22 = scalar_lea.hbm %s3874_s9, %s2620_s15 }
  0x1a   : > { %s2616_s24 = sshll.u32 %s455_s23, 7  ;;  %s2442_s25 = sshll.u32 %s455_s23, 3  ;;  %3886 = vst [vmem:[#allocation9_spill] sm:$0xff] %v3297_v16  ;;  %v609_v28 = vsub.s32 1, %v3297_v16  ;;  %v3878_v30 = vsub.s32 0, %v3297_v16  ;;  %v1252_v33 = vsub.s32 2, %v3297_v16  ;;  %v2667_v41 = vunpack.c.l.bf16 %v3324_v27 }
  0x1b   : > { %s3267_s28 = scalar_lea.vmem %s3865_s0, %s2616_s24  ;;  %s3272_s16 = scalar_lea.vmem %s3866_s1, %s2616_s24  ;;  %v2668_v42 = vunpack.c.h.bf16 %v3324_v27  ;;  %v2715_v43 = vld [vmem:[%s3871_s6 + $0x88] sm:$0xff]   ;;  %v2628_v45 = vunpack.c.h.bf16 %v2701_v26  ;;  %v2639_v46 = vunpack.c.l.bf16 %v2704_v31  ;;  %v2640_v47 = vunpack.c.h.bf16 %v2704_v31  ;;  %v3356_v50 = vld [vmem:[%s3871_s6 + $0x20] sm:$0xff]  }
  0x1c   : > { %s496_s17 = scalar_lea.vmem %s3869_s4, %s2442_s25  ;;  %s499_s11 = scalar_lea.vmem %s3870_s5, %s455_s23  ;;  %v3006_v6 = vld [vmem:[%s3272_s16] sm:$0xff]   ;;  %v2623_v48 = vunpack.c.l.bf16 %v2622_v32  ;;  %v2624_v51 = vunpack.c.h.bf16 %v2622_v32  ;;  %v2659_v52 = vunpack.c.l.bf16 %v3338_v38  ;;  %v1637_v53 = vsub.s32 3, %v3297_v16 }
  0x1d   : > { %v3280_v0 = vld [vmem:[%s496_s17] sm:$0x1f]  ;;  %s3286_s29 = scalar_lea.vmem %s3867_s2, %s2616_s24  ;;  %s3291_s13 = scalar_lea.vmem %s3868_s3, %s2616_s24  ;;  %2799 = vmatprep.mubr.msk.bf16.mxu0 %vm733_vm1, %v3006_v6  ;;  %v2023_v55 = vsub.s32 4, %v3297_v16  ;;  %v2660_v56 = vunpack.c.h.bf16 %v3338_v38  ;;  %v2683_v57 = vunpack.c.l.bf16 %v2715_v43  ;;  %v2684_v58 = vunpack.c.h.bf16 %v2715_v43 }
  0x1e   : > { %v2443_v1 = vld [vmem:[%s499_s11] ss:$0 sm:$0xff]  ;;  %v2663_v59 = vunpack.c.l.bf16 %v3348_v44  ;;  %v2675_v61 = vunpack.c.l.bf16 %v2713_v49  ;;  %v2676_v62 = vunpack.c.h.bf16 %v2713_v49  ;;  %v2655_v63 = vunpack.c.l.bf16 %v3356_v50  ;;  %v3008_v49 = vld [vmem:[%s3272_s16 + $0x8] sm:$0xff]   ;;  %s3727_s25 = scalar_lea.vmem [#allocation2], %s2433_s27  ;;  %s3820_s23 = scalar_lea.sflag [#allocation3], %s450_s26 }
  0x1f   : > { %v510_v2 = vsub.f32 %v3280_v0, %v2443_v1  ;;  %v3007_v7 = vld [vmem:[%s3267_s28] sm:$0xff]   ;;  %v2664_v1 = vunpack.c.h.bf16 %v3348_v44  ;;  %vm3153_vm4 = vmmov 0   ;;  %s2274_s11 = sshll.u32 %s3727_s25, 4  ;;  %s3788_s11 = int_to_ptr.vmem [resolvable:$true] %s2274_s11 }
  0x20   : > { %2835 = vmatprep.mubr.msk.bf16.mxu1 %vm733_vm1, %v3007_v7  ;;  %v2714_v54 = vld [vmem:[%s3871_s6 + $0x80] sm:$0xff]   ;;  %s3074_s24 = scalar_lea.vmem %s3788_s11, 4096 }
  0x21   : > { %v511_v3 = vadd.f32 1e-06, %v510_v2  ;;  %p3075_p12 = scmp.ne.s32.totalorder %s3788_s11, %s3074_s24 }
  0x23   : > { %v512_v4 = vmul.f32 %v511_v3, %v511_v3  ;;  %p3076_p13 = pnand %p3075_p12, %p3247_p4 }
  0x25   : > { %v514_v5 = vsel %vm513_vm0, %v512_v4, 0.0  ;;  %v2656_v4 = vunpack.c.h.bf16 %v3356_v50  ;;  %v3009_v50 = vld [vmem:[%s3267_s28 + $0x8] sm:$0xff]   ;;  %p3077_p0 = pneg %p3076_p13 }
  0x26   : > { %515 = vadd.xlane.f32.xlu0 %v514_v5  ;;  %v2679_v5 = vunpack.c.l.bf16 %v2714_v54 }
  0xaf   : > { %v516_v8 = vpop.xlane.xlu0 %515 }
  0xb0   : > { %3070 = vrsqrt.f32 %v516_v8  ;;  %vm519_vm2 = vcmp.eq.f32.partialorder %v516_v8, inf  ;;  %v522_v11 = vand.u32 2147483648, %v516_v8  ;;  %vm521_vm3 = vcmp.eq.f32.partialorder %v516_v8, 0.0 }
  0xbd   : > { %v3071_v9 = vpop.eup %3070 }
  0xbe   : > { %v518_v10 = vmul.f32 %v3071_v9, %v516_v8 }
  0xc0   : > { %v520_v12 = vsel %vm519_vm2, %v516_v8, %v518_v10  ;;  %v2680_v8 = vunpack.c.h.bf16 %v2714_v54 }
  0xc1   : > { %v523_v13 = vsel %vm521_vm3, %v522_v11, %v520_v12 }
  0xc2   : > { %v524_v14 = vadd.f32 1.0, %v523_v13 }
  0xc4   : > { %3072 = vrcp.f32 %v524_v14 }
  0xd1   : > { %v3073_v60 = vpop.eup %3072 }
  0xd2   : > { %v610_v2 = vrot.slane %v3073_v60, %v609_v28  ;;  %v546_v3 = vrot.slane %v3073_v60, %v3878_v30  ;;  %v1253_v6 = vrot.slane %v3073_v60, %v1252_v33  ;;  %v1638_v7 = vrot.slane %v3073_v60, %v1637_v53  ;;  %v2712_v33 = vld [vmem:[%s3871_s6 + $0x30] sm:$0xff]  }
  0xd3   : > { %v3371_v9 = vrot.slane %v3073_v60, %v2023_v55  ;;  %v3010_v55 = vld [vmem:[%s3272_s16 + $0x10] sm:$0xff]   ;;  %v3013_v60 = vld [vmem:[%s3267_s28 + $0x18] sm:$0xff]  }
  0xd4   : > { %v613_v10 = vmul.f32 %v2651_v24, %v610_v2  ;;  %v614_v11 = vmul.f32 %v2652_v25, %v610_v2  ;;  %v549_v12 = vmul.f32 %v2635_v29, %v546_v3  ;;  %v550_v13 = vmul.f32 %v2636_v34, %v546_v3 }
  0xd5   : > { %v611_v14 = vmul.f32 %v2647_v35, %v610_v2  ;;  %v612_v15 = vmul.f32 %v2648_v36, %v610_v2  ;;  %v547_v17 = vmul.f32 %v2631_v37, %v546_v3  ;;  %v548_v18 = vmul.f32 %v2632_v40, %v546_v3  ;;  %v3017_v2 = vld [vmem:[%s3267_s28 + $0x28] sm:$0xff]   ;;  %v3018_v3 = vld [vmem:[%s3272_s16 + $0x30] sm:$0xff]  }
  0xd6   : > { %v617_v19 = vadd.f32 %v2643_v22, %v613_v10  ;;  %v618_v20 = vadd.f32 %v2644_v23, %v614_v11  ;;  %v553_v21 = vadd.f32 %v2627_v39, %v549_v12  ;;  %v554_v26 = vadd.f32 %v2628_v45, %v550_v13  ;;  %v3024_v10 = vld [vmem:[%s3272_s16 + $0x48] sm:$0xff]   ;;  %v3026_v12 = vld [vmem:[%s3272_s16 + $0x50] sm:$0xff]  }
  0xd7   : > { %v615_v27 = vadd.f32 %v2639_v46, %v611_v14  ;;  %v616_v28 = vadd.f32 %v2640_v47, %v612_v15  ;;  %v551_v31 = vadd.f32 %v2623_v48, %v547_v17  ;;  %v552_v32 = vadd.f32 %v2624_v51, %v548_v18  ;;  %v3025_v11 = vld [vmem:[%s3267_s28 + $0x48] sm:$0xff]   ;;  %v3027_v13 = vld [vmem:[%s3267_s28 + $0x50] sm:$0xff]   ;;  %v3028_v14 = vld [vmem:[%s3272_s16 + $0x58] sm:$0xff]  }
  0xd8   : > { %v620_v24 = vpack.c.bf16 %v618_v20, %v617_v19  ;;  %v556_v25 = vpack.c.bf16 %v554_v26, %v553_v21  ;;  %v1256_v29 = vmul.f32 %v2667_v41, %v1253_v6  ;;  %v1257_v34 = vmul.f32 %v2668_v42, %v1253_v6  ;;  %v3029_v15 = vld [vmem:[%s3267_s28 + $0x58] sm:$0xff]   ;;  %v3030_v17 = vld [vmem:[%s3272_s16 + $0x60] sm:$0xff]   ;;  %v3032_v19 = vld [vmem:[%s3272_s16 + $0x68] sm:$0xff]  }
  0xd9   : > { %v619_v35 = vpack.c.bf16 %v616_v28, %v615_v27  ;;  %v555_v36 = vpack.c.bf16 %v552_v32, %v551_v31  ;;  %v1641_v37 = vmul.f32 %v2683_v57, %v1638_v7  ;;  %v1642_v38 = vmul.f32 %v2684_v58, %v1638_v7  ;;  %v3031_v18 = vld [vmem:[%s3267_s28 + $0x60] sm:$0xff]   ;;  %v3033_v20 = vld [vmem:[%s3267_s28 + $0x68] sm:$0xff]   ;;  %v3034_v21 = vld [vmem:[%s3272_s16 + $0x70] sm:$0xff]  }
  0xda   : > { %2795 = vmatprep.subr.bf16.mxu0 %v620_v24  ;;  %2831 = vmatprep.subr.bf16.mxu1 %v556_v25  ;;  %v1260_v22 = vadd.f32 %v2659_v52, %v1256_v29  ;;  %v1261_v23 = vadd.f32 %v2660_v56, %v1257_v34  ;;  %v1254_v39 = vmul.f32 %v2663_v59, %v1253_v6  ;;  %v2671_v40 = vunpack.c.l.bf16 %v2712_v33  ;;  %v3011_v56 = vld [vmem:[%s3267_s28 + $0x10] sm:$0xff]   ;;  %v3012_v59 = vld [vmem:[%s3272_s16 + $0x18] sm:$0xff]   ;;  %v3038_v29 = vld [vmem:[%s3286_s29] sm:$0xff]  }
  0xdb   : > { %2796 = vmatpush3.bf16.msra.mxu0 %v620_v24  ;;  %2832 = vmatpush3.bf16.msra.mxu1 %v556_v25  ;;  %v1645_v43 = vadd.f32 %v2675_v61, %v1641_v37  ;;  %v1646_v44 = vadd.f32 %v2676_v62, %v1642_v38  ;;  %v1255_v45 = vmul.f32 %v2664_v1, %v1253_v6  ;;  %v2672_v46 = vunpack.c.h.bf16 %v2712_v33  ;;  %v3014_v61 = vld [vmem:[%s3272_s16 + $0x20] sm:$0xff]   ;;  %v3016_v1 = vld [vmem:[%s3272_s16 + $0x28] sm:$0xff]   ;;  %v3021_v6 = vld [vmem:[%s3267_s28 + $0x38] sm:$0xff]  }
  0xdc   : > { %2797 = vmatprep.subr.bf16.mxu0 %v619_v35  ;;  %2833 = vmatprep.subr.bf16.mxu1 %v555_v36  ;;  %v1639_v41 = vmul.f32 %v2679_v5, %v1638_v7  ;;  %v1263_v42 = vpack.c.bf16 %v1261_v23, %v1260_v22  ;;  %v1640_v47 = vmul.f32 %v2680_v8, %v1638_v7  ;;  %v3015_v62 = vld [vmem:[%s3267_s28 + $0x20] sm:$0xff]   ;;  %v3020_v5 = vld [vmem:[%s3272_s16 + $0x38] sm:$0xff]   ;;  %v3035_v26 = vld [vmem:[%s3267_s28 + $0x70] sm:$0xff]  }
  0xdd   : > { %v1648_v48 = vpack.c.bf16 %v1646_v44, %v1645_v43  ;;  %v1258_v51 = vadd.f32 %v2655_v63, %v1254_v39  ;;  %v1259_v52 = vadd.f32 %v2656_v4, %v1255_v45  ;;  %v3152_v63 = vmov 0.0   ;;  %v3019_v4 = vld [vmem:[%s3267_s28 + $0x30] sm:$0xff]   ;;  %v3022_v7 = vld [vmem:[%s3272_s16 + $0x40] sm:$0xff]   ;;  %v2719_v27 = vld [vmem:[%s3871_s6 + $0x98] sm:$0xff]  }
  0xde   : > { %v1643_v53 = vadd.f32 %v2671_v40, %v1639_v41  ;;  %v1644_v54 = vadd.f32 %v2672_v46, %v1640_v47  ;;  %v3023_v8 = vld [vmem:[%s3267_s28 + $0x40] sm:$0xff]   ;;  %v2699_v28 = vunpack.c.l.bf16 %v2719_v27  ;;  %v2700_v31 = vunpack.c.h.bf16 %v2719_v27  ;;  %v2718_v32 = vld [vmem:[%s3871_s6 + $0x90] sm:$0xff]   ;;  %v3036_v33 = vld [vmem:[%s3272_s16 + $0x78] sm:$0xff]   ;;  %s3154_s16 = smov [#allocation2]  }
  0xdf   : > { %2798 = vmatpush3.bf16.msra.mxu0 %v619_v35  ;;  %2834 = vmatpush3.bf16.msra.mxu1 %v555_v36  ;;  %v1262_v57 = vpack.c.bf16 %v1259_v52, %v1258_v51  ;;  %v3037_v24 = vld [vmem:[%s3267_s28 + $0x78] sm:$0xff]   ;;  %v2717_v25 = vld [vmem:[%s3871_s6 + $0x48] sm:$0xff]   ;;  %v3039_v34 = vld [vmem:[%s3291_s13] sm:$0xff]   ;;  %v2695_v35 = vunpack.c.l.bf16 %v2718_v32  ;;  %v2696_v36 = vunpack.c.h.bf16 %v2718_v32  ;;  %s3078_s28 = sshll.u32 %s3154_s16, 4  ;;  %s3079_s28 = int_to_ptr.vmem [resolvable:$false] %s3078_s28 }
  0xe0   : > { %2867 = vmatprep.subr.bf16.mxu0 %v1263_v42  ;;  %2903 = vmatprep.subr.bf16.mxu1 %v1648_v48  ;;  %v1647_v58 = vpack.c.bf16 %v1644_v54, %v1643_v53  ;;  %v2691_v37 = vunpack.c.l.bf16 %v2717_v25  ;;  %v2692_v38 = vunpack.c.h.bf16 %v2717_v25  ;;  %v2027_v22 = vmul.f32 %v2699_v28, %v3371_v9  ;;  %v2716_v39 = vld [vmem:[%s3871_s6 + $0x40] sm:$0xff]   ;;  %v3041_v47 = vld [vmem:[%s3291_s13 + $0x8] sm:$0xff]   ;;  %v3044_v53 = vld [vmem:[%s3286_s29 + $0x18] sm:$0xff]   ;;  %p3081_p1 = scmp.lt.s32.totalorder %s3788_s11, %s3079_s28 }
  0xe1   : > { %v2028_v23 = vmul.f32 %v2700_v31, %v3371_v9  ;;  %v2687_v40 = vunpack.c.l.bf16 %v2716_v39  ;;  %v2688_v43 = vunpack.c.h.bf16 %v2716_v39  ;;  %v2025_v46 = vmul.f32 %v2695_v35, %v3371_v9  ;;  %v3045_v54 = vld [vmem:[%s3291_s13 + $0x18] sm:$0xff]  }
  0xe2   : > { %2800 = vmatmul.mubr.msk.bf16.vlgmr.msra.gmra.mxu0 %vm733_vm1, %v3008_v49  ;;  %2836 = vmatmul.mubr.msk.bf16.vlgmr.msra.gmra.mxu1 %vm733_vm1, %v3009_v50  ;;  %v2031_v44 = vadd.f32 %v2691_v37, %v2027_v22  ;;  %v2026_v41 = vmul.f32 %v2696_v36, %v3371_v9  ;;  %v3043_v49 = vld [vmem:[%s3291_s13 + $0x10] sm:$0xff]  }
  0xe3   : > { %2868 = vmatpush3.bf16.msra.mxu0 %v1263_v42  ;;  %2904 = vmatpush3.bf16.msra.mxu1 %v1648_v48  ;;  %v2032_v45 = vadd.f32 %v2692_v38, %v2028_v23  ;;  %v3040_v42 = vld [vmem:[%s3286_s29 + $0x8] sm:$0xff]   ;;  %v3042_v48 = vld [vmem:[%s3286_s29 + $0x10] sm:$0xff]   ;;  %v2029_v51 = vadd.f32 %v2687_v40, %v2025_v46 }
  0xe4   : > { %2869 = vmatprep.subr.bf16.mxu0 %v1262_v57  ;;  %2905 = vmatprep.subr.bf16.mxu1 %v1647_v58  ;;  %v2030_v52 = vadd.f32 %v2688_v43, %v2026_v41 }
  0xe5   : > { %2803 = vmatprep.mubr.msk.bf16.mxu0 %vm733_vm1, %v3010_v55  ;;  %2839 = vmatprep.mubr.msk.bf16.mxu1 %vm733_vm1, %v3011_v56  ;;  %v2034_v50 = vpack.c.bf16 %v2032_v45, %v2031_v44  ;;  %v3046_v55 = vld [vmem:[%s3286_s29 + $0x20] sm:$0xff]  }
  0xe6   : > { %v2033_v9 = vpack.c.bf16 %v2030_v52, %v2029_v51  ;;  %v3047_v56 = vld [vmem:[%s3291_s13 + $0x20] sm:$0xff]  }
  0xe7   : > { %2870 = vmatpush3.bf16.msra.mxu0 %v1262_v57  ;;  %2906 = vmatpush3.bf16.msra.mxu1 %v1647_v58  ;;  %v3048_v57 = vld [vmem:[%s3286_s29 + $0x28] sm:$0xff]  }
  0xe8   : > { %2939 = vmatprep.subr.bf16.mxu0 %v3152_v63  ;;  %v3049_v58 = vld [vmem:[%s3291_s13 + $0x28] sm:$0xff]  }
  0xea   : > { %2804 = vmatmul.mubr.msk.bf16.gmra.mxu0 %vm733_vm1, %v3012_v59  ;;  %2840 = vmatmul.mubr.msk.bf16.gmra.mxu1 %vm733_vm1, %v3013_v60  ;;  %v3050_v59 = vld [vmem:[%s3286_s29 + $0x30] sm:$0xff]  }
  0xeb   : > { %2807 = vmatprep.mubr.msk.bf16.mxu0 %vm733_vm1, %v3014_v61  ;;  %2843 = vmatprep.mubr.msk.bf16.mxu1 %vm733_vm1, %v3015_v62  ;;  %v3051_v60 = vld [vmem:[%s3291_s13 + $0x30] sm:$0xff]   ;;  %v3052_v61 = vld [vmem:[%s3286_s29 + $0x38] sm:$0xff]  }
  0xec   : > { %v3053_v62 = vld [vmem:[%s3291_s13 + $0x38] sm:$0xff]  }
  0xf2   : > { %2808 = vmatmul.mubr.msk.bf16.gmra.mxu0 %vm733_vm1, %v3016_v1  ;;  %2844 = vmatmul.mubr.msk.bf16.gmra.mxu1 %vm733_vm1, %v3017_v2  ;;  %v3054_v1 = vld [vmem:[%s3286_s29 + $0x40] sm:$0xff]  }
  0xf3   : > { %2811 = vmatprep.mubr.msk.bf16.mxu0 %vm733_vm1, %v3018_v3  ;;  %2847 = vmatprep.mubr.msk.bf16.mxu1 %vm733_vm1, %v3019_v4  ;;  %v3055_v2 = vld [vmem:[%s3291_s13 + $0x40] sm:$0xff]   ;;  %v3056_v3 = vld [vmem:[%s3286_s29 + $0x48] sm:$0xff]  }
  0xf4   : > { %v3057_v4 = vld [vmem:[%s3291_s13 + $0x48] sm:$0xff]  }
  0xfa   : > { %2812 = vmatmul.mubr.msk.bf16.gmra.mxu0 %vm733_vm1, %v3020_v5  ;;  %2848 = vmatmul.mubr.msk.bf16.gmra.mxu1 %vm733_vm1, %v3021_v6  ;;  %v3058_v5 = vld [vmem:[%s3286_s29 + $0x50] sm:$0xff]  }
  0xfb   : > { %2815 = vmatprep.mubr.msk.bf16.mxu0 %vm733_vm1, %v3022_v7  ;;  %2851 = vmatprep.mubr.msk.bf16.mxu1 %vm733_vm1, %v3023_v8  ;;  %v3059_v6 = vld [vmem:[%s3291_s13 + $0x50] sm:$0xff]   ;;  %v3060_v7 = vld [vmem:[%s3286_s29 + $0x58] sm:$0xff]  }
  0xfc   : > { %v3061_v8 = vld [vmem:[%s3291_s13 + $0x58] sm:$0xff]  }
 0x102   : > { %2816 = vmatmul.mubr.msk.bf16.gmra.mxu0 %vm733_vm1, %v3024_v10  ;;  %2852 = vmatmul.mubr.msk.bf16.gmra.mxu1 %vm733_vm1, %v3025_v11  ;;  %v3062_v10 = vld [vmem:[%s3286_s29 + $0x60] sm:$0xff]  }
 0x103   : > { %2819 = vmatprep.mubr.msk.bf16.mxu0 %vm733_vm1, %v3026_v12  ;;  %2855 = vmatprep.mubr.msk.bf16.mxu1 %vm733_vm1, %v3027_v13  ;;  %v3063_v11 = vld [vmem:[%s3291_s13 + $0x60] sm:$0xff]   ;;  %v3064_v12 = vld [vmem:[%s3286_s29 + $0x68] sm:$0xff]  }
 0x104   : > { %v3065_v13 = vld [vmem:[%s3291_s13 + $0x68] sm:$0xff]  }
 0x10a   : > { %2820 = vmatmul.mubr.msk.bf16.gmra.mxu0 %vm733_vm1, %v3028_v14  ;;  %2856 = vmatmul.mubr.msk.bf16.gmra.mxu1 %vm733_vm1, %v3029_v15  ;;  %v3066_v14 = vld [vmem:[%s3286_s29 + $0x70] sm:$0xff]  }
 0x10b   : > { %2823 = vmatprep.mubr.msk.bf16.mxu0 %vm733_vm1, %v3030_v17  ;;  %2859 = vmatprep.mubr.msk.bf16.mxu1 %vm733_vm1, %v3031_v18  ;;  %v3067_v15 = vld [vmem:[%s3291_s13 + $0x70] sm:$0xff]   ;;  %v3068_v17 = vld [vmem:[%s3286_s29 + $0x78] sm:$0xff]   ;;  %s3080_s29 = scalar_lea.vmem %s3079_s28, 8192 }
 0x10c   : > { %v3069_v18 = vld [vmem:[%s3291_s13 + $0x78] sm:$0xff]   ;;  %p3082_p2 = scmp.lt.s32.totalorder %s3080_s29, %s3074_s24 }
 0x10e   : > { %p3083_p3 = por %p3082_p2, %p3081_p1 }
 0x110   : > { %p3084_p5 = pnand %p3083_p3, %p3077_p0 }
 0x112   : > { %2824 = vmatmul.mubr.msk.bf16.gmra.mxu0 %vm733_vm1, %v3032_v19  ;;  %2860 = vmatmul.mubr.msk.bf16.gmra.mxu1 %vm733_vm1, %v3033_v20  ;;  %v2002_v19 = vpack.c.bf16 %v3280_v0, %v3280_v0 }
 0x113   : > { %2827 = vmatprep.mubr.msk.bf16.mxu0 %vm733_vm1, %v3034_v21  ;;  %2863 = vmatprep.mubr.msk.bf16.mxu1 %vm733_vm1, %v3035_v26 }
 0x114   : > { %v2036_v20 = vrot.slane %v2002_v19, 2 }
 0x11a   : > { %2828 = vmatmul.mubr.msk.bf16.gmra.mxu0 %vm733_vm1, %v3036_v33  ;;  %2864 = vmatmul.mubr.msk.bf16.gmra.mxu1 %vm733_vm1, %v3037_v24 }
 0x11b   : > { %2871 = vmatprep.mubr.msk.bf16.mxu0 %vm733_vm1, %v3038_v29  ;;  %2907 = vmatprep.mubr.msk.bf16.mxu1 %vm733_vm1, %v3039_v34 }
 0x122   : > { %2872 = vmatmul.mubr.msk.bf16.vlgmr.msra.gmra.mxu0 %vm733_vm1, %v3040_v42  ;;  %2908 = vmatmul.mubr.msk.bf16.vlgmr.msra.gmra.mxu1 %vm733_vm1, %v3041_v47 }
 0x123   : > { %2940 = vmatpush3.bf16.msra.mxu0 %v2034_v50  ;;  %2875 = vmatprep.mubr.msk.bf16.mxu0 %vm733_vm1, %v3042_v48 }
 0x124   : > { %2941 = vmatprep.subr.bf16.mxu0 %v3152_v63  ;;  %2911 = vmatprep.mubr.msk.bf16.mxu1 %vm733_vm1, %v3043_v49 }
 0x127   : > { %2942 = vmatpush3.bf16.msra.mxu0 %v2033_v9 }
 0x12a   : > { %2876 = vmatmul.mubr.msk.bf16.gmra.mxu0 %vm733_vm1, %v3044_v53  ;;  %2912 = vmatmul.mubr.msk.bf16.gmra.mxu1 %vm733_vm1, %v3045_v54 }
 0x12b   : > { %2879 = vmatprep.mubr.msk.bf16.mxu0 %vm733_vm1, %v3046_v55  ;;  %2915 = vmatprep.mubr.msk.bf16.mxu1 %vm733_vm1, %v3047_v56 }
 0x132   : > { %2880 = vmatmul.mubr.msk.bf16.gmra.mxu0 %vm733_vm1, %v3048_v57  ;;  %2916 = vmatmul.mubr.msk.bf16.gmra.mxu1 %vm733_vm1, %v3049_v58 }
 0x133   : > { %2883 = vmatprep.mubr.msk.bf16.mxu0 %vm733_vm1, %v3050_v59  ;;  %2919 = vmatprep.mubr.msk.bf16.mxu1 %vm733_vm1, %v3051_v60 }
 0x13a   : > { %2884 = vmatmul.mubr.msk.bf16.gmra.mxu0 %vm733_vm1, %v3052_v61  ;;  %2920 = vmatmul.mubr.msk.bf16.gmra.mxu1 %vm733_vm1, %v3053_v62 }
 0x13b   : > { %2887 = vmatprep.mubr.msk.bf16.mxu0 %vm733_vm1, %v3054_v1  ;;  %2923 = vmatprep.mubr.msk.bf16.mxu1 %vm733_vm1, %v3055_v2 }
 0x142   : > { %2888 = vmatmul.mubr.msk.bf16.gmra.mxu0 %vm733_vm1, %v3056_v3  ;;  %2924 = vmatmul.mubr.msk.bf16.gmra.mxu1 %vm733_vm1, %v3057_v4 }
 0x143   : > { %2891 = vmatprep.mubr.msk.bf16.mxu0 %vm733_vm1, %v3058_v5  ;;  %2927 = vmatprep.mubr.msk.bf16.mxu1 %vm733_vm1, %v3059_v6 }
 0x14a   : > { %2892 = vmatmul.mubr.msk.bf16.gmra.mxu0 %vm733_vm1, %v3060_v7  ;;  %2928 = vmatmul.mubr.msk.bf16.gmra.mxu1 %vm733_vm1, %v3061_v8 }
 0x14b   : > { %2895 = vmatprep.mubr.msk.bf16.mxu0 %vm733_vm1, %v3062_v10  ;;  %2931 = vmatprep.mubr.msk.bf16.mxu1 %vm733_vm1, %v3063_v11 }
 0x152   : > { %2896 = vmatmul.mubr.msk.bf16.gmra.mxu0 %vm733_vm1, %v3064_v12  ;;  %2932 = vmatmul.mubr.msk.bf16.gmra.mxu1 %vm733_vm1, %v3065_v13 }
 0x153   : > { %2899 = vmatprep.mubr.msk.bf16.mxu0 %vm733_vm1, %v3066_v14  ;;  %2935 = vmatprep.mubr.msk.bf16.mxu1 %vm733_vm1, %v3067_v15 }
 0x15a   : > { %2900 = vmatmul.mubr.msk.bf16.gmra.mxu0 %vm733_vm1, %v3068_v17  ;;  %2936 = vmatmul.mubr.msk.bf16.gmra.mxu1 %vm733_vm1, %v3069_v18 }
 0x15b   : > { %2943 = vmatprep.mubr.msk.bf16.mxu0 %vm3153_vm4, %v3152_v63 }
 0x162   : > { %2944 = vmatmul.mubr.msk.bf16.vlgmr.msra.gmra.mxu0 %vm733_vm1, %v2036_v20 }
 0x1a2   : > { %v2801_v21 = vpop.f32.mrf.mxu0  ;;  %v2837_v26 = vpop.f32.mrf.mxu1 }
 0x1a3   : > { %v3522_v27 = vadd.f32 %v2837_v26, %v2801_v21 }
 0x1a4   : > { %v816_v28 = vpop.f32.mrf.mxu0  ;;  %v1105_v31 = vpop.f32.mrf.mxu1 }
 0x1a5   : > { %v3524_v32 = vadd.f32 %v1105_v31, %v816_v28 }
 0x1a6   : > { %v2802_v33 = vpop.f32.mrf.mxu0  ;;  %v2838_v0 = vpop.f32.mrf.mxu1 }
 0x1a7   : > { %v3526_v24 = vadd.f32 %v2838_v0, %v2802_v33 }
 0x1a8   : > { %v819_v25 = vpop.f32.mrf.mxu0  ;;  %v1108_v29 = vpop.f32.mrf.mxu1 }
 0x1a9   : > { %v3528_v34 = vadd.f32 %v1108_v29, %v819_v25 }
 0x1aa   : > { %v2805_v63 = vpop.f32.mrf.mxu0  ;;  %v2841_v35 = vpop.f32.mrf.mxu1 }
 0x1ab   : > { %v3530_v36 = vadd.f32 %v2841_v35, %v2805_v63 }
 0x1ac   : > { %v832_v37 = vpop.f32.mrf.mxu0  ;;  %v1121_v38 = vpop.f32.mrf.mxu1 }
 0x1ad   : > { %v3532_v22 = vadd.f32 %v1121_v38, %v832_v37 }
 0x1ae   : > { %v2806_v23 = vpop.f32.mrf.mxu0  ;;  %v2842_v39 = vpop.f32.mrf.mxu1 }
 0x1af   : > { %v3534_v40 = vadd.f32 %v2842_v39, %v2806_v23 }
 0x1b0   : > { %v835_v43 = vpop.f32.mrf.mxu0  ;;  %v1124_v44 = vpop.f32.mrf.mxu1 }
 0x1b1   : > { %v3536_v45 = vadd.f32 %v1124_v44, %v835_v43 }
 0x1b2   : > { %v2809_v46 = vpop.f32.mrf.mxu0  ;;  %v2845_v41 = vpop.f32.mrf.mxu1 }
 0x1b3   : > { %v3538_v42 = vadd.f32 %v2845_v41, %v2809_v46 }
 0x1b4   : > { %v848_v47 = vpop.f32.mrf.mxu0  ;;  %v1137_v48 = vpop.f32.mrf.mxu1 }
 0x1b5   : > { %v3540_v49 = vadd.f32 %v1137_v48, %v848_v47 }
 0x1b6   : > { %v2810_v50 = vpop.f32.mrf.mxu0  ;;  %v2846_v51 = vpop.f32.mrf.mxu1 }
 0x1b7   : > { %v3542_v52 = vadd.f32 %v2846_v51, %v2810_v50 }
 0x1b8   : > { %v851_v9 = vpop.f32.mrf.mxu0  ;;  %v1140_v53 = vpop.f32.mrf.mxu1 }
 0x1b9   : > { %v3544_v54 = vadd.f32 %v1140_v53, %v851_v9 }
 0x1ba   : > { %v2813_v55 = vpop.f32.mrf.mxu0  ;;  %v2849_v56 = vpop.f32.mrf.mxu1 }
 0x1bb   : > { %v3546_v57 = vadd.f32 %v2849_v56, %v2813_v55 }
 0x1bc   : > { %v864_v58 = vpop.f32.mrf.mxu0  ;;  %v1153_v59 = vpop.f32.mrf.mxu1 }
 0x1bd   : > { %v3548_v60 = vadd.f32 %v1153_v59, %v864_v58 }
 0x1be   : > { %v2814_v61 = vpop.f32.mrf.mxu0  ;;  %v2850_v62 = vpop.f32.mrf.mxu1 }
 0x1bf   : > { %v3550_v1 = vadd.f32 %v2850_v62, %v2814_v61 }
 0x1c0   : > { %v867_v2 = vpop.f32.mrf.mxu0  ;;  %v1156_v3 = vpop.f32.mrf.mxu1 }
 0x1c1   : > { %v3552_v4 = vadd.f32 %v1156_v3, %v867_v2 }
 0x1c2   : > { %v2817_v5 = vpop.f32.mrf.mxu0  ;;  %v2853_v6 = vpop.f32.mrf.mxu1 }
 0x1c3   : > { %v3554_v7 = vadd.f32 %v2853_v6, %v2817_v5 }
 0x1c4   : > { %v880_v8 = vpop.f32.mrf.mxu0  ;;  %v1169_v10 = vpop.f32.mrf.mxu1 }
 0x1c5   : > { %3887 = vst [vmem:[#allocation10_spill] sm:$0xff] %v3554_v7  ;;  %v3556_v11 = vadd.f32 %v1169_v10, %v880_v8 }
 0x1c6   : > { %v2818_v12 = vpop.f32.mrf.mxu0  ;;  %v2854_v13 = vpop.f32.mrf.mxu1 }
 0x1c7   : > { %3888 = vst [vmem:[#allocation11_spill] sm:$0xff] %v3556_v11  ;;  %v3558_v14 = vadd.f32 %v2854_v13, %v2818_v12 }
 0x1c8   : > { %v883_v15 = vpop.f32.mrf.mxu0  ;;  %v1172_v17 = vpop.f32.mrf.mxu1 }
 0x1c9   : > { %3889 = vst [vmem:[#allocation12_spill] sm:$0xff] %v3558_v14  ;;  %v3560_v18 = vadd.f32 %v1172_v17, %v883_v15 }
 0x1ca   : > { %v2821_v19 = vpop.f32.mrf.mxu0  ;;  %v2857_v20 = vpop.f32.mrf.mxu1 }
 0x1cb   : > { %3890 = vst [vmem:[#allocation13_spill] sm:$0xff] %v3560_v18  ;;  %v3562_v21 = vadd.f32 %v2857_v20, %v2821_v19 }
 0x1cc   : > { %v896_v26 = vpop.f32.mrf.mxu0  ;;  %v1185_v28 = vpop.f32.mrf.mxu1 }
 0x1cd   : > { %3891 = vst [vmem:[#allocation14_spill] sm:$0xff] %v3562_v21  ;;  %v3564_v31 = vadd.f32 %v1185_v28, %v896_v26 }
 0x1ce   : > { %v2822_v33 = vpop.f32.mrf.mxu0  ;;  %v2858_v0 = vpop.f32.mrf.mxu1 }
 0x1cf   : > { %3892 = vst [vmem:[#allocation15_spill] sm:$0xff] %v3564_v31  ;;  %v3566_v25 = vadd.f32 %v2858_v0, %v2822_v33 }
 0x1d0   : > { %v899_v29 = vpop.f32.mrf.mxu0  ;;  %v1188_v63 = vpop.f32.mrf.mxu1 }
 0x1d1   : > { %3893 = vst [vmem:[#allocation16_spill] sm:$0xff] %v3566_v25  ;;  %v3568_v35 = vadd.f32 %v1188_v63, %v899_v29 }
 0x1d2   : > { %v2825_v37 = vpop.f32.mrf.mxu0  ;;  %v2861_v38 = vpop.f32.mrf.mxu1 }
 0x1d3   : > { %3894 = vst [vmem:[#allocation17_spill] sm:$0xff] %v3568_v35  ;;  %v3570_v23 = vadd.f32 %v2861_v38, %v2825_v37 }
 0x1d4   : > { %v912_v39 = vpop.f32.mrf.mxu0  ;;  %v1201_v43 = vpop.f32.mrf.mxu1 }
 0x1d5   : > { %3895 = vst [vmem:[#allocation18_spill] sm:$0xff] %v3570_v23  ;;  %v3572_v44 = vadd.f32 %v1201_v43, %v912_v39 }
 0x1d6   : > { %v2826_v46 = vpop.f32.mrf.mxu0  ;;  %v2862_v41 = vpop.f32.mrf.mxu1 }
 0x1d7   : > { %3896 = vst [vmem:[#allocation19_spill] sm:$0xff] %v3572_v44  ;;  %v3574_v47 = vadd.f32 %v2862_v41, %v2826_v46 }
 0x1d8   : > { %v915_v48 = vpop.f32.mrf.mxu0  ;;  %v1204_v50 = vpop.f32.mrf.mxu1 }
 0x1d9   : > { %3897 = vst [vmem:[#allocation20_spill] sm:$0xff] %v3574_v47  ;;  %v3576_v51 = vadd.f32 %v1204_v50, %v915_v48 }
 0x1da   : > { %v2829_v9 = vpop.f32.mrf.mxu0  ;;  %v2865_v53 = vpop.f32.mrf.mxu1 }
 0x1db   : > { %3898 = vst [vmem:[#allocation21_spill] sm:$0xff] %v3576_v51  ;;  %v3578_v55 = vadd.f32 %v2865_v53, %v2829_v9 }
 0x1dc   : > { %v928_v56 = vpop.f32.mrf.mxu0  ;;  %v1217_v58 = vpop.f32.mrf.mxu1 }
 0x1dd   : > { %3899 = vst [vmem:[#allocation22_spill] sm:$0xff] %v3578_v55  ;;  %v3580_v59 = vadd.f32 %v1217_v58, %v928_v56 }
 0x1de   : > { %v3582_v61 = vpop.f32.mrf.mxu0  ;;  %v3584_v62 = vpop.f32.mrf.mxu1 }
 0x1df   : > { %3900 = vst [vmem:[#allocation23_spill] sm:$0xff] %v3580_v59 }
 0x1e0   : > { %v3586_v2 = vpop.f32.mrf.mxu0  ;;  %v3588_v3 = vpop.f32.mrf.mxu1 }
 0x1e2   : > { %v2873_v5 = vpop.f32.mrf.mxu0  ;;  %v3590_v6 = vpop.f32.mrf.mxu1 }
 0x1e3   : > { %v3593_v8 = vadd.f32 %v2873_v5, %v3522_v27 }
 0x1e4   : > { %v1458_v10 = vpop.f32.mrf.mxu0  ;;  %v3595_v12 = vpop.f32.mrf.mxu1 }
 0x1e5   : > { %v3598_v13 = vadd.f32 %v1458_v10, %v3524_v32 }
 0x1e6   : > { %v2874_v15 = vpop.f32.mrf.mxu0  ;;  %v3600_v17 = vpop.f32.mrf.mxu1 }
 0x1e7   : > { %v3603_v19 = vadd.f32 %v2874_v15, %v3526_v24  ;;  %v3648_v11 = vadd.f32 %v3595_v12, %v3598_v13 }
 0x1e8   : > { %v1461_v20 = vpop.f32.mrf.mxu0  ;;  %v3605_v26 = vpop.f32.mrf.mxu1 }
 0x1e9   : > { %v3608_v28 = vadd.f32 %v1461_v20, %v3528_v34  ;;  %3910 = vst [vmem:[#allocation33_spill] sm:$0xff] %v3648_v11 }
 0x1ea   : > { %v2877_v27 = vpop.f32.mrf.mxu0  ;;  %v3610_v33 = vpop.f32.mrf.mxu1 }
 0x1eb   : > { %v3613_v0 = vadd.f32 %v2877_v27, %v3530_v36 }
 0x1ec   : > { %v1474_v32 = vpop.f32.mrf.mxu0  ;;  %v3615_v29 = vpop.f32.mrf.mxu1 }
 0x1ed   : > { %3901 = vst [vmem:[#allocation24_spill] sm:$0xff] %v3615_v29  ;;  %v1589_v63 = vadd.f32 %v1474_v32, %v3532_v22 }
 0x1ee   : > { %v2878_v37 = vpop.f32.mrf.mxu0  ;;  %v2914_v24 = vpop.f32.mrf.mxu1 }
 0x1ef   : > { %v1592_v38 = vadd.f32 %v2878_v37, %v3534_v40 }
 0x1f0   : > { %v1477_v39 = vpop.f32.mrf.mxu0  ;;  %v1862_v43 = vpop.f32.mrf.mxu1 }
 0x1f1   : > { %v1590_v34 = vadd.f32 %v1477_v39, %v3536_v45 }
 0x1f2   : > { %v2881_v46 = vpop.f32.mrf.mxu0  ;;  %v2917_v41 = vpop.f32.mrf.mxu1 }
 0x1f3   : > { %v1595_v48 = vadd.f32 %v2881_v46, %v3538_v42  ;;  %v1975_v13 = vadd.f32 %v1862_v43, %v1590_v34  ;;  %v3916_v43 = vld [vmem:[#allocation14_spill] sm:$0xff] }
 0x1f4   : > { %v1490_v50 = vpop.f32.mrf.mxu0  ;;  %v1875_v36 = vpop.f32.mrf.mxu1 }
 0x1f5   : > { %v1593_v9 = vadd.f32 %v1490_v50, %v3540_v49 }
 0x1f6   : > { %v2882_v53 = vpop.f32.mrf.mxu0  ;;  %v2918_v56 = vpop.f32.mrf.mxu1 }
 0x1f8   : > { %v1493_v58 = vpop.f32.mrf.mxu0  ;;  %v1878_v22 = vpop.f32.mrf.mxu1 }
 0x1fa   : > { %v2885_v5 = vpop.f32.mrf.mxu0  ;;  %v2921_v10 = vpop.f32.mrf.mxu1 }
 0x1fb   : > { %v1599_v7 = vadd.f32 %v2885_v5, %v3546_v57  ;;  %v1977_v57 = vadd.f32 %v2914_v24, %v1592_v38  ;;  %v3915_v24 = vld [vmem:[#allocation13_spill] sm:$0xff] }
 0x1fc   : > { %v1506_v15 = vpop.f32.mrf.mxu0  ;;  %v1891_v40 = vpop.f32.mrf.mxu1 }
 0x1fe   : > { %v2886_v20 = vpop.f32.mrf.mxu0  ;;  %v2922_v27 = vpop.f32.mrf.mxu1 }
 0x200   : > { %v1509_v32 = vpop.f32.mrf.mxu0  ;;  %v1894_v45 = vpop.f32.mrf.mxu1 }
 0x202   : > { %v2889_v37 = vpop.f32.mrf.mxu0  ;;  %v2925_v39 = vpop.f32.mrf.mxu1 }
 0x204   : > { %v1522_v30 = vpop.f32.mrf.mxu0  ;;  %v3622_v42 = vpop.f32.mrf.mxu1 }
 0x205   : > { %3902 = vst [vmem:[#allocation25_spill] sm:$0xff] %v3622_v42 }
 0x206   : > { %v2890_v46 = vpop.f32.mrf.mxu0  ;;  %v3624_v16 = vpop.f32.mrf.mxu1 }
 0x207   : > { %3903 = vst [vmem:[#allocation26_spill] sm:$0xff] %v3624_v16  ;;  %v1229_v16 = vadd.f32 %v3584_v62, %v3582_v61  ;;  %v1597_v61 = vadd.f32 %v1506_v15, %v3548_v60  ;;  %v1600_v62 = vadd.f32 %v2886_v20, %v3550_v1  ;;  %v1980_v60 = vadd.f32 %v2917_v41, %v1595_v48  ;;  %v3912_v20 = vld [vmem:[#allocation10_spill] sm:$0xff]  ;;  %v3917_v41 = vld [vmem:[#allocation15_spill] sm:$0xff] }
 0x208   : > { %v1525_v49 = vpop.f32.mrf.mxu0  ;;  %v3626_v50 = vpop.f32.mrf.mxu1 }
 0x209   : > { %3904 = vst [vmem:[#allocation27_spill] sm:$0xff] %v3626_v50  ;;  %v1602_v38 = vadd.f32 %v1525_v49, %v3915_v24 }
 0x20a   : > { %v2893_v59 = vpop.f32.mrf.mxu0  ;;  %v3628_v55 = vpop.f32.mrf.mxu1 }
 0x20b   : > { %3905 = vst [vmem:[#allocation28_spill] sm:$0xff] %v3628_v55  ;;  %v1221_v55 = vadd.f32 %v3588_v3, %v3586_v2  ;;  %v1973_v3 = vadd.f32 %v3600_v17, %v3603_v19  ;;  %v1603_v17 = vadd.f32 %v2889_v37, %v3912_v20  ;;  %v1984_v19 = vadd.f32 %v2921_v10, %v1599_v7  ;;  %v3920_v7 = vld [vmem:[#allocation18_spill] sm:$0xff]  ;;  %v3923_v37 = vld [vmem:[#allocation21_spill] sm:$0xff] }
 0x20c   : > { %v1538_v51 = vpop.f32.mrf.mxu0  ;;  %v3630_v47 = vpop.f32.mrf.mxu1  ;;  %v1607_v34 = vadd.f32 %v2893_v59, %v3916_v43  ;;  %v3924_v49 = vld [vmem:[#allocation25_spill] sm:$0xff]  ;;  %v3925_v59 = vld [vmem:[#allocation22_spill] sm:$0xff] }
 0x20d   : > { %3906 = vst [vmem:[#allocation29_spill] sm:$0xff] %v3630_v47  ;;  %v3642_v47 = vadd.f32 %v3590_v6, %v3593_v8  ;;  %v1598_v6 = vadd.f32 %v1509_v32, %v3552_v4  ;;  %v3911_v8 = vld [vmem:[#allocation24_spill] sm:$0xff]  ;;  %v1605_v48 = vadd.f32 %v1538_v51, %v3917_v41  ;;  %v1988_v10 = vadd.f32 %v2925_v39, %v1603_v17  ;;  %v3926_v51 = vld [vmem:[#allocation23_spill] sm:$0xff] }
 0x20e   : > { %v2894_v44 = vpop.f32.mrf.mxu0  ;;  %v3632_v23 = vpop.f32.mrf.mxu1  ;;  %v1974_v12 = vadd.f32 %v3911_v8, %v1589_v63  ;;  %v3914_v32 = vld [vmem:[#allocation12_spill] sm:$0xff] }
 0x20f   : > { %3907 = vst [vmem:[#allocation30_spill] sm:$0xff] %v3632_v23  ;;  %3909 = vst [vmem:[#allocation32_spill] sm:$0xff] %v3642_v47  ;;  %v1596_v23 = vadd.f32 %v2882_v53, %v3542_v52  ;;  %v1971_v52 = vadd.f32 %v3605_v26, %v3608_v28  ;;  %v1982_v47 = vadd.f32 %v1891_v40, %v1597_v61  ;;  %v3913_v28 = vld [vmem:[#allocation11_spill] sm:$0xff] }
 0x210   : > { %v1541_v35 = vpop.f32.mrf.mxu0  ;;  %v3634_v25 = vpop.f32.mrf.mxu1  ;;  %v1985_v26 = vadd.f32 %v2922_v27, %v1600_v62  ;;  %v1601_v11 = vadd.f32 %v1522_v30, %v3913_v28  ;;  %v1983_v4 = vadd.f32 %v1894_v45, %v1598_v6  ;;  %v1604_v63 = vadd.f32 %v2890_v46, %v3914_v32  ;;  %v3921_v30 = vld [vmem:[#allocation19_spill] sm:$0xff]  ;;  %v3922_v27 = vld [vmem:[#allocation20_spill] sm:$0xff] }
 0x211   : > { %3908 = vst [vmem:[#allocation31_spill] sm:$0xff] %v3634_v25  ;;  %v1594_v25 = vadd.f32 %v1493_v58, %v3544_v54  ;;  %v1976_v54 = vadd.f32 %v3610_v33, %v3613_v0  ;;  %v1978_v58 = vadd.f32 %v1875_v36, %v1593_v9  ;;  %v1981_v5 = vadd.f32 %v2918_v56, %v1596_v23  ;;  %v3918_v23 = vld [vmem:[#allocation16_spill] sm:$0xff]  ;;  %v3919_v36 = vld [vmem:[#allocation17_spill] sm:$0xff] }
 0x212   : > { %v2897_v31 = vpop.f32.mrf.mxu0  ;;  %v2933_v42 = vpop.f32.mrf.mxu1  ;;  %v1606_v9 = vadd.f32 %v1541_v35, %v3919_v36  ;;  %v1986_v62 = vadd.f32 %v3924_v49, %v1601_v11  ;;  %v3927_v35 = vld [vmem:[#allocation26_spill] sm:$0xff]  ;;  %v3929_v39 = vld [vmem:[#allocation28_spill] sm:$0xff]  ;;  %v3935_v49 = vld [vmem:[#allocation33_spill] sm:$0xff] }
 0x213   : > { %v1979_v15 = vadd.f32 %v1878_v22, %v1594_v25  ;;  %v1608_v25 = vadd.f32 %v2894_v44, %v3918_v23  ;;  %v1611_v56 = vadd.f32 %v2897_v31, %v3920_v7  ;;  %v1989_v28 = vadd.f32 %v3927_v35, %v1604_v63  ;;  %v3928_v31 = vld [vmem:[#allocation27_spill] sm:$0xff] }
 0x214   : > { %v1554_v21 = vpop.f32.mrf.mxu0  ;;  %v1939_v18 = vpop.f32.mrf.mxu1  ;;  %v1987_v32 = vadd.f32 %v3928_v31, %v1602_v38  ;;  %v1992_v17 = vadd.f32 %v3929_v39, %v1607_v34  ;;  %v3930_v24 = vld [vmem:[#allocation29_spill] sm:$0xff] }
 0x215   : > { %v1609_v40 = vadd.f32 %v1554_v21, %v3921_v30  ;;  %v1996_v11 = vadd.f32 %v2933_v42, %v1611_v56 }
 0x216   : > { %v2898_v50 = vpop.f32.mrf.mxu0  ;;  %v2934_v14 = vpop.f32.mrf.mxu1  ;;  %v3931_v43 = vld [vmem:[#allocation30_spill] sm:$0xff] }
 0x217   : > { %v1612_v45 = vadd.f32 %v2898_v50, %v3922_v27  ;;  %v1990_v50 = vadd.f32 %v3930_v24, %v1605_v48 }
 0x218   : > { %v1557_v29 = vpop.f32.mrf.mxu0  ;;  %v1942_v2 = vpop.f32.mrf.mxu1  ;;  %v3932_v41 = vld [vmem:[#allocation31_spill] sm:$0xff] }
 0x219   : > { %v1610_v46 = vadd.f32 %v1557_v29, %v3923_v37  ;;  %v1993_v29 = vadd.f32 %v3931_v43, %v1608_v25  ;;  %v1991_v23 = vadd.f32 %v3932_v41, %v1606_v9  ;;  %v1997_v7 = vadd.f32 %v2934_v14, %v1612_v45  ;;  %v3936_v25 = vld [vmem:[#allocation32_spill] sm:$0xff] }
 0x21a   : > { %v2901_v53 = vpop.f32.mrf.mxu0  ;;  %v2937_v1 = vpop.f32.mrf.mxu1 }
 0x21b   : > { %v1615_v6 = vadd.f32 %v2901_v53, %v3925_v59  ;;  %v1994_v53 = vadd.f32 %v1939_v18, %v1609_v40 }
 0x21c   : > { %v1570_v33 = vpop.f32.mrf.mxu0  ;;  %v1955_v0 = vpop.f32.mrf.mxu1 }
 0x21d   : > { %v1613_v8 = vadd.f32 %v1570_v33, %v3926_v51  ;;  %v1995_v33 = vadd.f32 %v1942_v2, %v1610_v46  ;;  %v2000_v27 = vadd.f32 %v2937_v1, %v1615_v6 }
 0x21e   : > { %v2902_v22 = vpop.f32.mrf.mxu0  ;;  %v2938_v61 = vpop.f32.mrf.mxu1 }
 0x21f   : > { %v1616_v44 = vadd.f32 %v2902_v22, %v1229_v16  ;;  %v3933_v22 = vld [vmem:[#allocation9_spill] sm:$0xff]  ;;  %v1998_v38 = vadd.f32 %v1955_v0, %v1613_v8 }
 0x220   : > { %v1573_v20 = vpop.f32.mrf.mxu0  ;;  %v1958_v16 = vpop.f32.mrf.mxu1  ;;  %v3934_v30 = vsub.s32 0, %v3933_v22 }
 0x221   : > { %v1614_v21 = vadd.f32 %v1573_v20, %v1221_v55  ;;  %v2001_v37 = vadd.f32 %v2938_v61, %v1616_v44 }
 0x222   : > { %v2074_v36 = vpop.f32.mrf.mxu0 }
 0x223   : > { %v2083_v63 = vrot.slane %v2074_v36, %v3934_v30  ;;  %v1999_v34 = vadd.f32 %v1958_v16, %v1614_v21  ;;  %v2610_v30 = vld [vmem:[%s3873_s8] ss:$0 sm:$0xff] }
 0x224   : > { %v2945_v55 = vpop.f32.mrf.mxu0 }
 0x225   : > { %v2084_v48 = vadd.f32 %v2083_v63, %v3935_v49  ;;  %v2085_v59 = vadd.f32 %v2083_v63, %v1971_v52  ;;  %v2086_v51 = vadd.f32 %v2083_v63, %v3936_v25  ;;  %v2087_v9 = vadd.f32 %v2083_v63, %v1973_v3  ;;  %v2609_v3 = vld [vmem:[%s3872_s7] ss:$0 sm:$0xff] }
 0x226   : > { %v2088_v42 = vadd.f32 %v2083_v63, %v1974_v12  ;;  %v2089_v56 = vadd.f32 %v2083_v63, %v1975_v13  ;;  %v2090_v18 = vadd.f32 %v2083_v63, %v1976_v54  ;;  %v2091_v14 = vadd.f32 %v2083_v63, %v1977_v57  ;;  %v2077_v2 = vpop.f32.mrf.mxu0 }
 0x227   : > { %v2092_v40 = vadd.f32 %v2083_v63, %v1978_v58  ;;  %v2093_v45 = vadd.f32 %v2083_v63, %v1979_v15  ;;  %v2094_v46 = vadd.f32 %v2083_v63, %v1980_v60  ;;  %v2095_v20 = vadd.f32 %v2083_v63, %v1981_v5 }
 0x228   : > { %v2096_v1 = vadd.f32 %v2083_v63, %v1982_v47  ;;  %v2097_v0 = vadd.f32 %v2083_v63, %v1983_v4  ;;  %v2098_v61 = vadd.f32 %v2083_v63, %v1984_v19  ;;  %v2099_v6 = vadd.f32 %v2083_v63, %v1985_v26  ;;  %v2946_v8 = vpop.f32.mrf.mxu0 }
 0x229   : > { %v2100_v44 = vadd.f32 %v2083_v63, %v1986_v62  ;;  %v2101_v35 = vadd.f32 %v2083_v63, %v1987_v32  ;;  %v2102_v52 = vadd.f32 %v2083_v63, %v1988_v10  ;;  %v2103_v31 = vadd.f32 %v2083_v63, %v1989_v28 }
 0x22a   : > { %v2104_v54 = vadd.f32 %v2083_v63, %v1990_v50  ;;  %v2105_v12 = vadd.f32 %v2083_v63, %v1991_v23  ;;  %v2106_v57 = vadd.f32 %v2083_v63, %v1992_v17  ;;  %v2107_v13 = vadd.f32 %v2083_v63, %v1993_v29 }
 0x22b   : > { %v2108_v58 = vadd.f32 %v2083_v63, %v1994_v53  ;;  %v2109_v60 = vadd.f32 %v2083_v63, %v1995_v33  ;;  %v2110_v5 = vadd.f32 %v2083_v63, %v1996_v11  ;;  %v2111_v47 = vadd.f32 %v2083_v63, %v1997_v7 }
 0x22c   : > { %v2112_v15 = vadd.f32 %v2083_v63, %v1998_v38  ;;  %v2113_v19 = vadd.f32 %v2083_v63, %v1999_v34  ;;  %v2114_v26 = vadd.f32 %v2083_v63, %v2000_v27  ;;  %v2115_v4 = vadd.f32 %v2083_v63, %v2001_v37 }
 0x22d   : > { %v2123_v62 = vmul.f32 %v2609_v3, %v2084_v48  ;;  %v2124_v32 = vmul.f32 %v2609_v3, %v2085_v59  ;;  %v2125_v10 = vmul.f32 %v2609_v3, %v2086_v51  ;;  %v2126_v28 = vmul.f32 %v2609_v3, %v2087_v9 }
 0x22e   : > { %v2127_v39 = vmul.f32 %v2609_v3, %v2088_v42  ;;  %v2128_v21 = vmul.f32 %v2609_v3, %v2089_v56  ;;  %v2129_v24 = vmul.f32 %v2609_v3, %v2090_v18  ;;  %v2130_v43 = vmul.f32 %v2609_v3, %v2091_v14 }
 0x22f   : > { %v2131_v50 = vmul.f32 %v2609_v3, %v2092_v40  ;;  %v2132_v41 = vmul.f32 %v2609_v3, %v2093_v45  ;;  %v2133_v17 = vmul.f32 %v2609_v3, %v2094_v46  ;;  %v2134_v29 = vmul.f32 %v2609_v3, %v2095_v20 }
 0x230   : > { %v2135_v23 = vmul.f32 %v2609_v3, %v2096_v1  ;;  %v2136_v36 = vmul.f32 %v2609_v3, %v2097_v0  ;;  %v2137_v11 = vmul.f32 %v2609_v3, %v2098_v61  ;;  %v2138_v53 = vmul.f32 %v2609_v3, %v2099_v6 }
 0x231   : > { %v2139_v7 = vmul.f32 %v2609_v3, %v2100_v44  ;;  %v2140_v33 = vmul.f32 %v2609_v3, %v2101_v35  ;;  %v2141_v16 = vmul.f32 %v2609_v3, %v2102_v52  ;;  %v2142_v22 = vmul.f32 %v2609_v3, %v2103_v31 }
 0x232   : > { %v2143_v63 = vmul.f32 %v2609_v3, %v2104_v54  ;;  %v2144_v27 = vmul.f32 %v2609_v3, %v2105_v12  ;;  %v2145_v38 = vmul.f32 %v2609_v3, %v2106_v57  ;;  %v2146_v37 = vmul.f32 %v2609_v3, %v2107_v13 }
 0x233   : > { %v2147_v34 = vmul.f32 %v2609_v3, %v2108_v58  ;;  %v2148_v55 = vmul.f32 %v2609_v3, %v2109_v60  ;;  %v2149_v49 = vmul.f32 %v2609_v3, %v2110_v5  ;;  %v2150_v48 = vmul.f32 %v2609_v3, %v2111_v47 }
 0x234   : > { %v2151_v59 = vmul.f32 %v2609_v3, %v2112_v15  ;;  %v2152_v25 = vmul.f32 %v2609_v3, %v2113_v19  ;;  %v2153_v51 = vmul.f32 %v2609_v3, %v2114_v26  ;;  %v2154_v9 = vmul.f32 %v2609_v3, %v2115_v4 }
 0x235   : > { %v2162_v42 = vadd.f32 %v2610_v30, %v2123_v62  ;;  %v2163_v56 = vadd.f32 %v2610_v30, %v2124_v32  ;;  %v2164_v18 = vadd.f32 %v2610_v30, %v2125_v10  ;;  %v2165_v14 = vadd.f32 %v2610_v30, %v2126_v28 }
 0x236   : > { %v2166_v2 = vadd.f32 %v2610_v30, %v2127_v39  ;;  %v2167_v40 = vadd.f32 %v2610_v30, %v2128_v21  ;;  %v2168_v45 = vadd.f32 %v2610_v30, %v2129_v24  ;;  %v2169_v46 = vadd.f32 %v2610_v30, %v2130_v43 }
 0x237   : > { %v2170_v20 = vadd.f32 %v2610_v30, %v2131_v50  ;;  %v2171_v1 = vadd.f32 %v2610_v30, %v2132_v41  ;;  %v2172_v0 = vadd.f32 %v2610_v30, %v2133_v17  ;;  %v2173_v61 = vadd.f32 %v2610_v30, %v2134_v29 }
 0x238   : > { %v2174_v6 = vadd.f32 %v2610_v30, %v2135_v23  ;;  %v2175_v8 = vadd.f32 %v2610_v30, %v2136_v36  ;;  %v2176_v44 = vadd.f32 %v2610_v30, %v2137_v11  ;;  %v2177_v35 = vadd.f32 %v2610_v30, %v2138_v53 }
 0x239   : > { %v3695_v52 = vadd.f32 %v2610_v30, %v2139_v7  ;;  %v3697_v31 = vadd.f32 %v2610_v30, %v2140_v33  ;;  %v3699_v3 = vadd.f32 %v2610_v30, %v2141_v16  ;;  %v3701_v54 = vadd.f32 %v2610_v30, %v2142_v22 }
 0x23a   : > { %v3703_v12 = vadd.f32 %v2610_v30, %v2143_v63  ;;  %v3705_v57 = vadd.f32 %v2610_v30, %v2144_v27  ;;  %v3707_v13 = vadd.f32 %v2610_v30, %v2145_v38  ;;  %v3709_v58 = vadd.f32 %v2610_v30, %v2146_v37 }
 0x23b   : > { %v3711_v60 = vadd.f32 %v2610_v30, %v2147_v34  ;;  %v3713_v5 = vadd.f32 %v2610_v30, %v2148_v55  ;;  %v3715_v47 = vadd.f32 %v2610_v30, %v2149_v49  ;;  %v3717_v15 = vadd.f32 %v2610_v30, %v2150_v48 }
 0x23c   : > { %v3719_v19 = vadd.f32 %v2610_v30, %v2151_v59  ;;  %v3721_v26 = vadd.f32 %v2610_v30, %v2152_v25  ;;  %v3723_v4 = vadd.f32 %v2610_v30, %v2153_v51  ;;  %v3725_v62 = vadd.f32 %v2610_v30, %v2154_v9 }
 0x23d   : > { %v2194_v32 = vmax.f32 %v2162_v42, 0.0  ;;  %v2195_v10 = vmax.f32 %v2163_v56, 0.0  ;;  %v2196_v28 = vmax.f32 %v2164_v18, 0.0  ;;  %v2197_v39 = vmax.f32 %v2165_v14, 0.0 }
 0x23e   : > { %v2198_v21 = vmax.f32 %v2166_v2, 0.0  ;;  %v2199_v24 = vmax.f32 %v2167_v40, 0.0  ;;  %v2200_v43 = vmax.f32 %v2168_v45, 0.0  ;;  %v2201_v50 = vmax.f32 %v2169_v46, 0.0 }
 0x23f   : > { %v2202_v41 = vmax.f32 %v2170_v20, 0.0  ;;  %v2203_v17 = vmax.f32 %v2171_v1, 0.0  ;;  %v2204_v29 = vmax.f32 %v2172_v0, 0.0  ;;  %v2205_v23 = vmax.f32 %v2173_v61, 0.0  ;;  %2226 = vst.msk [vmem:[%s3727_s25] sm:$0xff] %vm733_vm1, %v2194_v32  ;;  %2227 = vst.msk [vmem:[%s3727_s25 + $0x8] sm:$0xff] %vm733_vm1, %v2195_v10 }
 0x240   : > { %2228 = vst.msk [vmem:[%s3727_s25 + $0x10] sm:$0xff] %vm733_vm1, %v2196_v28  ;;  %2229 = vst.msk [vmem:[%s3727_s25 + $0x18] sm:$0xff] %vm733_vm1, %v2197_v39  ;;  %v2206_v36 = vmax.f32 %v2174_v6, 0.0  ;;  %v2207_v11 = vmax.f32 %v2175_v8, 0.0  ;;  %v2208_v53 = vmax.f32 %v2176_v44, 0.0  ;;  %v2209_v7 = vmax.f32 %v2177_v35, 0.0 }
 0x241   : > { %2230 = vst.msk [vmem:[%s3727_s25 + $0x20] sm:$0xff] %vm733_vm1, %v2198_v21  ;;  %2231 = vst.msk [vmem:[%s3727_s25 + $0x28] sm:$0xff] %vm733_vm1, %v2199_v24  ;;  %v2210_v33 = vmax.f32 %v3695_v52, 0.0  ;;  %v2211_v16 = vmax.f32 %v3697_v31, 0.0  ;;  %v2212_v22 = vmax.f32 %v3699_v3, 0.0  ;;  %v2213_v30 = vmax.f32 %v3701_v54, 0.0 }
 0x242   : > { %2232 = vst.msk [vmem:[%s3727_s25 + $0x30] sm:$0xff] %vm733_vm1, %v2200_v43  ;;  %2233 = vst.msk [vmem:[%s3727_s25 + $0x38] sm:$0xff] %vm733_vm1, %v2201_v50  ;;  %v2214_v63 = vmax.f32 %v3703_v12, 0.0  ;;  %v2215_v27 = vmax.f32 %v3705_v57, 0.0  ;;  %v2216_v38 = vmax.f32 %v3707_v13, 0.0  ;;  %v2217_v37 = vmax.f32 %v3709_v58, 0.0 }
 0x243   : > { %2234 = vst.msk [vmem:[%s3727_s25 + $0x40] sm:$0xff] %vm733_vm1, %v2202_v41  ;;  %2235 = vst.msk [vmem:[%s3727_s25 + $0x48] sm:$0xff] %vm733_vm1, %v2203_v17  ;;  %v2218_v34 = vmax.f32 %v3711_v60, 0.0  ;;  %v2219_v55 = vmax.f32 %v3713_v5, 0.0  ;;  %v2220_v49 = vmax.f32 %v3715_v47, 0.0  ;;  %v2221_v48 = vmax.f32 %v3717_v15, 0.0 }
 0x244   : > { %2236 = vst.msk [vmem:[%s3727_s25 + $0x50] sm:$0xff] %vm733_vm1, %v2204_v29  ;;  %2237 = vst.msk [vmem:[%s3727_s25 + $0x58] sm:$0xff] %vm733_vm1, %v2205_v23  ;;  %v2222_v59 = vmax.f32 %v3719_v19, 0.0  ;;  %v2223_v25 = vmax.f32 %v3721_v26, 0.0  ;;  %v2224_v51 = vmax.f32 %v3723_v4, 0.0  ;;  %v2225_v9 = vmax.f32 %v3725_v62, 0.0 }
 0x245   : > { %2238 = vst.msk [vmem:[%s3727_s25 + $0x60] sm:$0xff] %vm733_vm1, %v2206_v36  ;;  %2239 = vst.msk [vmem:[%s3727_s25 + $0x68] sm:$0xff] %vm733_vm1, %v2207_v11 }
 0x246   : > { %2240 = vst.msk [vmem:[%s3727_s25 + $0x70] sm:$0xff] %vm733_vm1, %v2208_v53  ;;  %2241 = vst.msk [vmem:[%s3727_s25 + $0x78] sm:$0xff] %vm733_vm1, %v2209_v7 }
 0x247   : > { %2242 = vst.msk [vmem:[%s3727_s25 + $0x80] sm:$0xff] %vm733_vm1, %v2210_v33  ;;  %2243 = vst.msk [vmem:[%s3727_s25 + $0x88] sm:$0xff] %vm733_vm1, %v2211_v16 }
 0x248   : > { %2244 = vst.msk [vmem:[%s3727_s25 + $0x90] sm:$0xff] %vm733_vm1, %v2212_v22  ;;  %2245 = vst.msk [vmem:[%s3727_s25 + $0x98] sm:$0xff] %vm733_vm1, %v2213_v30 }
 0x249   : > { %2246 = vst.msk [vmem:[%s3727_s25 + $0xa0] sm:$0xff] %vm733_vm1, %v2214_v63  ;;  %2247 = vst.msk [vmem:[%s3727_s25 + $0xa8] sm:$0xff] %vm733_vm1, %v2215_v27 }
 0x24a   : > { %2248 = vst.msk [vmem:[%s3727_s25 + $0xb0] sm:$0xff] %vm733_vm1, %v2216_v38  ;;  %2249 = vst.msk [vmem:[%s3727_s25 + $0xb8] sm:$0xff] %vm733_vm1, %v2217_v37 }
 0x24b   : > { %2250 = vst.msk [vmem:[%s3727_s25 + $0xc0] sm:$0xff] %vm733_vm1, %v2218_v34  ;;  %2251 = vst.msk [vmem:[%s3727_s25 + $0xc8] sm:$0xff] %vm733_vm1, %v2219_v55 }
 0x24c   : > { %2252 = vst.msk [vmem:[%s3727_s25 + $0xd0] sm:$0xff] %vm733_vm1, %v2220_v49  ;;  %2253 = vst.msk [vmem:[%s3727_s25 + $0xd8] sm:$0xff] %vm733_vm1, %v2221_v48 }
 0x24d   : > { %2254 = vst.msk [vmem:[%s3727_s25 + $0xe0] sm:$0xff] %vm733_vm1, %v2222_v59  ;;  %2255 = vst.msk [vmem:[%s3727_s25 + $0xe8] sm:$0xff] %vm733_vm1, %v2223_v25 }
 0x24e   : > { %2256 = vst.msk [vmem:[%s3727_s25 + $0xf0] sm:$0xff] %vm733_vm1, %v2224_v51  ;;  %2257 = vst.msk [vmem:[%s3727_s25 + $0xf8] sm:$0xff] %vm733_vm1, %v2225_v9 }
 0x24f   : > { %3087 = shalt.err (!%p3084_p5)
}
 0x250   : > { %s3088_s13 = scalar_lea.hbm %s3786_s22, 4096  ;;  %s3092_s26 = scalar_lea.hbm %s3874_s9, 8192 }
 0x251   : > { %p3089_p6 = scmp.ne.s32.totalorder %s3786_s22, %s3088_s13  ;;  %p3093_p10 = scmp.lt.s32.totalorder %s3786_s22, %s3874_s9 }
 0x252   : > { %p3094_p11 = scmp.lt.s32.totalorder %s3092_s26, %s3088_s13 }
 0x253   : > { %p3090_p7 = pnand %p3089_p6, %p3247_p4 }
 0x254   : > { %p3095_p12 = por %p3094_p11, %p3093_p10 }
 0x255   : > { %p3091_p9 = pneg %p3090_p7 }
 0x257   : > { %p3096_p13 = pnand %p3095_p12, %p3091_p9 }
 0x259   : > { %3099 = shalt.err (!%p3096_p13)
}
 0x25a   : > { %s3155_s15 = smov 128   ;;  %s3156_s12 = smov 8  }
 0x25b   : > { %2947 = dma.vmem_to_hbm [thread:$0]  (%p3247_p4), %s3788_s11, 4096, %s3786_s22, %s3820_s23, %s3155_s15, %s3155_s15, %s3156_s12  }
 0x25c PF: > { %p2953_p0 = scmp.ge.s32.totalorder %s3150_s14, 2  ;;  %s2289_s17 = sand.u32 1, %s3130_s30  }
 0x25d   : > { %s2290_s24 = scalar_lea.sflag [#allocation3], %s2289_s17 }
 0x25e   : > { %p2950_p1 = pnand %p2953_p0, %p3254_p8 }
 0x260   : > { %p2951_p2 = pneg %p2950_p1 }
 0x262   : > { %3125 = dma.done.wait (%p2951_p2), %s2290_s24, 4096  }
 0x263   : > { %3127 = vsyncadd (%p2951_p2), %s2290_s24, 4294963200  ;;  %s22_s14 = sadd.s32 1, %s3150_s14   ;;  %s3937_s16 = sld [smem:[#allocation5_spill]] }
 0x264   : > { %p19_p3 = scmp.ge.s32.totalorder %s22_s14, 4   ;;  %s3938_s11 = sld [smem:[#allocation8_spill]] }
 0x265   : > { %s3939_s12 = sld [smem:[#allocation6_spill]]  ;;  %s3941_s30 = smov %s3134_s10 }
 0x266   : > { %s3940_s13 = sld [smem:[#allocation7_spill]]  ;;  %21 = sbr.rel (!%p19_p3) target bundleno = 4 (0x4), region = 115 }
 0x269   : > { %s3942_s10 = smov %s3937_s16 }
 0x26b   :  { %2295 = vsyncpa [#allocation3], 1 }
 0x26c   :  { %2297 = vsyncpa [#allocation3 + $0x1], 1 }

</bundles_post_ra>
